<compile_context>
chip_gen: v5e
topology: v5e:2x2
jax: 0.10.0
libtpu: 0.0.40
codegen_flags: <defaults>
</compile_context>

<pallas_src>
import jax
import jax.numpy as jnp
from jax.experimental import pallas as pl
from jax.experimental.pallas import tpu as pltpu


def _round_up(x, m):
    return (x + m - 1) // m * m


def _cdiv(a, b):
    return -(-a // b)


# --------------------------------------------------------------------------- #
# Kernel
# --------------------------------------------------------------------------- #
def gen_kernel(x_ref, w1_ref, t1_ref, w2_ref, t2_ref, w3_ref, b3_ref, out_ref):
    """One (batch-tile, out-column-tile) block of the fused Gen MLP.

    x_ref : (TILE_M, feat_dim)  weight-dtype (bf16) activations
    wN    : weight-dtype weights with the BN scale folded into their columns
    tN,b3 : (1, N) f32 per-feature shifts / bias
    out   : (TILE_M, TILE_N) output tile (lane-dense, multiple of 128 wide)
    """
    wdt = w1_ref.dtype
    x = x_ref[...]                                   # already weight dtype

    # fc_1 (+ folded BN scale) -> shift -> ReLU
    h1 = jnp.dot(x, w1_ref[...], preferred_element_type=jnp.float32)
    h1 = jnp.maximum(h1 + t1_ref[...], 0.0)
    # drop_1: identity in eval mode
    # TODO(synk): training-mode Dropout(0.5) would need pltpu.prng_seed/prng_random_bits masks

    # fc_2 (+ folded BN scale) -> shift -> ReLU
    h2 = jnp.dot(h1.astype(wdt), w2_ref[...], preferred_element_type=jnp.float32)
    h2 = jnp.maximum(h2 + t2_ref[...], 0.0)
    # drop_2: identity in eval mode

    # fc_3 + bias for this column tile (TILE_N is a multiple of 128 -> unmasked stores)
    out = jnp.dot(h2.astype(wdt), w3_ref[...], preferred_element_type=jnp.float32)
    out_ref[...] = (out + b3_ref[...]).astype(out_ref.dtype)


# --------------------------------------------------------------------------- #
# Wrapper: prepare weights once, return a jitted forward(x)
# --------------------------------------------------------------------------- #
def make_gen_forward(params, feat_dim, num_points, *, eps=1e-5,
                     weight_dtype=jnp.bfloat16, out_dtype=jnp.float32,
                     tile_m=None, tile_n=2048, single_buffer_weights=True,
                     interpret=False):
    """Folds BN + casts + pads the weights ONCE and returns fn(x)->(B,P,3)."""
    p = params
    out_dim = num_points * 3

    # ---- fold BatchNorm1d (eval mode, real running stats) into the linears ----
    # (x@W + b - mean)*g/sqrt(var+eps) + beta == x@(W*scale) + ((b-mean)*scale + beta)
    def fold(w, b, gamma, beta, mean, var):
        scale = gamma / jnp.sqrt(var + eps)                      # (N,)
        w_s = (w * scale[None, :]).astype(weight_dtype)          # scale into columns
        shift = ((b - mean) * scale + beta).astype(jnp.float32)
        return w_s, shift.reshape(1, -1)

    # ---- output (N3) tiling: lane-dense, few tiles so fc_1/fc_2 recompute is bounded
    TILE_N = int(min(tile_n, _round_up(out_dim, 128)))           # multiple of 128
    N3 = _round_up(out_dim, TILE_N)
    num_n = N3 // TILE_N

    w1s, t1 = fold(p["w1"], p["b1"], p["g1"], p["beta1"], p["rm1"], p["rv1"])
    w2s, t2 = fold(p["w2"], p["b2"], p["g2"], p["beta2"], p["rm2"], p["rv2"])
    w3p = jnp.pad(p["w3"].astype(weight_dtype), ((0, 0), (0, N3 - out_dim)))
    b3p = jnp.pad(p["b3"].astype(jnp.float32).reshape(1, -1),
                  ((0, 0), (0, N3 - out_dim)))
    packed = (w1s, t1, w2s, t2, w3p, b3p)
    packed = jax.block_until_ready(packed)   # materialize once, off the hot path

    # ---- generation-aware limits ----
    try:
        info = pltpu.get_tpu_info()
        vmem_phys = int(getattr(info, "vmem_capacity_bytes", 128 << 20))
    except Exception:  # pragma: no cover - CPU / interpret fallback
        vmem_phys = 128 << 20
    if tile_m is None:
        # 512-row tiles on 128 MiB chips (v5e/v6e); 256 on 64 MiB chips (v7x)
        tile_m = 512 if vmem_phys >= (100 << 20) else 256
    tile_m = int(_round_up(tile_m, 8))

    w_it = jnp.dtype(weight_dtype).itemsize
    o_it = jnp.dtype(out_dtype).itemsize
    n_wbuf = 1 if single_buffer_weights else 2

    def wspec(shape):
        # Constant block index -> stays resident in VMEM; single-buffer it so
        # the resident weights don't pay the default 2x pipelining tax.
        if single_buffer_weights:
            return pl.BlockSpec(shape, lambda i, j: (0, 0),
                                pipeline_mode=pl.Buffered(1))
        return pl.BlockSpec(shape, lambda i, j: (0, 0))

    def _forward(x, packed):
        w1s, t1, w2s, t2, w3p, b3p = packed
        B, F = x.shape
        assert F == feat_dim

        # Tight batch tiling: round B to 8, then pick TILE_M dividing B_pad.
        B8 = _round_up(max(B, 1), 8)
        num_i = _cdiv(B8, tile_m)
        TILE_M = _round_up(_cdiv(B8, num_i), 8)
        B_pad = num_i * TILE_M

        # x cast to weight dtype in the wrapper, fused with the batch pad.
        # No K padding: the (TILE_M, feat_dim) block uses the full last dim.
        xp = jnp.pad(x.astype(weight_dtype), ((0, B_pad - B), (0, 0)))

        grid = (num_i, num_n)

        in_specs = [
            pl.BlockSpec((TILE_M, feat_dim), lambda i, j: (i, 0)),   # x tile
            wspec((feat_dim, 512)), wspec((1, 512)),                 # fc_1 (resident)
            wspec((512, 1024)),     wspec((1, 1024)),                # fc_2 (resident)
            pl.BlockSpec((1024, TILE_N), lambda i, j: (0, j)),       # fc_3 col tile
            pl.BlockSpec((1, TILE_N),    lambda i, j: (0, j)),
        ]
        out_specs = pl.BlockSpec((TILE_M, TILE_N), lambda i, j: (i, j))

        # ---- scheduling hints (post bf16-x / no-K-pad / bf16-weight layout) ----
        flops = 2 * B_pad * ((feat_dim * 512 + 512 * 1024) * num_n + 1024 * N3)
        bytes_accessed = (
            B_pad * feat_dim * w_it                                  # x (bf16)
            + (feat_dim * 512 + 512 * 1024) * w_it + (512 + 1024) * 4
            + (1024 * N3 * w_it + N3 * 4) * (num_i if num_n > 1 else 1)
            + B_pad * N3 * o_it)                                     # output writeback
        cost = pl.CostEstimate(flops=int(flops), transcendentals=0,
                               bytes_accessed=int(bytes_accessed))

        resident = ((feat_dim * 512 + 512 * 1024) * w_it + (512 + 1024) * 4) * n_wbuf
        w3_tiles = (1024 * TILE_N * w_it + TILE_N * 4) * 2
        x_tiles = TILE_M * feat_dim * w_it * 2
        out_tiles = TILE_M * TILE_N * o_it * 2
        inter = TILE_M * (512 + 1024) * (4 + w_it) + TILE_M * TILE_N * 4
        vmem_limit = int(min(resident + w3_tiles + x_tiles + out_tiles + inter
                             + (16 << 20),
                             int(0.9 * vmem_phys)))

        out = pl.pallas_call(
            gen_kernel,
            out_shape=jax.ShapeDtypeStruct((B_pad, N3), out_dtype),
            grid=grid,
            in_specs=in_specs,
            out_specs=out_specs,
            compiler_params=pltpu.CompilerParams(
                dimension_semantics=("parallel", "parallel"),
                vmem_limit_bytes=vmem_limit),
            cost_estimate=cost,
            interpret=interpret,
        )(xp, w1s, t1, w2s, t2, w3p, b3p)

        return out[:B, :out_dim].reshape(B, num_points, 3)

    fwd_jit = jax.jit(_forward)
    return lambda x: fwd_jit(x, packed)


# --------------------------------------------------------------------------- #
# Synthetic params + references
# --------------------------------------------------------------------------- #
def init_params(key, feat_dim, num_points):
    """Deterministic synthetic parameters matching the module (incl. BN running stats)."""
    ks = jax.random.split(key, 11)
    out_dim = num_points * 3

    def lin(k, fan_in, fan_out):
        bound = 1.0 / jnp.sqrt(fan_in)
        kw, kb = jax.random.split(k)
        w = jax.random.uniform(kw, (fan_in, fan_out), jnp.float32, -bound, bound)
        b = jax.random.uniform(kb, (fan_out,), jnp.float32, -bound, bound)
        return w, b

    def bn(kg, kb, km, kv, n):
        g = 1.0 + 0.1 * jax.random.normal(kg, (n,), jnp.float32)
        beta = 0.1 * jax.random.normal(kb, (n,), jnp.float32)
        rm = 0.05 * jax.random.normal(km, (n,), jnp.float32)
        rv = jax.random.uniform(kv, (n,), jnp.float32, 0.5, 1.5)
        return g, beta, rm, rv

    w1, b1 = lin(ks[0], feat_dim, 512)
    w2, b2 = lin(ks[1], 512, 1024)
    w3, b3 = lin(ks[2], 1024, out_dim)
    g1, beta1, rm1, rv1 = bn(ks[3], ks[4], ks[5], ks[6], 512)
    g2, beta2, rm2, rv2 = bn(ks[7], ks[8], ks[9], ks[10], 1024)

    return dict(w1=w1, b1=b1, g1=g1, beta1=beta1, rm1=rm1, rv1=rv1,
                w2=w2, b2=b2, g2=g2, beta2=beta2, rm2=rm2, rv2=rv2,
                w3=w3, b3=b3)


def reference_forward(x, params, num_points, eps=1e-5):
    """Pure-JAX eval-mode reference, full f32 (module semantics)."""
    p = params

    def bn(h, g, beta, mean, var):
        return (h - mean) / jnp.sqrt(var + eps) * g + beta

    h1 = jnp.maximum(bn(x @ p["w1"] + p["b1"], p["g1"], p["beta1"], p["rm1"], p["rv1"]), 0.0)
    h2 = jnp.maximum(bn(h1 @ p["w2"] + p["b2"], p["g2"], p["beta2"], p["rm2"], p["rv2"]), 0.0)
    out = h2 @ p["w3"] + p["b3"]
    return out.reshape(x.shape[0], num_points, 3)


def reference_forward_matched(x, params, num_points, eps=1e-5, weight_dtype=jnp.bfloat16):
    """Reference that mimics the kernel's bf16 weight/activation casts (f32 accumulation)."""
    p = params
    f32 = jnp.float32
    q = lambda a: a.astype(weight_dtype).astype(f32)

    def fold(w, b, g, beta, mean, var):
        scale = g / jnp.sqrt(var + eps)
        return q(w * scale[None, :]), (b - mean) * scale + beta

    w1, t1 = fold(p["w1"], p["b1"], p["g1"], p["beta1"], p["rm1"], p["rv1"])
    w2, t2 = fold(p["w2"], p["b2"], p["g2"], p["beta2"], p["rm2"], p["rv2"])
    w3 = q(p["w3"])
    h1 = jnp.maximum(q(x) @ w1 + t1, 0.0)
    h2 = jnp.maximum(q(h1) @ w2 + t2, 0.0)
    out = q(h2) @ w3 + p["b3"]
    return out.reshape(x.shape[0], num_points, 3)


# --------------------------------------------------------------------------- #
# Demo / self-test
# --------------------------------------------------------------------------- #
if __name__ == "__main__":
    B = 4
    feat_dim = 32     # args.feat_dim
    num_points = 8    # args.num_points  -> out_dim = 24

    key = jax.random.PRNGKey(0)
    kx, kp = jax.random.split(key)
    x = jax.random.normal(kx, (B, feat_dim), jnp.float32)
    params = init_params(kp, feat_dim, num_points)

    try:
        fwd = make_gen_forward(params, feat_dim, num_points)
        y = fwd(x)
        jax.block_until_ready(y)
    except Exception:
        # Fallback if this JAX build rejects pl.Buffered(1) on resident weights.
        fwd = make_gen_forward(params, feat_dim, num_points,
                               single_buffer_weights=False)
        y = fwd(x)
        jax.block_until_ready(y)

    assert y.shape == (B, num_points, 3)
    ref_matched = reference_forward_matched(x, params, num_points)
    ref_f32 = reference_forward(x, params, num_points)
    err_m = float(jnp.max(jnp.abs(y.astype(jnp.float32) - ref_matched)))
    err_f = float(jnp.max(jnp.abs(y.astype(jnp.float32) - ref_f32)))
    assert err_m < 5e-3, f"matched-reference error too large: {err_m}"
    assert err_f < 5e-2, f"f32-reference error too large: {err_f}"

    print("KERNEL_OK")
</pallas_src>

<mosaic_0001>
module attributes {stable_mosaic.version = 11 : i64} {
  func.func @gen_kernel(%arg0: i32, %arg1: i32, %arg2: memref<8x32xbf16, #tpu.memory_space<vmem>>, %arg3: memref<32x512xbf16, #tpu.memory_space<vmem>>, %arg4: memref<1x512xf32, #tpu.memory_space<vmem>>, %arg5: memref<512x1024xbf16, #tpu.memory_space<vmem>>, %arg6: memref<1x1024xf32, #tpu.memory_space<vmem>>, %arg7: memref<1024x128xbf16, #tpu.memory_space<vmem>>, %arg8: memref<1x128xf32, #tpu.memory_space<vmem>>, %arg9: memref<8x128xf32, #tpu.memory_space<vmem>>) attributes {dimension_semantics = [#tpu.dimension_semantics<parallel>, #tpu.dimension_semantics<parallel>], iteration_bounds = array<i64: 1, 1>, scalar_prefetch = 0 : i64, scratch_operands = 0 : i64, tpu.core_type = #tpu.core_type<tc>, window_params = [{transform_indices = @transform_0, window_bounds = array<i64: 8, 32>}, {pipeline_mode = #tpu.pipeline_mode<synchronous>, transform_indices = @transform_1, window_bounds = array<i64: 32, 512>}, {pipeline_mode = #tpu.pipeline_mode<synchronous>, transform_indices = @transform_2, window_bounds = array<i64: 1, 512>}, {pipeline_mode = #tpu.pipeline_mode<synchronous>, transform_indices = @transform_3, window_bounds = array<i64: 512, 1024>}, {pipeline_mode = #tpu.pipeline_mode<synchronous>, transform_indices = @transform_4, window_bounds = array<i64: 1, 1024>}, {transform_indices = @transform_5, window_bounds = array<i64: 1024, 128>}, {transform_indices = @transform_6, window_bounds = array<i64: 1, 128>}, {transform_indices = @transform_7, window_bounds = array<i64: 8, 128>}]} {
    %c0 = arith.constant 0 : index
    %c0_0 = arith.constant 0 : index
    %0 = vector.load %arg2[%c0, %c0_0] : memref<8x32xbf16, #tpu.memory_space<vmem>>, vector<8x32xbf16>
    %c0_1 = arith.constant 0 : index
    %c0_2 = arith.constant 0 : index
    %1 = vector.load %arg3[%c0_1, %c0_2] : memref<32x512xbf16, #tpu.memory_space<vmem>>, vector<32x512xbf16>
    %cst = arith.constant dense<0.000000e+00> : vector<8x512xf32>
    %2 = tpu.matmul %0, %1, %cst {dimension_numbers = #tpu.dot_dimension_numbers<[1], [0], [0], [1], [0, 0, 1, 1], [], []>} : vector<8x32xbf16>, vector<32x512xbf16>, vector<8x512xf32> -> vector<8x512xf32>
    %c0_3 = arith.constant 0 : index
    %c0_4 = arith.constant 0 : index
    %3 = vector.load %arg4[%c0_3, %c0_4] : memref<1x512xf32, #tpu.memory_space<vmem>>, vector<1x512xf32>
    %4 = vector.broadcast %3 : vector<1x512xf32> to vector<8x512xf32>
    %5 = arith.addf %2, %4 : vector<8x512xf32>
    %cst_5 = arith.constant 0.000000e+00 : f32
    %6 = vector.broadcast %cst_5 : f32 to vector<8x512xf32>
    %7 = arith.maximumf %5, %6 : vector<8x512xf32>
    %8 = arith.truncf %7 : vector<8x512xf32> to vector<8x512xbf16>
    %c0_6 = arith.constant 0 : index
    %c0_7 = arith.constant 0 : index
    %9 = vector.load %arg5[%c0_6, %c0_7] : memref<512x1024xbf16, #tpu.memory_space<vmem>>, vector<512x1024xbf16>
    %cst_8 = arith.constant dense<0.000000e+00> : vector<8x1024xf32>
    %10 = tpu.matmul %8, %9, %cst_8 {dimension_numbers = #tpu.dot_dimension_numbers<[1], [0], [0], [1], [0, 0, 1, 1], [], []>} : vector<8x512xbf16>, vector<512x1024xbf16>, vector<8x1024xf32> -> vector<8x1024xf32>
    %c0_9 = arith.constant 0 : index
    %c0_10 = arith.constant 0 : index
    %11 = vector.load %arg6[%c0_9, %c0_10] : memref<1x1024xf32, #tpu.memory_space<vmem>>, vector<1x1024xf32>
    %12 = vector.broadcast %11 : vector<1x1024xf32> to vector<8x1024xf32>
    %13 = arith.addf %10, %12 : vector<8x1024xf32>
    %cst_11 = arith.constant 0.000000e+00 : f32
    %14 = vector.broadcast %cst_11 : f32 to vector<8x1024xf32>
    %15 = arith.maximumf %13, %14 : vector<8x1024xf32>
    %16 = arith.truncf %15 : vector<8x1024xf32> to vector<8x1024xbf16>
    %c0_12 = arith.constant 0 : index
    %c0_13 = arith.constant 0 : index
    %17 = vector.load %arg7[%c0_12, %c0_13] : memref<1024x128xbf16, #tpu.memory_space<vmem>>, vector<1024x128xbf16>
    %cst_14 = arith.constant dense<0.000000e+00> : vector<8x128xf32>
    %18 = tpu.matmul %16, %17, %cst_14 {dimension_numbers = #tpu.dot_dimension_numbers<[1], [0], [0], [1], [0, 0, 1, 1], [], []>} : vector<8x1024xbf16>, vector<1024x128xbf16>, vector<8x128xf32> -> vector<8x128xf32>
    %c0_15 = arith.constant 0 : index
    %c0_16 = arith.constant 0 : index
    %19 = vector.load %arg8[%c0_15, %c0_16] : memref<1x128xf32, #tpu.memory_space<vmem>>, vector<1x128xf32>
    %20 = vector.broadcast %19 : vector<1x128xf32> to vector<8x128xf32>
    %21 = arith.addf %18, %20 : vector<8x128xf32>
    %c0_17 = arith.constant 0 : index
    %c0_18 = arith.constant 0 : index
    %22 = vector.load %arg9[%c0_17, %c0_18] : memref<8x128xf32, #tpu.memory_space<vmem>>, vector<8x128xf32>
    tpu.vector_store %arg9[%c0_17, %c0_18], %21 {strides = array<i32>} : memref<8x128xf32, #tpu.memory_space<vmem>>, vector<8x128xf32>,
    return
  }
  func.func @transform_0(%arg0: i32, %arg1: i32) -> (i32, i32) {
    %c0_i32 = arith.constant 0 : i32
    %c0_i32_0 = arith.constant 0 : i32
    return %arg0, %c0_i32 : i32, i32
  }
  func.func @transform_1(%arg0: i32, %arg1: i32) -> (i32, i32) {
    %c0_i32 = arith.constant 0 : i32
    %c0_i32_0 = arith.constant 0 : i32
    %c0_i32_1 = arith.constant 0 : i32
    return %c0_i32, %c0_i32_0 : i32, i32
  }
  func.func @transform_2(%arg0: i32, %arg1: i32) -> (i32, i32) {
    %c0_i32 = arith.constant 0 : i32
    %c0_i32_0 = arith.constant 0 : i32
    %c0_i32_1 = arith.constant 0 : i32
    return %c0_i32, %c0_i32_0 : i32, i32
  }
  func.func @transform_3(%arg0: i32, %arg1: i32) -> (i32, i32) {
    %c0_i32 = arith.constant 0 : i32
    %c0_i32_0 = arith.constant 0 : i32
    %c0_i32_1 = arith.constant 0 : i32
    return %c0_i32, %c0_i32_0 : i32, i32
  }
  func.func @transform_4(%arg0: i32, %arg1: i32) -> (i32, i32) {
    %c0_i32 = arith.constant 0 : i32
    %c0_i32_0 = arith.constant 0 : i32
    %c0_i32_1 = arith.constant 0 : i32
    return %c0_i32, %c0_i32_0 : i32, i32
  }
  func.func @transform_5(%arg0: i32, %arg1: i32) -> (i32, i32) {
    %c0_i32 = arith.constant 0 : i32
    %c0_i32_0 = arith.constant 0 : i32
    return %c0_i32, %arg1 : i32, i32
  }
  func.func @transform_6(%arg0: i32, %arg1: i32) -> (i32, i32) {
    %c0_i32 = arith.constant 0 : i32
    %c0_i32_0 = arith.constant 0 : i32
    return %c0_i32, %arg1 : i32, i32
  }
  func.func @transform_7(%arg0: i32, %arg1: i32) -> (i32, i32) {
    %c0_i32 = arith.constant 0 : i32
    return %arg0, %arg1 : i32, i32
  }
}

module attributes {stable_mosaic.version = 11 : i64} {
  func.func @gen_kernel(%arg0: i32, %arg1: i32, %arg2: memref<8x32xbf16, #tpu.memory_space<vmem>>, %arg3: memref<32x512xbf16, #tpu.memory_space<vmem>>, %arg4: memref<1x512xf32, #tpu.memory_space<vmem>>, %arg5: memref<512x1024xbf16, #tpu.memory_space<vmem>>, %arg6: memref<1x1024xf32, #tpu.memory_space<vmem>>, %arg7: memref<1024x128xbf16, #tpu.memory_space<vmem>>, %arg8: memref<1x128xf32, #tpu.memory_space<vmem>>, %arg9: memref<8x128xf32, #tpu.memory_space<vmem>>) attributes {dimension_semantics = [#tpu.dimension_semantics<parallel>, #tpu.dimension_semantics<parallel>], iteration_bounds = array<i64: 1, 1>, scalar_prefetch = 0 : i64, scratch_operands = 0 : i64, tpu.core_type = #tpu.core_type<tc>, window_params = [{transform_indices = @transform_0, window_bounds = array<i64: 8, 32>}, {pipeline_mode = #tpu.pipeline_mode<synchronous>, transform_indices = @transform_1, window_bounds = array<i64: 32, 512>}, {pipeline_mode = #tpu.pipeline_mode<synchronous>, transform_indices = @transform_2, window_bounds = array<i64: 1, 512>}, {pipeline_mode = #tpu.pipeline_mode<synchronous>, transform_indices = @transform_3, window_bounds = array<i64: 512, 1024>}, {pipeline_mode = #tpu.pipeline_mode<synchronous>, transform_indices = @transform_4, window_bounds = array<i64: 1, 1024>}, {transform_indices = @transform_5, window_bounds = array<i64: 1024, 128>}, {transform_indices = @transform_6, window_bounds = array<i64: 1, 128>}, {transform_indices = @transform_7, window_bounds = array<i64: 8, 128>}]} {
    %c0 = arith.constant 0 : index
    %c0_0 = arith.constant 0 : index
    %0 = vector.load %arg2[%c0, %c0_0] : memref<8x32xbf16, #tpu.memory_space<vmem>>, vector<8x32xbf16>
    %c0_1 = arith.constant 0 : index
    %c0_2 = arith.constant 0 : index
    %1 = vector.load %arg3[%c0_1, %c0_2] : memref<32x512xbf16, #tpu.memory_space<vmem>>, vector<32x512xbf16>
    %cst = arith.constant dense<0.000000e+00> : vector<8x512xf32>
    %2 = tpu.matmul %0, %1, %cst {dimension_numbers = #tpu.dot_dimension_numbers<[1], [0], [0], [1], [0, 0, 1, 1], [], []>} : vector<8x32xbf16>, vector<32x512xbf16>, vector<8x512xf32> -> vector<8x512xf32>
    %c0_3 = arith.constant 0 : index
    %c0_4 = arith.constant 0 : index
    %3 = vector.load %arg4[%c0_3, %c0_4] : memref<1x512xf32, #tpu.memory_space<vmem>>, vector<1x512xf32>
    %4 = vector.broadcast %3 : vector<1x512xf32> to vector<8x512xf32>
    %5 = arith.addf %2, %4 : vector<8x512xf32>
    %cst_5 = arith.constant 0.000000e+00 : f32
    %6 = vector.broadcast %cst_5 : f32 to vector<8x512xf32>
    %7 = arith.maximumf %5, %6 : vector<8x512xf32>
    %8 = arith.truncf %7 : vector<8x512xf32> to vector<8x512xbf16>
    %c0_6 = arith.constant 0 : index
    %c0_7 = arith.constant 0 : index
    %9 = vector.load %arg5[%c0_6, %c0_7] : memref<512x1024xbf16, #tpu.memory_space<vmem>>, vector<512x1024xbf16>
    %cst_8 = arith.constant dense<0.000000e+00> : vector<8x1024xf32>
    %10 = tpu.matmul %8, %9, %cst_8 {dimension_numbers = #tpu.dot_dimension_numbers<[1], [0], [0], [1], [0, 0, 1, 1], [], []>} : vector<8x512xbf16>, vector<512x1024xbf16>, vector<8x1024xf32> -> vector<8x1024xf32>
    %c0_9 = arith.constant 0 : index
    %c0_10 = arith.constant 0 : index
    %11 = vector.load %arg6[%c0_9, %c0_10] : memref<1x1024xf32, #tpu.memory_space<vmem>>, vector<1x1024xf32>
    %12 = vector.broadcast %11 : vector<1x1024xf32> to vector<8x1024xf32>
    %13 = arith.addf %10, %12 : vector<8x1024xf32>
    %cst_11 = arith.constant 0.000000e+00 : f32
    %14 = vector.broadcast %cst_11 : f32 to vector<8x1024xf32>
    %15 = arith.maximumf %13, %14 : vector<8x1024xf32>
    %16 = arith.truncf %15 : vector<8x1024xf32> to vector<8x1024xbf16>
    %c0_12 = arith.constant 0 : index
    %c0_13 = arith.constant 0 : index
    %17 = vector.load %arg7[%c0_12, %c0_13] : memref<1024x128xbf16, #tpu.memory_space<vmem>>, vector<1024x128xbf16>
    %cst_14 = arith.constant dense<0.000000e+00> : vector<8x128xf32>
    %18 = tpu.matmul %16, %17, %cst_14 {dimension_numbers = #tpu.dot_dimension_numbers<[1], [0], [0], [1], [0, 0, 1, 1], [], []>} : vector<8x1024xbf16>, vector<1024x128xbf16>, vector<8x128xf32> -> vector<8x128xf32>
    %c0_15 = arith.constant 0 : index
    %c0_16 = arith.constant 0 : index
    %19 = vector.load %arg8[%c0_15, %c0_16] : memref<1x128xf32, #tpu.memory_space<vmem>>, vector<1x128xf32>
    %20 = vector.broadcast %19 : vector<1x128xf32> to vector<8x128xf32>
    %21 = arith.addf %18, %20 : vector<8x128xf32>
    %c0_17 = arith.constant 0 : index
    %c0_18 = arith.constant 0 : index
    %22 = vector.load %arg9[%c0_17, %c0_18] : memref<8x128xf32, #tpu.memory_space<vmem>>, vector<8x128xf32>
    tpu.vector_store %arg9[%c0_17, %c0_18], %21 {strides = array<i32>} : memref<8x128xf32, #tpu.memory_space<vmem>>, vector<8x128xf32>,
    return
  }
  func.func @transform_0(%arg0: i32, %arg1: i32) -> (i32, i32) {
    %c0_i32 = arith.constant 0 : i32
    %c0_i32_0 = arith.constant 0 : i32
    return %arg0, %c0_i32 : i32, i32
  }
  func.func @transform_1(%arg0: i32, %arg1: i32) -> (i32, i32) {
    %c0_i32 = arith.constant 0 : i32
    %c0_i32_0 = arith.constant 0 : i32
    %c0_i32_1 = arith.constant 0 : i32
    return %c0_i32, %c0_i32_0 : i32, i32
  }
  func.func @transform_2(%arg0: i32, %arg1: i32) -> (i32, i32) {
    %c0_i32 = arith.constant 0 : i32
    %c0_i32_0 = arith.constant 0 : i32
    %c0_i32_1 = arith.constant 0 : i32
    return %c0_i32, %c0_i32_0 : i32, i32
  }
  func.func @transform_3(%arg0: i32, %arg1: i32) -> (i32, i32) {
    %c0_i32 = arith.constant 0 : i32
    %c0_i32_0 = arith.constant 0 : i32
    %c0_i32_1 = arith.constant 0 : i32
    return %c0_i32, %c0_i32_0 : i32, i32
  }
  func.func @transform_4(%arg0: i32, %arg1: i32) -> (i32, i32) {
    %c0_i32 = arith.constant 0 : i32
    %c0_i32_0 = arith.constant 0 : i32
    %c0_i32_1 = arith.constant 0 : i32
    return %c0_i32, %c0_i32_0 : i32, i32
  }
  func.func @transform_5(%arg0: i32, %arg1: i32) -> (i32, i32) {
    %c0_i32 = arith.constant 0 : i32
    %c0_i32_0 = arith.constant 0 : i32
    return %c0_i32, %arg1 : i32, i32
  }
  func.func @transform_6(%arg0: i32, %arg1: i32) -> (i32, i32) {
    %c0_i32 = arith.constant 0 : i32
    %c0_i32_0 = arith.constant 0 : i32
    return %c0_i32, %arg1 : i32, i32
  }
  func.func @transform_7(%arg0: i32, %arg1: i32) -> (i32, i32) {
    %c0_i32 = arith.constant 0 : i32
    return %arg0, %arg1 : i32, i32
  }
}

</mosaic_0001>

<bundles_post_ra>
// kernel: _forward.1
= control target key start
LH: loop header
LB: loop body
LE: loop exit
PB: predicated region body
PF: predicated region fallthrough
CT: control target
= control target key end

     0   :  { %12 = vsyncpa [#allocation3], 0  ;;  %s4700_s0 = inlined_call_operand.vmem [shape: bf16[8,32], index: 0, kind: input, shape index: {}]   ;;  %s4701_s1 = inlined_call_operand.hbm [shape: bf16[32,512], index: 1, kind: input, shape index: {}]   ;;  %s4702_s2 = inlined_call_operand.vmem [shape: f32[1,512], index: 2, kind: input, shape index: {}]   ;;  %s4703_s3 = inlined_call_operand.hbm [shape: bf16[512,1024], index: 3, kind: input, shape index: {}]   ;;  %s4704_s4 = inlined_call_operand.vmem [shape: f32[1,1024], index: 4, kind: input, shape index: {}]   ;;  %s4705_s5 = inlined_call_operand.hbm [shape: bf16[1024,128], index: 5, kind: input, shape index: {}]   ;;  %s4706_s6 = inlined_call_operand.vmem [shape: f32[1,128], index: 6, kind: input, shape index: {}]   ;;  %s4707_s7 = inlined_call_operand.vmem [shape: f32[8,128], index: 7, kind: output, shape index: {}]  }
   0x1   :  { %13 = vsyncpa [#allocation5], 0  ;;  %s35_s26 = sshll.u32 %s4703_s3, 4  ;;  %s4540_s27 = smov [#allocation4]   ;;  %s36_s26 = int_to_ptr.hbm [resolvable:$true] %s35_s26 }
   0x2   :  { %s37_s28 = sshll.u32 %s4540_s27, 4  ;;  %s20_s8 = sshll.u32 %s4701_s1, 4  ;;  %s38_s28 = int_to_ptr.vmem [resolvable:$true] %s37_s28  ;;  %s21_s8 = int_to_ptr.hbm [resolvable:$true] %s20_s8 }
   0x3   :  { %s4541_s9 = smov 512   ;;  %s4542_s10 = smov 32  }
   0x4   :  { %43 = dma.hbm_to_vmem [thread:$0]  %s36_s26, 32768, %s38_s28, [#allocation5], %s4541_s9, %s4541_s9, %s4542_s10  }
   0x5   :  { %s4543_s11 = smov [#allocation2]   ;;  %s4544_s13 = smov 256  }
   0x6   :  { %s22_s12 = sshll.u32 %s4543_s11, 4  ;;  %s4545_s14 = smov 16   ;;  %s23_s12 = int_to_ptr.vmem [resolvable:$true] %s22_s12 }
   0x7   :  { %28 = dma.hbm_to_vmem [thread:$0]  %s21_s8, 1024, %s23_s12, [#allocation3], %s4544_s13, %s4544_s13, %s4545_s14  }
   0x8   :  { %s50_s16 = sshll.u32 %s4705_s5, 4  ;;  %s4546_s17 = smov [#allocation6]   ;;  %s51_s16 = int_to_ptr.hbm [resolvable:$true] %s50_s16 }
   0x9   :  { %s52_s18 = sshll.u32 %s4546_s17, 4  ;;  %s4547_s19 = smov 64   ;;  %s53_s18 = int_to_ptr.vmem [resolvable:$true] %s52_s18 }
   0xa   :  { %s4548_s1 = smov 4  }
   0xb   :  { %58 = dma.hbm_to_vmem [thread:$0]  %s51_s16, 8192, %s53_s18, [#allocation5], %s4547_s19, %s4547_s19, %s4548_s1  }
   0xc   :  { %4536 = dma.done.wait [#allocation3], 1024  }
   0xd   :  { %4537 = vsyncadd [#allocation3], 4294966272 }
   0xe   :  { %4538 = dma.done.wait [#allocation5], 40960  }
   0xf   :  { %4539 = vsyncadd [#allocation5], 4294926336  ;;  %vm133_vm0 = vcmask 261120   ;;  %v2828_v0 = vld [vmem:[#allocation2 + $0x20] sm:$0xf] }
  0x10   :  { %v4132_v1 = vld [vmem:[#allocation2 + $0x2c] sm:$0xf0]  ;;  %v4130_v2 = vld [vmem:[#allocation2 + $0x24] sm:$0xf]  ;;  %v2830_v4 = vld [vmem:[#allocation2 + $0x30] sm:$0xf0] }
  0x11   :  { %v2829_v3 = vor.u32 %v4132_v1, %v2828_v0  ;;  %v2836_v5 = vld [vmem:[#allocation2 + $0x28] sm:$0xf]  ;;  %v4133_v6 = vld [vmem:[#allocation2 + $0x34] sm:$0xf0]  ;;  %v2833_v7 = vor.u32 %v4130_v2, %v2830_v4  ;;  %v4131_v9 = vld [vmem:[#allocation2 + $0x2c] sm:$0xf] }
  0x12   :  { %v2837_v8 = vor.u32 %v4133_v6, %v2836_v5  ;;  %v2838_v10 = vld [vmem:[#allocation2 + $0x38] sm:$0xf0]  ;;  %v2812_v11 = vld [vmem:[#allocation2] sm:$0xf]  ;;  %v4128_v13 = vld [vmem:[#allocation2 + $0xc] sm:$0xf0] }
  0x13   :  { %143 = vmatpush.bf16.msra.mxu0 %v2829_v3  ;;  %v2841_v12 = vor.u32 %v4131_v9, %v2838_v10  ;;  %v4126_v14 = vld [vmem:[#allocation2 + $0x4] sm:$0xf]  ;;  %v2814_v15 = vld [vmem:[#allocation2 + $0x10] sm:$0xf0]  ;;  %156 = vmatpush.bf16.msra.mxu1 %v2833_v7  ;;  %v2813_v16 = vor.u32 %v4128_v13, %v2812_v11  ;;  %v2820_v18 = vld [vmem:[#allocation2 + $0x8] sm:$0xf] }
  0x14   :  { %169 = vmatpush.bf16.msra.mxu2 %v2837_v8  ;;  %v2817_v17 = vor.u32 %v4126_v14, %v2814_v15  ;;  %v4129_v19 = vld [vmem:[#allocation2 + $0x14] sm:$0xf0]  ;;  %v4127_v20 = vld [vmem:[#allocation2 + $0xc] sm:$0xf]  ;;  %v2822_v22 = vld [vmem:[#allocation2 + $0x18] sm:$0xf0] }
  0x15   :  { %182 = vmatpush.bf16.msra.mxu3 %v2841_v12  ;;  %v2821_v21 = vor.u32 %v4129_v19, %v2820_v18  ;;  %v74_v23 = vld [vmem:[%s4700_s0] sm:$0xf]  ;;  %v2825_v25 = vor.u32 %v4127_v20, %v2822_v22 }
  0x16   :  { %v3072_v24 = vld [vmem:[#allocation4 + $0x1c0] sm:$0xf] }
  0x17   :  { %v4194_v26 = vld [vmem:[#allocation4 + $0x1dc] sm:$0xf0]  ;;  %144 = vmatpush.bf16.msra.mxu0 %v2813_v16  ;;  %157 = vmatpush.bf16.msra.mxu1 %v2817_v17 }
  0x18   :  { %v3328_v27 = vld [vmem:[#allocation4 + $0x3c0] sm:$0xf]  ;;  %v3073_v29 = vor.u32 %v4194_v26, %v3072_v24  ;;  %170 = vmatpush.bf16.msra.mxu2 %v2821_v21 }
  0x19   :  { %v4258_v28 = vld [vmem:[#allocation4 + $0x3dc] sm:$0xf0]  ;;  %183 = vmatpush.bf16.msra.mxu3 %v2825_v25 }
  0x1a   :  { %v3329_v30 = vor.u32 %v4258_v28, %v3328_v27  ;;  %v3040_v31 = vld [vmem:[#allocation4 + $0x180] sm:$0xf]  ;;  %2842 = vmatmul.msk.bf16.vlgmr.msra.gmra.mxu0 %vm133_vm0, %v74_v23  ;;  %2843 = vmatmul.msk.bf16.vlgmr.msra.gmra.mxu1 %vm133_vm0, %v74_v23 }
  0x1b   :  { %v4186_v32 = vld [vmem:[#allocation4 + $0x19c] sm:$0xf0]  ;;  %1751 = vmatpush.bf16.msrb.mxu0 %v3073_v29  ;;  %2844 = vmatmul.msk.bf16.vlgmr.msra.gmra.mxu2 %vm133_vm0, %v74_v23 }
  0x1c   :  { %v3296_v33 = vld [vmem:[#allocation4 + $0x380] sm:$0xf]  ;;  %v3041_v37 = vor.u32 %v4186_v32, %v3040_v31  ;;  %1764 = vmatpush.bf16.msrb.mxu1 %v3329_v30  ;;  %2845 = vmatmul.msk.bf16.vlgmr.msra.gmra.mxu3 %vm133_vm0, %v74_v23 }
  0x1d   :  { %v4250_v34 = vld [vmem:[#allocation4 + $0x39c] sm:$0xf0] }
  0x1e   :  { %v3584_v35 = vld [vmem:[#allocation4 + $0x5c0] sm:$0xf]  ;;  %v3297_v42 = vor.u32 %v4250_v34, %v3296_v33 }
  0x1f   :  { %v4322_v36 = vld [vmem:[#allocation4 + $0x5dc] sm:$0xf0]  ;;  %1752 = vmatpush.bf16.msrb.mxu0 %v3041_v37 }
  0x20   :  { %v3585_v38 = vor.u32 %v4322_v36, %v3584_v35  ;;  %v3840_v39 = vld [vmem:[#allocation4 + $0x7c0] sm:$0xf]  ;;  %1765 = vmatpush.bf16.msrb.mxu1 %v3297_v42 }
  0x21   :  { %v4386_v40 = vld [vmem:[#allocation4 + $0x7dc] sm:$0xf0] }
  0x22   :  { %v3008_v41 = vld [vmem:[#allocation4 + $0x140] sm:$0xf]  ;;  %v3841_v43 = vor.u32 %v4386_v40, %v3840_v39  ;;  %1777 = vmatpush.bf16.msrb.mxu2 %v3585_v38 }
  0x23   :  { %v4178_v44 = vld [vmem:[#allocation4 + $0x15c] sm:$0xf0] }
  0x24   :  { %v3264_v45 = vld [vmem:[#allocation4 + $0x340] sm:$0xf]  ;;  %1790 = vmatpush.bf16.msrb.mxu3 %v3841_v43  ;;  %v3009_v52 = vor.u32 %v4178_v44, %v3008_v41 }
  0x25   :  { %v4242_v46 = vld [vmem:[#allocation4 + $0x35c] sm:$0xf0] }
  0x26   :  { %v3552_v47 = vld [vmem:[#allocation4 + $0x580] sm:$0xf]  ;;  %v3265_v57 = vor.u32 %v4242_v46, %v3264_v45  ;;  %1753 = vmatpush.bf16.msrb.mxu0 %v3009_v52 }
  0x27   :  { %v4314_v48 = vld [vmem:[#allocation4 + $0x59c] sm:$0xf0] }
  0x28   :  { %v3808_v49 = vld [vmem:[#allocation4 + $0x780] sm:$0xf]  ;;  %v3553_v50 = vor.u32 %v4314_v48, %v3552_v47  ;;  %1766 = vmatpush.bf16.msrb.mxu1 %v3265_v57  ;;  %v4190_v47 = vld [vmem:[#allocation4 + $0x1c4] sm:$0xf] }
  0x29   :  { %v4378_v51 = vld [vmem:[#allocation4 + $0x79c] sm:$0xf0]  ;;  %v3074_v48 = vld [vmem:[#allocation4 + $0x1e0] sm:$0xf0] }
  0x2a   :  { %v3809_v53 = vor.u32 %v4378_v51, %v3808_v49  ;;  %v2976_v54 = vld [vmem:[#allocation4 + $0x100] sm:$0xf]  ;;  %1778 = vmatpush.bf16.msrb.mxu2 %v3553_v50  ;;  %v4254_v49 = vld [vmem:[#allocation4 + $0x3c4] sm:$0xf] }
  0x2b   :  { %v4170_v55 = vld [vmem:[#allocation4 + $0x11c] sm:$0xf0]  ;;  %v3330_v50 = vld [vmem:[#allocation4 + $0x3e0] sm:$0xf0] }
  0x2c   :  { %v3520_v56 = vld [vmem:[#allocation4 + $0x540] sm:$0xf]  ;;  %1791 = vmatpush.bf16.msrb.mxu3 %v3809_v53  ;;  %v2977_v0 = vor.u32 %v4170_v55, %v2976_v54  ;;  %v4182_v54 = vld [vmem:[#allocation4 + $0x184] sm:$0xf] }
  0x2d   :  { %v4306_v58 = vld [vmem:[#allocation4 + $0x55c] sm:$0xf0] }
  0x2e   :  { %v3776_v59 = vld [vmem:[#allocation4 + $0x740] sm:$0xf]  ;;  %v3521_v63 = vor.u32 %v4306_v58, %v3520_v56  ;;  %1754 = vmatpush.bf16.msrb.mxu0 %v2977_v0  ;;  %v3042_v0 = vld [vmem:[#allocation4 + $0x1a0] sm:$0xf0] }
  0x2f   :  { %v4370_v60 = vld [vmem:[#allocation4 + $0x75c] sm:$0xf0] }
  0x30   :  { %v3232_v61 = vld [vmem:[#allocation4 + $0x300] sm:$0xf]  ;;  %v3777_v1 = vor.u32 %v4370_v60, %v3776_v59  ;;  %1779 = vmatpush.bf16.msrb.mxu2 %v3521_v63  ;;  %v3077_v59 = vor.u32 %v4190_v47, %v3074_v48  ;;  %v3333_v63 = vor.u32 %v4254_v49, %v3330_v50  ;;  %v4150_v47 = vld [vmem:[#allocation4 + $0x84] sm:$0xf] }
  0x31   :  { %v4234_v62 = vld [vmem:[#allocation4 + $0x31c] sm:$0xf0]  ;;  %v2914_v48 = vld [vmem:[#allocation4 + $0xa0] sm:$0xf0] }
  0x32   :  { %v2944_v2 = vld [vmem:[#allocation4 + $0xc0] sm:$0xf]  ;;  %v3233_v5 = vor.u32 %v4234_v62, %v3232_v61  ;;  %1792 = vmatpush.bf16.msrb.mxu3 %v3777_v1  ;;  %v4318_v61 = vld [vmem:[#allocation4 + $0x5c4] sm:$0xf] }
  0x33   :  { %v3488_v3 = vld [vmem:[#allocation4 + $0x500] sm:$0xf]  ;;  %v3586_v62 = vld [vmem:[#allocation4 + $0x5e0] sm:$0xf0] }
  0x34   :  { %v4298_v4 = vld [vmem:[#allocation4 + $0x51c] sm:$0xf0]  ;;  %1767 = vmatpush.bf16.msrb.mxu1 %v3233_v5  ;;  %v4382_v1 = vld [vmem:[#allocation4 + $0x7c4] sm:$0xf] }
  0x35   :  { %v4162_v6 = vld [vmem:[#allocation4 + $0xdc] sm:$0xf0]  ;;  %v3489_v11 = vor.u32 %v4298_v4, %v3488_v3  ;;  %v4246_v3 = vld [vmem:[#allocation4 + $0x384] sm:$0xf] }
  0x36   :  { %v3744_v7 = vld [vmem:[#allocation4 + $0x700] sm:$0xf]  ;;  %v2945_v12 = vor.u32 %v4162_v6, %v2944_v2  ;;  %v3842_v2 = vld [vmem:[#allocation4 + $0x7e0] sm:$0xf0] }
  0x37   :  { %v4362_v8 = vld [vmem:[#allocation4 + $0x71c] sm:$0xf0]  ;;  %1780 = vmatpush.bf16.msrb.mxu2 %v3489_v11  ;;  %v3298_v4 = vld [vmem:[#allocation4 + $0x3a0] sm:$0xf0] }
  0x38   :  { %v3200_v9 = vld [vmem:[#allocation4 + $0x2c0] sm:$0xf]  ;;  %v3745_v13 = vor.u32 %v4362_v8, %v3744_v7  ;;  %1755 = vmatpush.bf16.msrb.mxu0 %v2945_v12  ;;  %v3589_v7 = vor.u32 %v4318_v61, %v3586_v62  ;;  %v3045_v8 = vor.u32 %v4182_v54, %v3042_v0  ;;  %v4310_v11 = vld [vmem:[#allocation4 + $0x584] sm:$0xf] }
  0x39   :  { %v4226_v10 = vld [vmem:[#allocation4 + $0x2dc] sm:$0xf0]  ;;  %v3554_v12 = vld [vmem:[#allocation4 + $0x5a0] sm:$0xf0] }
  0x3a   :  { %v2912_v14 = vld [vmem:[#allocation4 + $0x80] sm:$0xf]  ;;  %v3201_v17 = vor.u32 %v4226_v10, %v3200_v9  ;;  %1793 = vmatpush.bf16.msrb.mxu3 %v3745_v13  ;;  %v3845_v9 = vor.u32 %v4382_v1, %v3842_v2  ;;  %v4174_v10 = vld [vmem:[#allocation4 + $0x144] sm:$0xf]  ;;  %v3301_v13 = vor.u32 %v4246_v3, %v3298_v4 }
  0x3b   :  { %v3456_v15 = vld [vmem:[#allocation4 + $0x4c0] sm:$0xf]  ;;  %v4214_v49 = vld [vmem:[#allocation4 + $0x284] sm:$0xf] }
  0x3c   :  { %v4290_v16 = vld [vmem:[#allocation4 + $0x4dc] sm:$0xf0]  ;;  %1768 = vmatpush.bf16.msrb.mxu1 %v3201_v17  ;;  %v4238_v17 = vld [vmem:[#allocation4 + $0x344] sm:$0xf] }
  0x3d   :  { %v4154_v18 = vld [vmem:[#allocation4 + $0x9c] sm:$0xf0]  ;;  %v3457_v23 = vor.u32 %v4290_v16, %v3456_v15  ;;  %v4374_v15 = vld [vmem:[#allocation4 + $0x784] sm:$0xf] }
  0x3e   :  { %v3712_v19 = vld [vmem:[#allocation4 + $0x6c0] sm:$0xf]  ;;  %v2913_v24 = vor.u32 %v4154_v18, %v2912_v14  ;;  %v3010_v14 = vld [vmem:[#allocation4 + $0x160] sm:$0xf0] }
  0x3f   :  { %v4354_v20 = vld [vmem:[#allocation4 + $0x6dc] sm:$0xf0]  ;;  %1781 = vmatpush.bf16.msrb.mxu2 %v3457_v23  ;;  %v3810_v16 = vld [vmem:[#allocation4 + $0x7a0] sm:$0xf0] }
  0x40   :  { %v3168_v21 = vld [vmem:[#allocation4 + $0x280] sm:$0xf]  ;;  %v3713_v25 = vor.u32 %v4354_v20, %v3712_v19  ;;  %1756 = vmatpush.bf16.msrb.mxu0 %v2913_v24  ;;  %v3266_v18 = vld [vmem:[#allocation4 + $0x360] sm:$0xf0]  ;;  %v3557_v19 = vor.u32 %v4310_v11, %v3554_v12  ;;  %v3013_v20 = vor.u32 %v4174_v10, %v3010_v14 }
  0x41   :  { %v4218_v22 = vld [vmem:[#allocation4 + $0x29c] sm:$0xf0]  ;;  %v4302_v23 = vld [vmem:[#allocation4 + $0x544] sm:$0xf] }
  0x42   :  { %v2880_v26 = vld [vmem:[#allocation4 + $0x40] sm:$0xf]  ;;  %v3169_v29 = vor.u32 %v4218_v22, %v3168_v21  ;;  %1794 = vmatpush.bf16.msrb.mxu3 %v3713_v25  ;;  %v3813_v21 = vor.u32 %v4374_v15, %v3810_v16  ;;  %v4166_v22 = vld [vmem:[#allocation4 + $0x104] sm:$0xf]  ;;  %v3269_v25 = vor.u32 %v4238_v17, %v3266_v18 }
  0x43   :  { %v3424_v27 = vld [vmem:[#allocation4 + $0x480] sm:$0xf]  ;;  %v3522_v24 = vld [vmem:[#allocation4 + $0x560] sm:$0xf0] }
  0x44   :  { %v4282_v28 = vld [vmem:[#allocation4 + $0x49c] sm:$0xf0]  ;;  %1769 = vmatpush.bf16.msrb.mxu1 %v3169_v29  ;;  %v4230_v29 = vld [vmem:[#allocation4 + $0x304] sm:$0xf] }
  0x45   :  { %v4146_v30 = vld [vmem:[#allocation4 + $0x5c] sm:$0xf0]  ;;  %v3425_v35 = vor.u32 %v4282_v28, %v3424_v27  ;;  %v4366_v27 = vld [vmem:[#allocation4 + $0x744] sm:$0xf] }
  0x46   :  { %v3680_v31 = vld [vmem:[#allocation4 + $0x680] sm:$0xf]  ;;  %v2881_v37 = vor.u32 %v4146_v30, %v2880_v26  ;;  %v2978_v26 = vld [vmem:[#allocation4 + $0x120] sm:$0xf0] }
  0x47   :  { %v4346_v32 = vld [vmem:[#allocation4 + $0x69c] sm:$0xf0]  ;;  %1782 = vmatpush.bf16.msrb.mxu2 %v3425_v35  ;;  %v3778_v28 = vld [vmem:[#allocation4 + $0x760] sm:$0xf0] }
  0x48   :  { %v3136_v33 = vld [vmem:[#allocation4 + $0x240] sm:$0xf]  ;;  %v3681_v38 = vor.u32 %v4346_v32, %v3680_v31  ;;  %1757 = vmatpush.bf16.msrb.mxu0 %v2881_v37  ;;  %v3234_v30 = vld [vmem:[#allocation4 + $0x320] sm:$0xf0]  ;;  %v3525_v31 = vor.u32 %v4302_v23, %v3522_v24  ;;  %v2981_v32 = vor.u32 %v4166_v22, %v2978_v26 }
  0x49   :  { %v4210_v34 = vld [vmem:[#allocation4 + $0x25c] sm:$0xf0]  ;;  %v4294_v35 = vld [vmem:[#allocation4 + $0x504] sm:$0xf]  ;;  %v3237_v37 = vor.u32 %v4230_v29, %v3234_v30 }
  0x4a   :  { %v2848_v36 = vld [vmem:[#allocation4] sm:$0xf]  ;;  %v3137_v42 = vor.u32 %v4210_v34, %v3136_v33  ;;  %1795 = vmatpush.bf16.msrb.mxu3 %v3681_v38  ;;  %v3781_v33 = vor.u32 %v4366_v27, %v3778_v28  ;;  %v4158_v34 = vld [vmem:[#allocation4 + $0xc4] sm:$0xf] }
  0x4b   :  { %v4138_v39 = vld [vmem:[#allocation4 + $0x1c] sm:$0xf0]  ;;  %v2946_v38 = vld [vmem:[#allocation4 + $0xe0] sm:$0xf0] }
  0x4c   :  { %v3392_v40 = vld [vmem:[#allocation4 + $0x440] sm:$0xf]  ;;  %v2849_v52 = vor.u32 %v4138_v39, %v2848_v36  ;;  %1770 = vmatpush.bf16.msrb.mxu1 %v3137_v42  ;;  %v3490_v36 = vld [vmem:[#allocation4 + $0x520] sm:$0xf0] }
  0x4d   :  { %v4274_v41 = vld [vmem:[#allocation4 + $0x45c] sm:$0xf0]  ;;  %v4358_v39 = vld [vmem:[#allocation4 + $0x704] sm:$0xf] }
  0x4e   :  { %v3104_v43 = vld [vmem:[#allocation4 + $0x200] sm:$0xf]  ;;  %v3393_v51 = vor.u32 %v4274_v41, %v3392_v40  ;;  %1758 = vmatpush.bf16.msrb.mxu0 %v2849_v52  ;;  %v3746_v40 = vld [vmem:[#allocation4 + $0x720] sm:$0xf0] }
  0x4f   :  { %v3648_v44 = vld [vmem:[#allocation4 + $0x640] sm:$0xf]  ;;  %v4222_v41 = vld [vmem:[#allocation4 + $0x2c4] sm:$0xf] }
  0x50   :  { %v4338_v45 = vld [vmem:[#allocation4 + $0x65c] sm:$0xf0]  ;;  %1783 = vmatpush.bf16.msrb.mxu2 %v3393_v51  ;;  %v3202_v42 = vld [vmem:[#allocation4 + $0x2e0] sm:$0xf0]  ;;  %v2917_v51 = vor.u32 %v4150_v47, %v2914_v48  ;;  %v4251_v47 = vld [vmem:[#allocation4 + $0x3a4] sm:$0xf0] }
  0x51   :  { %v4202_v46 = vld [vmem:[#allocation4 + $0x21c] sm:$0xf0]  ;;  %v3649_v53 = vor.u32 %v4338_v45, %v3648_v44  ;;  %v2949_v44 = vor.u32 %v4158_v34, %v2946_v38  ;;  %v3749_v45 = vor.u32 %v4358_v39, %v3746_v40  ;;  %v3170_v50 = vld [vmem:[#allocation4 + $0x2a0] sm:$0xf0]  ;;  %v3336_v34 = vld [vmem:[#allocation4 + $0x3c8] sm:$0xf] }
  0x52   :  { %v3360_v55 = vld [vmem:[#allocation4 + $0x400] sm:$0xf]  ;;  %v3105_v58 = vor.u32 %v4202_v46, %v3104_v43  ;;  %1803 = vmatpush.bf16.msra.mxu0 %v3077_v59  ;;  %v3493_v43 = vor.u32 %v4294_v35, %v3490_v36  ;;  %v3205_v46 = vor.u32 %v4222_v41, %v3202_v42  ;;  %v3173_v52 = vor.u32 %v4214_v49, %v3170_v50  ;;  %v3458_v54 = vld [vmem:[#allocation4 + $0x4e0] sm:$0xf0]  ;;  %v4259_v35 = vld [vmem:[#allocation4 + $0x3e4] sm:$0xf0] }
  0x53   :  { %v4266_v56 = vld [vmem:[#allocation4 + $0x41c] sm:$0xf0]  ;;  %1796 = vmatpush.bf16.msrb.mxu3 %v3649_v53  ;;  %v4286_v53 = vld [vmem:[#allocation4 + $0x4c4] sm:$0xf]  ;;  %v3337_v42 = vor.u32 %v4259_v35, %v3336_v34 }
  0x54   :  { %v3616_v57 = vld [vmem:[#allocation4 + $0x600] sm:$0xf]  ;;  %v3361_v5 = vor.u32 %v4266_v56, %v3360_v55  ;;  %1771 = vmatpush.bf16.msrb.mxu1 %v3105_v58  ;;  %v4350_v55 = vld [vmem:[#allocation4 + $0x6c4] sm:$0xf]  ;;  %v3461_v56 = vor.u32 %v4286_v53, %v3458_v54  ;;  %v3592_v53 = vld [vmem:[#allocation4 + $0x5c8] sm:$0xf] }
  0x55   :  { %v4330_v60 = vld [vmem:[#allocation4 + $0x61c] sm:$0xf0]  ;;  %v4142_v59 = vld [vmem:[#allocation4 + $0x44] sm:$0xf]  ;;  %v4323_v54 = vld [vmem:[#allocation4 + $0x5e4] sm:$0xf0] }
  0x56   :  { %v3617_v6 = vor.u32 %v4330_v60, %v3616_v57  ;;  %1784 = vmatpush.bf16.msrb.mxu2 %v3361_v5  ;;  %1804 = vmatpush.bf16.msra.mxu0 %v3045_v8  ;;  %v3714_v57 = vld [vmem:[#allocation4 + $0x6e0] sm:$0xf0] }
  0x57   :  { %v3717_v58 = vor.u32 %v4350_v55, %v3714_v57  ;;  %v2882_v60 = vld [vmem:[#allocation4 + $0x60] sm:$0xf0]  ;;  %v3848_v55 = vld [vmem:[#allocation4 + $0x7c8] sm:$0xf] }
  0x58   :  { %1816 = vmatpush.bf16.msra.mxu1 %v3333_v63  ;;  %1797 = vmatpush.bf16.msrb.mxu3 %v3617_v6  ;;  %v2885_v61 = vor.u32 %v4142_v59, %v2882_v60  ;;  %v4206_v62 = vld [vmem:[#allocation4 + $0x244] sm:$0xf]  ;;  %v4387_v59 = vld [vmem:[#allocation4 + $0x7e4] sm:$0xf0] }
  0x59   :  { %v3138_v63 = vld [vmem:[#allocation4 + $0x260] sm:$0xf0]  ;;  %v3016_v60 = vld [vmem:[#allocation4 + $0x148] sm:$0xf] }
  0x5a   :  { %1829 = vmatpush.bf16.msra.mxu2 %v3589_v7  ;;  %1805 = vmatpush.bf16.msra.mxu0 %v3013_v20  ;;  %v3141_v0 = vor.u32 %v4206_v62, %v3138_v63  ;;  %v4278_v1 = vld [vmem:[#allocation4 + $0x484] sm:$0xf]  ;;  %v3272_v63 = vld [vmem:[#allocation4 + $0x348] sm:$0xf] }
  0x5b   :  { %v3426_v2 = vld [vmem:[#allocation4 + $0x4a0] sm:$0xf0] }
  0x5c   :  { %1842 = vmatpush.bf16.msra.mxu3 %v3845_v9  ;;  %1817 = vmatpush.bf16.msra.mxu1 %v3301_v13  ;;  %v4342_v3 = vld [vmem:[#allocation4 + $0x684] sm:$0xf]  ;;  %v3429_v4 = vor.u32 %v4278_v1, %v3426_v2  ;;  %v3593_v2 = vor.u32 %v4323_v54, %v3592_v53  ;;  %v4147_v53 = vld [vmem:[#allocation4 + $0x64] sm:$0xf0] }
  0x5d   :  { %v3682_v5 = vld [vmem:[#allocation4 + $0x6a0] sm:$0xf0]  ;;  %v3144_v54 = vld [vmem:[#allocation4 + $0x248] sm:$0xf] }
  0x5e   :  { %1830 = vmatpush.bf16.msra.mxu2 %v3557_v19  ;;  %1806 = vmatpush.bf16.msra.mxu0 %v2981_v32  ;;  %v3685_v6 = vor.u32 %v4342_v3, %v3682_v5  ;;  %v4134_v7 = vld [vmem:[#allocation4 + $0x4] sm:$0xf]  ;;  %v4195_v32 = vld [vmem:[#allocation4 + $0x1e4] sm:$0xf0] }
  0x5f   :  { %v2850_v8 = vld [vmem:[#allocation4 + $0x20] sm:$0xf0] }
  0x60   :  { %1843 = vmatpush.bf16.msra.mxu3 %v3813_v21  ;;  %1818 = vmatpush.bf16.msra.mxu1 %v3269_v25  ;;  %v4198_v9 = vld [vmem:[#allocation4 + $0x204] sm:$0xf]  ;;  %v2853_v10 = vor.u32 %v4134_v7, %v2850_v8  ;;  %v83_v25 = vld [vmem:[%s4702_s2] sm:$0xf]  ;;  %v4315_v7 = vld [vmem:[#allocation4 + $0x5a4] sm:$0xf0] }
  0x61   :  { %v3106_v11 = vld [vmem:[#allocation4 + $0x220] sm:$0xf0]  ;;  %v85_v26 = vperm.slane %v83_v25, 0  ;;  %v86_v27 = vperm.slane %v83_v25, 1  ;;  %v87_v38 = vperm.slane %v83_v25, 2  ;;  %v88_v41 = vperm.slane %v83_v25, 3 }
  0x62   :  { %1831 = vmatpush.bf16.msra.mxu2 %v3525_v31  ;;  %1807 = vmatpush.bf16.msra.mxu0 %v2949_v44  ;;  %v3109_v12 = vor.u32 %v4198_v9, %v3106_v11  ;;  %v4270_v13 = vld [vmem:[#allocation4 + $0x444] sm:$0xf]  ;;  %v3080_v31 = vld [vmem:[#allocation4 + $0x1c8] sm:$0xf] }
  0x63   :  { %v3394_v14 = vld [vmem:[#allocation4 + $0x460] sm:$0xf0]  ;;  %v3081_v39 = vor.u32 %v4195_v32, %v3080_v31  ;;  %v4187_v44 = vld [vmem:[#allocation4 + $0x1a4] sm:$0xf0] }
  0x64   :  { %1844 = vmatpush.bf16.msra.mxu3 %v3781_v33  ;;  %1819 = vmatpush.bf16.msra.mxu1 %v3237_v37  ;;  %v3397_v15 = vor.u32 %v4270_v13, %v3394_v14  ;;  %v4334_v16 = vld [vmem:[#allocation4 + $0x644] sm:$0xf]  ;;  %v3816_v8 = vld [vmem:[#allocation4 + $0x788] sm:$0xf] }
  0x65   :  { %v3650_v17 = vld [vmem:[#allocation4 + $0x660] sm:$0xf0]  ;;  %v4379_v11 = vld [vmem:[#allocation4 + $0x7a4] sm:$0xf0] }
  0x66   :  { %1832 = vmatpush.bf16.msra.mxu2 %v3493_v43  ;;  %1808 = vmatpush.bf16.msra.mxu0 %v2917_v51  ;;  %v3653_v18 = vor.u32 %v4334_v16, %v3650_v17  ;;  %v4262_v19 = vld [vmem:[#allocation4 + $0x404] sm:$0xf]  ;;  %v3048_v43 = vld [vmem:[#allocation4 + $0x188] sm:$0xf] }
  0x67   :  { %v3362_v20 = vld [vmem:[#allocation4 + $0x420] sm:$0xf0]  ;;  %v4171_v13 = vld [vmem:[#allocation4 + $0x124] sm:$0xf0] }
  0x68   :  { %1845 = vmatpush.bf16.msra.mxu3 %v3749_v45  ;;  %1820 = vmatpush.bf16.msra.mxu1 %v3205_v46  ;;  %v3365_v21 = vor.u32 %v4262_v19, %v3362_v20  ;;  %v4326_v22 = vld [vmem:[#allocation4 + $0x604] sm:$0xf]  ;;  %v3304_v46 = vld [vmem:[#allocation4 + $0x388] sm:$0xf]  ;;  %v3817_v19 = vor.u32 %v4379_v11, %v3816_v8  ;;  %v4255_v8 = vld [vmem:[#allocation4 + $0x3cc] sm:$0xf] }
  0x69   :  { %v3618_v23 = vld [vmem:[#allocation4 + $0x620] sm:$0xf0]  ;;  %v3240_v14 = vld [vmem:[#allocation4 + $0x308] sm:$0xf] }
  0x6a   :  { %1833 = vmatpush.bf16.msra.mxu2 %v3461_v56  ;;  %1809 = vmatpush.bf16.msra.mxu0 %v2885_v61  ;;  %v3621_v24 = vor.u32 %v4326_v22, %v3618_v23  ;;  %v4179_v61 = vld [vmem:[#allocation4 + $0x164] sm:$0xf0] }
  0x6b   :  { %v3017_v5 = vor.u32 %v4179_v61, %v3016_v60  ;;  %v4307_v22 = vld [vmem:[#allocation4 + $0x564] sm:$0xf0] }
  0x6c   :  { %1821 = vmatpush.bf16.msra.mxu1 %v3173_v52  ;;  %1846 = vmatpush.bf16.msra.mxu3 %v3717_v58  ;;  %v3049_v52 = vor.u32 %v4187_v44, %v3048_v43  ;;  %v3305_v58 = vor.u32 %v4251_v47, %v3304_v46  ;;  %v4371_v25 = vld [vmem:[#allocation4 + $0x764] sm:$0xf0] }
  0x6d   :  { %v3496_v32 = vld [vmem:[#allocation4 + $0x508] sm:$0xf] }
  0x6e   :  { %1834 = vmatpush.bf16.msra.mxu2 %v3429_v4  ;;  %1810 = vmatpush.bf16.msra.mxu0 %v2853_v10  ;;  %v3849_v4 = vor.u32 %v4387_v59, %v3848_v55  ;;  %v3464_v46 = vld [vmem:[#allocation4 + $0x4c8] sm:$0xf] }
  0x6f   :  { %v4291_v47 = vld [vmem:[#allocation4 + $0x4e4] sm:$0xf0] }
  0x70   :  { %1822 = vmatpush.bf16.msra.mxu1 %v3141_v0  ;;  %1847 = vmatpush.bf16.msra.mxu3 %v3685_v6  ;;  %v4243_v0 = vld [vmem:[#allocation4 + $0x364] sm:$0xf0] }
  0x71   :  { %v3560_v6 = vld [vmem:[#allocation4 + $0x588] sm:$0xf]  ;;  %v3273_v10 = vor.u32 %v4243_v0, %v3272_v63 }
  0x72   :  { %1835 = vmatpush.bf16.msra.mxu2 %v3397_v15  ;;  %v4235_v15 = vld [vmem:[#allocation4 + $0x324] sm:$0xf0]  ;;  %v3561_v17 = vor.u32 %v4315_v7, %v3560_v6  ;;  %v3082_v7 = vld [vmem:[#allocation4 + $0x1e8] sm:$0xf0] }
  0x73   :  { %v3241_v23 = vor.u32 %v4235_v15, %v3240_v14  ;;  %v4211_v55 = vld [vmem:[#allocation4 + $0x264] sm:$0xf0] }
  0x74   :  { %1823 = vmatpush.bf16.msra.mxu1 %v3109_v12  ;;  %1848 = vmatpush.bf16.msra.mxu3 %v3653_v18  ;;  %v2984_v12 = vld [vmem:[#allocation4 + $0x108] sm:$0xf] }
  0x75   :  { %v2985_v20 = vor.u32 %v4171_v13, %v2984_v12  ;;  %v4283_v59 = vld [vmem:[#allocation4 + $0x4a4] sm:$0xf0] }
  0x76   :  { %1836 = vmatpush.bf16.msra.mxu2 %v3365_v21  ;;  %v3528_v21 = vld [vmem:[#allocation4 + $0x548] sm:$0xf] }
  0x77   :  { %v3688_v60 = vld [vmem:[#allocation4 + $0x688] sm:$0xf] }
  0x78   :  { %1849 = vmatpush.bf16.msra.mxu3 %v3621_v24  ;;  %v3784_v24 = vld [vmem:[#allocation4 + $0x748] sm:$0xf] }
  0x79   :  { %v3785_v31 = vor.u32 %v4371_v25, %v3784_v24  ;;  %v4347_v63 = vld [vmem:[#allocation4 + $0x6a4] sm:$0xf0]  ;;  %v3306_v24 = vld [vmem:[#allocation4 + $0x3a8] sm:$0xf0] }
  0x7a   :  { %v2856_v0 = vld [vmem:[#allocation4 + $0x8] sm:$0xf]  ;;  %v3689_v11 = vor.u32 %v4347_v63, %v3688_v60  ;;  %v3786_v63 = vld [vmem:[#allocation4 + $0x768] sm:$0xf0] }
  0x7b   :  { %v3400_v12 = vld [vmem:[#allocation4 + $0x448] sm:$0xf] }
  0x7c   :  { %v4275_v13 = vld [vmem:[#allocation4 + $0x464] sm:$0xf0] }
  0x97   :  { %v146_v28 = vpop.f32.mrf.mxu0  ;;  %v159_v30 = vpop.f32.mrf.mxu1 }
  0x98   :  { %v147_v29 = vadd.f32 %v146_v28, %v85_v26  ;;  %v160_v33 = vadd.f32 %v159_v30, %v86_v27  ;;  %v2952_v26 = vld [vmem:[#allocation4 + $0xc8] sm:$0xf]  ;;  %v3529_v30 = vor.u32 %v4307_v22, %v3528_v21  ;;  %v3401_v21 = vor.u32 %v4275_v13, %v3400_v12  ;;  %v3050_v22 = vld [vmem:[#allocation4 + $0x1a8] sm:$0xf0] }
  0x99   :  { %v4163_v27 = vld [vmem:[#allocation4 + $0xe4] sm:$0xf0]  ;;  %v4359_v12 = vld [vmem:[#allocation4 + $0x70c] sm:$0xf] }
  0x9a   :  { %v189_v36 = vmax.f32 %v147_v29, 0.0  ;;  %v190_v37 = vmax.f32 %v160_v33, 0.0  ;;  %v3208_v28 = vld [vmem:[#allocation4 + $0x2c8] sm:$0xf]  ;;  %v2953_v34 = vor.u32 %v4163_v27, %v2952_v26  ;;  %v3754_v13 = vld [vmem:[#allocation4 + $0x728] sm:$0xf0] }
  0x9b   :  { %v4227_v29 = vld [vmem:[#allocation4 + $0x2e4] sm:$0xf0] }
  0x9c   :  { %v4608_v40 = vpack.c.bf16 %v189_v36, %v189_v36  ;;  %v4610_v45 = vpack.c.bf16 %v190_v37, %v190_v37  ;;  %v4299_v33 = vld [vmem:[#allocation4 + $0x524] sm:$0xf0]  ;;  %v3209_v35 = vor.u32 %v4227_v29, %v3208_v28 }
  0x9d   :  { %v3752_v36 = vld [vmem:[#allocation4 + $0x708] sm:$0xf]  ;;  %v3497_v43 = vor.u32 %v4299_v33, %v3496_v32 }
  0x9e   :  { %v172_v48 = vpop.f32.mrf.mxu2  ;;  %1759 = vmatmul.bf16.vlgmr.msrb.gmra.mxu0 %v4608_v40  ;;  %1772 = vmatmul.bf16.vlgmr.msrb.gmra.mxu1 %v4610_v45  ;;  %v4363_v37 = vld [vmem:[#allocation4 + $0x724] sm:$0xf0] }
  0x9f   :  { %v173_v49 = vadd.f32 %v172_v48, %v87_v38  ;;  %v185_v50 = vpop.f32.mrf.mxu3  ;;  %1855 = vmatpush.bf16.msrb.mxu0 %v3081_v39  ;;  %v148_v51 = vpop.f32.mrf.mxu0  ;;  %1868 = vmatpush.bf16.msrb.mxu1 %v3337_v42  ;;  %v2920_v38 = vld [vmem:[#allocation4 + $0x88] sm:$0xf]  ;;  %v3753_v44 = vor.u32 %v4363_v37, %v3752_v36  ;;  %v4175_v36 = vld [vmem:[#allocation4 + $0x14c] sm:$0xf] }
  0xa0   :  { %v186_v56 = vadd.f32 %v185_v50, %v88_v41  ;;  %v161_v57 = vpop.f32.mrf.mxu1  ;;  %v4155_v39 = vld [vmem:[#allocation4 + $0xa4] sm:$0xf0] }
  0xa1   :  { %v191_v62 = vmax.f32 %v173_v49, 0.0  ;;  %v3176_v41 = vld [vmem:[#allocation4 + $0x288] sm:$0xf]  ;;  %v2921_v48 = vor.u32 %v4155_v39, %v2920_v38  ;;  %v3018_v38 = vld [vmem:[#allocation4 + $0x168] sm:$0xf0] }
  0xa2   :  { %v192_v1 = vmax.f32 %v186_v56, 0.0  ;;  %v4219_v42 = vld [vmem:[#allocation4 + $0x2a4] sm:$0xf0]  ;;  %v3465_v56 = vor.u32 %v4291_v47, %v3464_v46  ;;  %v4239_v39 = vld [vmem:[#allocation4 + $0x34c] sm:$0xf] }
  0xa3   :  { %v4614_v3 = vpack.c.bf16 %v191_v62, %v191_v62  ;;  %1856 = vmatpush.bf16.msrb.mxu0 %v3049_v52  ;;  %1869 = vmatpush.bf16.msrb.mxu1 %v3305_v58  ;;  %v3177_v49 = vor.u32 %v4219_v42, %v3176_v41  ;;  %v3720_v50 = vld [vmem:[#allocation4 + $0x6c8] sm:$0xf]  ;;  %v3145_v62 = vor.u32 %v4211_v55, %v3144_v54  ;;  %v3274_v41 = vld [vmem:[#allocation4 + $0x368] sm:$0xf0] }
  0xa4   :  { %v4616_v9 = vpack.c.bf16 %v192_v1, %v192_v1  ;;  %v4355_v51 = vld [vmem:[#allocation4 + $0x6e4] sm:$0xf0]  ;;  %v4311_v46 = vld [vmem:[#allocation4 + $0x58c] sm:$0xf] }
  0xa5   :  { %1785 = vmatmul.bf16.vlgmr.msrb.gmra.mxu2 %v4614_v3  ;;  %v2888_v52 = vld [vmem:[#allocation4 + $0x48] sm:$0xf]  ;;  %v3721_v57 = vor.u32 %v4355_v51, %v3720_v50  ;;  %v3562_v47 = vld [vmem:[#allocation4 + $0x5a8] sm:$0xf0] }
  0xa6   :  { %1798 = vmatmul.bf16.vlgmr.msrb.gmra.mxu3 %v4616_v9  ;;  %1881 = vmatpush.bf16.msrb.mxu2 %v3593_v2  ;;  %v174_v16 = vpop.f32.mrf.mxu2  ;;  %v3432_v58 = vld [vmem:[#allocation4 + $0x488] sm:$0xf]  ;;  %v2889_v61 = vor.u32 %v4147_v53, %v2888_v52  ;;  %v4375_v50 = vld [vmem:[#allocation4 + $0x78c] sm:$0xf] }
  0xa7   :  { %1894 = vmatpush.bf16.msrb.mxu3 %v3849_v4  ;;  %v187_v18 = vpop.f32.mrf.mxu3  ;;  %1857 = vmatpush.bf16.msrb.mxu0 %v3017_v5  ;;  %v4139_v1 = vld [vmem:[#allocation4 + $0x24] sm:$0xf0]  ;;  %v4191_v5 = vld [vmem:[#allocation4 + $0x1cc] sm:$0xf]  ;;  %v3433_v6 = vor.u32 %v4283_v59, %v3432_v58 }
  0xa8   :  { %1870 = vmatpush.bf16.msrb.mxu1 %v3273_v10  ;;  %v3112_v2 = vld [vmem:[#allocation4 + $0x208] sm:$0xf]  ;;  %v3338_v10 = vld [vmem:[#allocation4 + $0x3e8] sm:$0xf0]  ;;  %v2857_v14 = vor.u32 %v4139_v1, %v2856_v0  ;;  %v3085_v18 = vor.u32 %v4191_v5, %v3082_v7 }
  0xa9   :  { %v4203_v4 = vld [vmem:[#allocation4 + $0x224] sm:$0xf0]  ;;  %v3818_v51 = vld [vmem:[#allocation4 + $0x7a8] sm:$0xf0] }
  0xaa   :  { %1882 = vmatpush.bf16.msrb.mxu2 %v3561_v17  ;;  %v3113_v15 = vor.u32 %v4203_v4, %v3112_v2  ;;  %v3656_v16 = vld [vmem:[#allocation4 + $0x648] sm:$0xf]  ;;  %v4167_v52 = vld [vmem:[#allocation4 + $0x10c] sm:$0xf] }
  0xab   :  { %1895 = vmatpush.bf16.msrb.mxu3 %v3817_v19  ;;  %1858 = vmatpush.bf16.msrb.mxu0 %v2985_v20  ;;  %v4339_v17 = vld [vmem:[#allocation4 + $0x664] sm:$0xf0]  ;;  %v3341_v19 = vor.u32 %v4255_v8, %v3338_v10  ;;  %v4183_v20 = vld [vmem:[#allocation4 + $0x18c] sm:$0xf] }
  0xac   :  { %1871 = vmatpush.bf16.msrb.mxu1 %v3241_v23  ;;  %v4247_v23 = vld [vmem:[#allocation4 + $0x38c] sm:$0xf]  ;;  %v3657_v25 = vor.u32 %v4339_v17, %v3656_v16  ;;  %v3368_v26 = vld [vmem:[#allocation4 + $0x408] sm:$0xf]  ;;  %v3053_v32 = vor.u32 %v4183_v20, %v3050_v22 }
  0xad   :  { %v4267_v27 = vld [vmem:[#allocation4 + $0x424] sm:$0xf0]  ;;  %v3309_v33 = vor.u32 %v4247_v23, %v3306_v24  ;;  %v2986_v53 = vld [vmem:[#allocation4 + $0x128] sm:$0xf0] }
  0xae   :  { %1883 = vmatpush.bf16.msrb.mxu2 %v3529_v30  ;;  %1811 = vmatmul.bf16.vlgmr.msra.gmra.mxu0 %v4608_v40  ;;  %v3624_v28 = vld [vmem:[#allocation4 + $0x608] sm:$0xf]  ;;  %v4319_v30 = vld [vmem:[#allocation4 + $0x5cc] sm:$0xf]  ;;  %v3369_v37 = vor.u32 %v4267_v27, %v3368_v26  ;;  %v2989_v60 = vor.u32 %v4167_v52, %v2986_v53 }
  0xaf   :  { %1896 = vmatpush.bf16.msrb.mxu3 %v3785_v31  ;;  %1824 = vmatmul.bf16.vlgmr.msra.gmra.mxu1 %v4610_v45  ;;  %v4331_v29 = vld [vmem:[#allocation4 + $0x624] sm:$0xf0]  ;;  %v3594_v31 = vld [vmem:[#allocation4 + $0x5e8] sm:$0xf0] }
  0xb0   :  { %1859 = vmatpush.bf16.msrb.mxu0 %v2953_v34  ;;  %1872 = vmatpush.bf16.msrb.mxu1 %v3209_v35  ;;  %v4383_v34 = vld [vmem:[#allocation4 + $0x7cc] sm:$0xf]  ;;  %v3625_v42 = vor.u32 %v4331_v29, %v3624_v28 }
  0xb1   :  { %v3850_v35 = vld [vmem:[#allocation4 + $0x7e8] sm:$0xf0] }
  0xb2   :  { %1884 = vmatpush.bf16.msrb.mxu2 %v3497_v43  ;;  %v3597_v43 = vor.u32 %v4319_v30, %v3594_v31  ;;  %v4231_v54 = vld [vmem:[#allocation4 + $0x30c] sm:$0xf] }
  0xb3   :  { %1897 = vmatpush.bf16.msrb.mxu3 %v3753_v44  ;;  %v3853_v44 = vor.u32 %v4383_v34, %v3850_v35  ;;  %v3242_v55 = vld [vmem:[#allocation4 + $0x328] sm:$0xf0] }
  0xb4   :  { %1860 = vmatpush.bf16.msrb.mxu0 %v2921_v48  ;;  %1873 = vmatpush.bf16.msrb.mxu1 %v3177_v49  ;;  %v3021_v48 = vor.u32 %v4175_v36, %v3018_v38  ;;  %v3277_v49 = vor.u32 %v4239_v39, %v3274_v41  ;;  %v4303_v58 = vld [vmem:[#allocation4 + $0x54c] sm:$0xf] }
  0xb5   :  { %1837 = vmatmul.bf16.vlgmr.msra.gmra.mxu2 %v4614_v3  ;;  %v3530_v59 = vld [vmem:[#allocation4 + $0x568] sm:$0xf0] }
  0xb6   :  { %1850 = vmatmul.bf16.vlgmr.msra.gmra.mxu3 %v4616_v9  ;;  %1885 = vmatpush.bf16.msrb.mxu2 %v3465_v56  ;;  %v3565_v56 = vor.u32 %v4311_v46, %v3562_v47  ;;  %v4159_v0 = vld [vmem:[#allocation4 + $0xcc] sm:$0xf]  ;;  %v3533_v5 = vor.u32 %v4303_v58, %v3530_v59  ;;  %v4196_v46 = vld [vmem:[#allocation4 + $0x1ec] sm:$0xf0] }
  0xb7   :  { %1898 = vmatpush.bf16.msrb.mxu3 %v3721_v57  ;;  %v3821_v57 = vor.u32 %v4375_v50, %v3818_v51  ;;  %v2954_v1 = vld [vmem:[#allocation4 + $0xe8] sm:$0xf0]  ;;  %v3344_v47 = vld [vmem:[#allocation4 + $0x3d0] sm:$0xf] }
  0xb8   :  { %1861 = vmatpush.bf16.msrb.mxu0 %v2889_v61  ;;  %1874 = vmatpush.bf16.msrb.mxu1 %v3145_v62  ;;  %v3245_v61 = vor.u32 %v4231_v54, %v3242_v55  ;;  %v4367_v62 = vld [vmem:[#allocation4 + $0x74c] sm:$0xf]  ;;  %v2957_v10 = vor.u32 %v4159_v0, %v2954_v1  ;;  %v3056_v58 = vld [vmem:[#allocation4 + $0x190] sm:$0xf] }
  0xb9   :  { %v4223_v2 = vld [vmem:[#allocation4 + $0x2cc] sm:$0xf] }
  0xba   :  { %1886 = vmatpush.bf16.msrb.mxu2 %v3433_v6  ;;  %v3210_v4 = vld [vmem:[#allocation4 + $0x2e8] sm:$0xf0]  ;;  %v3789_v6 = vor.u32 %v4367_v62, %v3786_v63  ;;  %v4252_v62 = vld [vmem:[#allocation4 + $0x3ac] sm:$0xf0] }
  0xbb   :  { %1899 = vmatpush.bf16.msrb.mxu3 %v3689_v11  ;;  %v4295_v7 = vld [vmem:[#allocation4 + $0x50c] sm:$0xf]  ;;  %v3213_v11 = vor.u32 %v4223_v2, %v3210_v4 }
  0xbc   :  { %1862 = vmatpush.bf16.msrb.mxu0 %v2857_v14  ;;  %1875 = vmatpush.bf16.msrb.mxu1 %v3113_v15  ;;  %v3498_v8 = vld [vmem:[#allocation4 + $0x528] sm:$0xf0] }
  0xbd   :  { %v4151_v14 = vld [vmem:[#allocation4 + $0x8c] sm:$0xf] }
  0xbe   :  { %1887 = vmatpush.bf16.msrb.mxu2 %v3401_v21  ;;  %v2922_v15 = vld [vmem:[#allocation4 + $0xa8] sm:$0xf0] }
  0xbf   :  { %1900 = vmatpush.bf16.msrb.mxu3 %v3657_v25  ;;  %1863 = vmatmul.bf16.vlgmr.msrb.gmra.mxu0 %v4608_v40  ;;  %v4215_v16 = vld [vmem:[#allocation4 + $0x28c] sm:$0xf]  ;;  %v2925_v22 = vor.u32 %v4151_v14, %v2922_v15  ;;  %v4180_v14 = vld [vmem:[#allocation4 + $0x16c] sm:$0xf0] }
  0xc0   :  { %1907 = vmatpush.bf16.msra.mxu0 %v3085_v18  ;;  %1920 = vmatpush.bf16.msra.mxu1 %v3341_v19  ;;  %v3178_v17 = vld [vmem:[#allocation4 + $0x2a8] sm:$0xf0]  ;;  %v3501_v18 = vor.u32 %v4295_v7, %v3498_v8  ;;  %v3757_v19 = vor.u32 %v4359_v12, %v3754_v13  ;;  %v3024_v13 = vld [vmem:[#allocation4 + $0x150] sm:$0xf] }
  0xc1   :  { %1876 = vmatmul.bf16.vlgmr.msrb.gmra.mxu1 %v4610_v45  ;;  %v4287_v20 = vld [vmem:[#allocation4 + $0x4cc] sm:$0xf]  ;;  %v3181_v23 = vor.u32 %v4215_v16, %v3178_v17  ;;  %v3280_v17 = vld [vmem:[#allocation4 + $0x350] sm:$0xf] }
  0xc2   :  { %1888 = vmatpush.bf16.msrb.mxu2 %v3369_v37  ;;  %v3466_v21 = vld [vmem:[#allocation4 + $0x4e8] sm:$0xf0] }
  0xc3   :  { %1901 = vmatpush.bf16.msrb.mxu3 %v3625_v42  ;;  %v4351_v24 = vld [vmem:[#allocation4 + $0x6cc] sm:$0xf]  ;;  %v3469_v30 = vor.u32 %v4287_v20, %v3466_v21  ;;  %v3568_v20 = vld [vmem:[#allocation4 + $0x590] sm:$0xf] }
  0xc4   :  { %1908 = vmatpush.bf16.msra.mxu0 %v3053_v32  ;;  %1921 = vmatpush.bf16.msra.mxu1 %v3309_v33  ;;  %v3722_v25 = vld [vmem:[#allocation4 + $0x6e8] sm:$0xf0]  ;;  %v4316_v21 = vld [vmem:[#allocation4 + $0x5ac] sm:$0xf0] }
  0xc5   :  { %1889 = vmatmul.bf16.vlgmr.msrb.gmra.mxu2 %v4614_v3  ;;  %v4143_v26 = vld [vmem:[#allocation4 + $0x4c] sm:$0xf]  ;;  %v3725_v31 = vor.u32 %v4351_v24, %v3722_v25  ;;  %v4380_v24 = vld [vmem:[#allocation4 + $0x7ac] sm:$0xf0] }
  0xc6   :  { %1933 = vmatpush.bf16.msra.mxu2 %v3597_v43  ;;  %1902 = vmatmul.bf16.vlgmr.msrb.gmra.mxu3 %v4616_v9  ;;  %v2890_v27 = vld [vmem:[#allocation4 + $0x68] sm:$0xf0]  ;;  %v3088_v43 = vld [vmem:[#allocation4 + $0x1d0] sm:$0xf] }
  0xc7   :  { %1946 = vmatpush.bf16.msra.mxu3 %v3853_v44  ;;  %v4207_v28 = vld [vmem:[#allocation4 + $0x24c] sm:$0xf]  ;;  %v2893_v35 = vor.u32 %v4143_v26, %v2890_v27  ;;  %v2992_v26 = vld [vmem:[#allocation4 + $0x110] sm:$0xf] }
  0xc8   :  { %1909 = vmatpush.bf16.msra.mxu0 %v3021_v48  ;;  %1922 = vmatpush.bf16.msra.mxu1 %v3277_v49  ;;  %v3146_v29 = vld [vmem:[#allocation4 + $0x268] sm:$0xf0]  ;;  %v4260_v48 = vld [vmem:[#allocation4 + $0x3ec] sm:$0xf0] }
  0xc9   :  { %v4279_v32 = vld [vmem:[#allocation4 + $0x48c] sm:$0xf]  ;;  %v3149_v36 = vor.u32 %v4207_v28, %v3146_v29  ;;  %v4172_v27 = vld [vmem:[#allocation4 + $0x12c] sm:$0xf0]  ;;  %v3569_v28 = vor.u32 %v4316_v21, %v3568_v20  ;;  %v3090_v20 = vld [vmem:[#allocation4 + $0x1f0] sm:$0xf0] }
  0xca   :  { %1934 = vmatpush.bf16.msra.mxu2 %v3565_v56  ;;  %v3434_v33 = vld [vmem:[#allocation4 + $0x4a8] sm:$0xf0]  ;;  %v3089_v56 = vor.u32 %v4196_v46, %v3088_v43  ;;  %v3248_v29 = vld [vmem:[#allocation4 + $0x310] sm:$0xf]  ;;  %v4256_v21 = vld [vmem:[#allocation4 + $0x3d4] sm:$0xf] }
  0xcb   :  { %1947 = vmatpush.bf16.msra.mxu3 %v3821_v57  ;;  %v4343_v34 = vld [vmem:[#allocation4 + $0x68c] sm:$0xf]  ;;  %v3437_v44 = vor.u32 %v4279_v32, %v3434_v33  ;;  %v3345_v57 = vor.u32 %v4260_v48, %v3344_v47  ;;  %v3536_v32 = vld [vmem:[#allocation4 + $0x550] sm:$0xf] }
  0xcc   :  { %1910 = vmatpush.bf16.msra.mxu0 %v2989_v60  ;;  %1923 = vmatpush.bf16.msra.mxu1 %v3245_v61  ;;  %v3690_v37 = vld [vmem:[#allocation4 + $0x6a8] sm:$0xf0]  ;;  %v4188_v60 = vld [vmem:[#allocation4 + $0x1ac] sm:$0xf0] }
  0xcd   :  { %v4135_v38 = vld [vmem:[#allocation4 + $0xc] sm:$0xf]  ;;  %v3693_v49 = vor.u32 %v4343_v34, %v3690_v37  ;;  %v3312_v61 = vld [vmem:[#allocation4 + $0x390] sm:$0xf]  ;;  %v3057_v7 = vor.u32 %v4188_v60, %v3056_v58  ;;  %v2993_v34 = vor.u32 %v4172_v27, %v2992_v26 }
  0xce   :  { %1935 = vmatpush.bf16.msra.mxu2 %v3533_v5  ;;  %v2858_v39 = vld [vmem:[#allocation4 + $0x28] sm:$0xf0]  ;;  %v3600_v5 = vld [vmem:[#allocation4 + $0x5d0] sm:$0xf]  ;;  %v3313_v8 = vor.u32 %v4252_v62, %v3312_v61 }
  0xcf   :  { %1948 = vmatpush.bf16.msra.mxu3 %v3789_v6  ;;  %v4199_v41 = vld [vmem:[#allocation4 + $0x20c] sm:$0xf]  ;;  %v2861_v52 = vor.u32 %v4135_v38, %v2858_v39  ;;  %v4324_v6 = vld [vmem:[#allocation4 + $0x5ec] sm:$0xf0] }
  0xd0   :  { %1911 = vmatpush.bf16.msra.mxu0 %v2957_v10  ;;  %1924 = vmatpush.bf16.msra.mxu1 %v3213_v11  ;;  %v3114_v42 = vld [vmem:[#allocation4 + $0x228] sm:$0xf0]  ;;  %v3856_v10 = vld [vmem:[#allocation4 + $0x7d0] sm:$0xf]  ;;  %v3601_v16 = vor.u32 %v4324_v6, %v3600_v5 }
  0xd1   :  { %v4271_v50 = vld [vmem:[#allocation4 + $0x44c] sm:$0xf]  ;;  %v3117_v53 = vor.u32 %v4199_v41, %v3114_v42  ;;  %v4388_v11 = vld [vmem:[#allocation4 + $0x7ec] sm:$0xf0] }
  0xd2   :  { %1936 = vmatpush.bf16.msra.mxu2 %v3501_v18  ;;  %v3402_v51 = vld [vmem:[#allocation4 + $0x468] sm:$0xf0]  ;;  %v4244_v18 = vld [vmem:[#allocation4 + $0x36c] sm:$0xf0] }
  0xd3   :  { %1949 = vmatpush.bf16.msra.mxu3 %v3757_v19  ;;  %v4335_v54 = vld [vmem:[#allocation4 + $0x64c] sm:$0xf]  ;;  %v3405_v59 = vor.u32 %v4271_v50, %v3402_v51  ;;  %v3857_v19 = vor.u32 %v4388_v11, %v3856_v10  ;;  %v3281_v25 = vor.u32 %v4244_v18, %v3280_v17  ;;  %v4308_v33 = vld [vmem:[#allocation4 + $0x56c] sm:$0xf0] }
  0xd4   :  { %1912 = vmatpush.bf16.msra.mxu0 %v2925_v22  ;;  %1925 = vmatpush.bf16.msra.mxu1 %v3181_v23  ;;  %v3658_v55 = vld [vmem:[#allocation4 + $0x668] sm:$0xf0]  ;;  %v3025_v22 = vor.u32 %v4180_v14, %v3024_v13  ;;  %v3824_v23 = vld [vmem:[#allocation4 + $0x790] sm:$0xf]  ;;  %v3537_v41 = vor.u32 %v4308_v33, %v3536_v32 }
  0xd5   :  { %v3661_v63 = vor.u32 %v4335_v54, %v3658_v55  ;;  %v4263_v0 = vld [vmem:[#allocation4 + $0x40c] sm:$0xf]  ;;  %v2960_v38 = vld [vmem:[#allocation4 + $0xd0] sm:$0xf] }
  0xd6   :  { %1937 = vmatpush.bf16.msra.mxu2 %v3469_v30  ;;  %v3370_v1 = vld [vmem:[#allocation4 + $0x428] sm:$0xf0]  ;;  %v4236_v30 = vld [vmem:[#allocation4 + $0x32c] sm:$0xf0] }
  0xd7   :  { %1950 = vmatpush.bf16.msra.mxu3 %v3725_v31  ;;  %v4327_v2 = vld [vmem:[#allocation4 + $0x60c] sm:$0xf]  ;;  %v3373_v12 = vor.u32 %v4263_v0, %v3370_v1  ;;  %v3825_v31 = vor.u32 %v4380_v24, %v3824_v23  ;;  %v3249_v37 = vor.u32 %v4236_v30, %v3248_v29  ;;  %v4164_v39 = vld [vmem:[#allocation4 + $0xec] sm:$0xf0]  ;;  %v3346_v23 = vld [vmem:[#allocation4 + $0x3f0] sm:$0xf0] }
  0xd8   :  { %1913 = vmatpush.bf16.msra.mxu0 %v2893_v35  ;;  %1926 = vmatpush.bf16.msra.mxu1 %v3149_v36  ;;  %v3626_v4 = vld [vmem:[#allocation4 + $0x628] sm:$0xf0]  ;;  %v3792_v35 = vld [vmem:[#allocation4 + $0x750] sm:$0xf]  ;;  %v2961_v48 = vor.u32 %v4164_v39, %v2960_v38  ;;  %v3349_v32 = vor.u32 %v4256_v21, %v3346_v23  ;;  %v3506_v21 = vld [vmem:[#allocation4 + $0x530] sm:$0xf0] }
  0xd9   :  { %v3629_v15 = vor.u32 %v4327_v2, %v3626_v4  ;;  %v4372_v36 = vld [vmem:[#allocation4 + $0x76c] sm:$0xf0]  ;;  %v4360_v23 = vld [vmem:[#allocation4 + $0x714] sm:$0xf] }
  0xda   :  { %1938 = vmatpush.bf16.msra.mxu2 %v3437_v44  ;;  %v3216_v42 = vld [vmem:[#allocation4 + $0x2d0] sm:$0xf]  ;;  %v3793_v44 = vor.u32 %v4372_v36, %v3792_v35  ;;  %v4248_v35 = vld [vmem:[#allocation4 + $0x394] sm:$0xf] }
  0xdb   :  { %1951 = vmatpush.bf16.msra.mxu3 %v3693_v49  ;;  %v4228_v43 = vld [vmem:[#allocation4 + $0x2ec] sm:$0xf0]  ;;  %v3314_v36 = vld [vmem:[#allocation4 + $0x3b0] sm:$0xf0] }
  0xdc   :  { %1914 = vmatpush.bf16.msra.mxu0 %v2861_v52  ;;  %1927 = vmatpush.bf16.msra.mxu1 %v3117_v53  ;;  %v3504_v46 = vld [vmem:[#allocation4 + $0x510] sm:$0xf]  ;;  %v3217_v51 = vor.u32 %v4228_v43, %v3216_v42  ;;  %v4320_v43 = vld [vmem:[#allocation4 + $0x5d4] sm:$0xf] }
  0xdd   :  { %v4300_v47 = vld [vmem:[#allocation4 + $0x52c] sm:$0xf0] }
  0xde   :  { %1939 = vmatpush.bf16.msra.mxu2 %v3405_v59  ;;  %v3760_v49 = vld [vmem:[#allocation4 + $0x710] sm:$0xf]  ;;  %v3505_v54 = vor.u32 %v4300_v47, %v3504_v46  ;;  %v4384_v47 = vld [vmem:[#allocation4 + $0x7d4] sm:$0xf] }
  0xdf   :  { %1952 = vmatpush.bf16.msra.mxu3 %v3661_v63  ;;  %1915 = vmatmul.bf16.vlgmr.msra.gmra.mxu0 %v4608_v40  ;;  %v4364_v50 = vld [vmem:[#allocation4 + $0x72c] sm:$0xf0] }
  0xe0   :  { %1959 = vmatpush.bf16.msrb.mxu0 %v3089_v56  ;;  %1972 = vmatpush.bf16.msrb.mxu1 %v3345_v57  ;;  %v2928_v52 = vld [vmem:[#allocation4 + $0x90] sm:$0xf]  ;;  %v3761_v57 = vor.u32 %v4364_v50, %v3760_v49  ;;  %v3317_v49 = vor.u32 %v4248_v35, %v3314_v36  ;;  %v4352_v35 = vld [vmem:[#allocation4 + $0x6d4] sm:$0xf] }
  0xe1   :  { %1928 = vmatmul.bf16.vlgmr.msra.gmra.mxu1 %v4610_v45  ;;  %v4156_v53 = vld [vmem:[#allocation4 + $0xac] sm:$0xf0]  ;;  %v3730_v36 = vld [vmem:[#allocation4 + $0x6f0] sm:$0xf0] }
  0xe2   :  { %1940 = vmatpush.bf16.msra.mxu2 %v3373_v12  ;;  %v3184_v55 = vld [vmem:[#allocation4 + $0x290] sm:$0xf]  ;;  %v2929_v60 = vor.u32 %v4156_v53, %v2928_v52  ;;  %v3026_v52 = vld [vmem:[#allocation4 + $0x170] sm:$0xf0] }
  0xe3   :  { %1953 = vmatpush.bf16.msra.mxu3 %v3629_v15  ;;  %v4220_v56 = vld [vmem:[#allocation4 + $0x2ac] sm:$0xf0] }
  0xe4   :  { %1960 = vmatpush.bf16.msrb.mxu0 %v3057_v7  ;;  %1973 = vmatpush.bf16.msrb.mxu1 %v3313_v8  ;;  %v3472_v58 = vld [vmem:[#allocation4 + $0x4d0] sm:$0xf]  ;;  %v3185_v63 = vor.u32 %v4220_v56, %v3184_v55  ;;  %v4240_v55 = vld [vmem:[#allocation4 + $0x354] sm:$0xf] }
  0xe5   :  { %1941 = vmatmul.bf16.vlgmr.msra.gmra.mxu2 %v4614_v3  ;;  %v4292_v59 = vld [vmem:[#allocation4 + $0x4ec] sm:$0xf0]  ;;  %v3282_v56 = vld [vmem:[#allocation4 + $0x370] sm:$0xf0] }
  0xe6   :  { %1985 = vmatpush.bf16.msrb.mxu2 %v3601_v16  ;;  %1954 = vmatmul.bf16.vlgmr.msra.gmra.mxu3 %v4616_v9  ;;  %v3728_v61 = vld [vmem:[#allocation4 + $0x6d0] sm:$0xf]  ;;  %v3473_v2 = vor.u32 %v4292_v59, %v3472_v58  ;;  %v4312_v58 = vld [vmem:[#allocation4 + $0x594] sm:$0xf] }
  0xe7   :  { %1998 = vmatpush.bf16.msrb.mxu3 %v3857_v19  ;;  %v4356_v62 = vld [vmem:[#allocation4 + $0x6ec] sm:$0xf0]  ;;  %v4192_v19 = vld [vmem:[#allocation4 + $0x1d4] sm:$0xf] }
  0xe8   :  { %1961 = vmatpush.bf16.msrb.mxu0 %v3025_v22  ;;  %1974 = vmatpush.bf16.msrb.mxu1 %v3281_v25  ;;  %v2896_v0 = vld [vmem:[#allocation4 + $0x50] sm:$0xf]  ;;  %v3729_v6 = vor.u32 %v4356_v62, %v3728_v61  ;;  %v3093_v30 = vor.u32 %v4192_v19, %v3090_v20  ;;  %v3570_v59 = vld [vmem:[#allocation4 + $0x5b0] sm:$0xf0] }
  0xe9   :  { %v4148_v1 = vld [vmem:[#allocation4 + $0x6c] sm:$0xf0]  ;;  %v4376_v61 = vld [vmem:[#allocation4 + $0x794] sm:$0xf] }
  0xea   :  { %1986 = vmatpush.bf16.msrb.mxu2 %v3569_v28  ;;  %v3152_v4 = vld [vmem:[#allocation4 + $0x250] sm:$0xf]  ;;  %v2897_v10 = vor.u32 %v4148_v1, %v2896_v0  ;;  %v3826_v62 = vld [vmem:[#allocation4 + $0x7b0] sm:$0xf0] }
  0xeb   :  { %1999 = vmatpush.bf16.msrb.mxu3 %v3825_v31  ;;  %v4212_v5 = vld [vmem:[#allocation4 + $0x26c] sm:$0xf0]  ;;  %v4184_v31 = vld [vmem:[#allocation4 + $0x194] sm:$0xf] }
  0xec   :  { %1962 = vmatpush.bf16.msrb.mxu0 %v2993_v34  ;;  %1975 = vmatpush.bf16.msrb.mxu1 %v3249_v37  ;;  %v3440_v7 = vld [vmem:[#allocation4 + $0x490] sm:$0xf]  ;;  %v3153_v14 = vor.u32 %v4212_v5, %v3152_v4  ;;  %v3058_v34 = vld [vmem:[#allocation4 + $0x1b0] sm:$0xf0] }
  0xed   :  { %v4284_v8 = vld [vmem:[#allocation4 + $0x4ac] sm:$0xf0]  ;;  %v3061_v46 = vor.u32 %v4184_v31, %v3058_v34  ;;  %v4168_v0 = vld [vmem:[#allocation4 + $0x114] sm:$0xf] }
  0xee   :  { %1987 = vmatpush.bf16.msrb.mxu2 %v3537_v41  ;;  %v3696_v11 = vld [vmem:[#allocation4 + $0x690] sm:$0xf]  ;;  %v3441_v18 = vor.u32 %v4284_v8, %v3440_v7  ;;  %v2994_v1 = vld [vmem:[#allocation4 + $0x130] sm:$0xf0] }
  0xef   :  { %2000 = vmatpush.bf16.msrb.mxu3 %v3793_v44  ;;  %v4348_v12 = vld [vmem:[#allocation4 + $0x6ac] sm:$0xf0]  ;;  %v3602_v44 = vld [vmem:[#allocation4 + $0x5f0] sm:$0xf0] }
  0xf0   :  { %1963 = vmatpush.bf16.msrb.mxu0 %v2961_v48  ;;  %1976 = vmatpush.bf16.msrb.mxu1 %v3217_v51  ;;  %v2864_v13 = vld [vmem:[#allocation4 + $0x10] sm:$0xf]  ;;  %v3697_v22 = vor.u32 %v4348_v12, %v3696_v11  ;;  %v3858_v48 = vld [vmem:[#allocation4 + $0x7f0] sm:$0xf0] }
  0xf1   :  { %v4140_v15 = vld [vmem:[#allocation4 + $0x2c] sm:$0xf0]  ;;  %v4176_v51 = vld [vmem:[#allocation4 + $0x154] sm:$0xf] }
  0xf2   :  { %1988 = vmatpush.bf16.msrb.mxu2 %v3505_v54  ;;  %v3120_v16 = vld [vmem:[#allocation4 + $0x210] sm:$0xf]  ;;  %v2865_v26 = vor.u32 %v4140_v15, %v2864_v13  ;;  %v3605_v54 = vor.u32 %v4320_v43, %v3602_v44  ;;  %v4232_v4 = vld [vmem:[#allocation4 + $0x314] sm:$0xf]  ;;  %v3733_v44 = vor.u32 %v4352_v35, %v3730_v36 }
  0xf3   :  { %2001 = vmatpush.bf16.msrb.mxu3 %v3761_v57  ;;  %v4204_v17 = vld [vmem:[#allocation4 + $0x22c] sm:$0xf0]  ;;  %v3861_v57 = vor.u32 %v4384_v47, %v3858_v48  ;;  %v3250_v5 = vld [vmem:[#allocation4 + $0x330] sm:$0xf0] }
  0xf4   :  { %1964 = vmatpush.bf16.msrb.mxu0 %v2929_v60  ;;  %1977 = vmatpush.bf16.msrb.mxu1 %v3185_v63  ;;  %v3408_v24 = vld [vmem:[#allocation4 + $0x450] sm:$0xf]  ;;  %v3121_v29 = vor.u32 %v4204_v17, %v3120_v16  ;;  %v3029_v60 = vor.u32 %v4176_v51, %v3026_v52  ;;  %v3285_v63 = vor.u32 %v4240_v55, %v3282_v56  ;;  %v4304_v7 = vld [vmem:[#allocation4 + $0x554] sm:$0xf] }
  0xf5   :  { %v4276_v25 = vld [vmem:[#allocation4 + $0x46c] sm:$0xf0]  ;;  %v3538_v8 = vld [vmem:[#allocation4 + $0x570] sm:$0xf0]  ;;  %v3253_v13 = vor.u32 %v4232_v4, %v3250_v5 }
  0xf6   :  { %1989 = vmatpush.bf16.msrb.mxu2 %v3473_v2  ;;  %v3664_v27 = vld [vmem:[#allocation4 + $0x650] sm:$0xf]  ;;  %v3409_v33 = vor.u32 %v4276_v25, %v3408_v24  ;;  %v3573_v2 = vor.u32 %v4312_v58, %v3570_v59  ;;  %v4368_v11 = vld [vmem:[#allocation4 + $0x754] sm:$0xf]  ;;  %v3541_v16 = vor.u32 %v4304_v7, %v3538_v8  ;;  %v4197_v58 = vld [vmem:[#allocation4 + $0x1f4] sm:$0xf0] }
  0xf7   :  { %2002 = vmatpush.bf16.msrb.mxu3 %v3729_v6  ;;  %v4340_v28 = vld [vmem:[#allocation4 + $0x66c] sm:$0xf0]  ;;  %v3829_v6 = vor.u32 %v4376_v61, %v3826_v62  ;;  %v3794_v12 = vld [vmem:[#allocation4 + $0x770] sm:$0xf0]  ;;  %v3352_v59 = vld [vmem:[#allocation4 + $0x3d8] sm:$0xf] }
  0xf8   :  { %1965 = vmatpush.bf16.msrb.mxu0 %v2897_v10  ;;  %1978 = vmatpush.bf16.msrb.mxu1 %v3153_v14  ;;  %v3665_v37 = vor.u32 %v4340_v28, %v3664_v27  ;;  %v3376_v38 = vld [vmem:[#allocation4 + $0x410] sm:$0xf]  ;;  %v2997_v10 = vor.u32 %v4168_v0, %v2994_v1  ;;  %v4160_v14 = vld [vmem:[#allocation4 + $0xd4] sm:$0xf]  ;;  %v3797_v19 = vor.u32 %v4368_v11, %v3794_v12  ;;  %v4261_v61 = vld [vmem:[#allocation4 + $0x3f4] sm:$0xf0] }
  0xf9   :  { %v4268_v39 = vld [vmem:[#allocation4 + $0x42c] sm:$0xf0]  ;;  %v2962_v15 = vld [vmem:[#allocation4 + $0xf0] sm:$0xf0]  ;;  %v3353_v7 = vor.u32 %v4261_v61, %v3352_v59  ;;  %v3320_v11 = vld [vmem:[#allocation4 + $0x398] sm:$0xf] }
  0xfa   :  { %1990 = vmatpush.bf16.msrb.mxu2 %v3441_v18  ;;  %v3632_v41 = vld [vmem:[#allocation4 + $0x610] sm:$0xf]  ;;  %v3377_v50 = vor.u32 %v4268_v39, %v3376_v38  ;;  %v4224_v17 = vld [vmem:[#allocation4 + $0x2d4] sm:$0xf]  ;;  %v4253_v12 = vld [vmem:[#allocation4 + $0x3b4] sm:$0xf0] }
  0xfb   :  { %2003 = vmatpush.bf16.msrb.mxu3 %v3697_v22  ;;  %v4332_v42 = vld [vmem:[#allocation4 + $0x62c] sm:$0xf0]  ;;  %v3218_v18 = vld [vmem:[#allocation4 + $0x2f0] sm:$0xf0]  ;;  %v2965_v22 = vor.u32 %v4160_v14, %v2962_v15  ;;  %v3224_v61 = vld [vmem:[#allocation4 + $0x2d8] sm:$0xf] }
  0xfc   :  { %1966 = vmatpush.bf16.msrb.mxu0 %v2865_v26  ;;  %1979 = vmatpush.bf16.msrb.mxu1 %v3121_v29  ;;  %v3633_v53 = vor.u32 %v4332_v42, %v3632_v41  ;;  %v4296_v20 = vld [vmem:[#allocation4 + $0x514] sm:$0xf]  ;;  %v3221_v25 = vor.u32 %v4224_v17, %v3218_v18  ;;  %v3608_v18 = vld [vmem:[#allocation4 + $0x5d8] sm:$0xf] }
  0xfd   :  { %v3762_v24 = vld [vmem:[#allocation4 + $0x730] sm:$0xf0]  ;;  %v3509_v28 = vor.u32 %v4296_v20, %v3506_v21  ;;  %v3864_v21 = vld [vmem:[#allocation4 + $0x7d8] sm:$0xf] }
  0xfe   :  { %1991 = vmatpush.bf16.msrb.mxu2 %v3409_v33  ;;  %v4152_v26 = vld [vmem:[#allocation4 + $0x94] sm:$0xf]  ;;  %v3765_v31 = vor.u32 %v4360_v23, %v3762_v24  ;;  %v3321_v23 = vor.u32 %v4253_v12, %v3320_v11  ;;  %v3192_v11 = vld [vmem:[#allocation4 + $0x298] sm:$0xf] }
  0xff   :  { %2004 = vmatpush.bf16.msrb.mxu3 %v3665_v37  ;;  %1967 = vmatmul.bf16.vlgmr.msrb.gmra.mxu0 %v4608_v40  ;;  %v2930_v27 = vld [vmem:[#allocation4 + $0xb0] sm:$0xf0]  ;;  %v4221_v12 = vld [vmem:[#allocation4 + $0x2b4] sm:$0xf0] }
 0x100   :  { %2011 = vmatpush.bf16.msra.mxu0 %v3093_v30  ;;  %2024 = vmatpush.bf16.msra.mxu1 %v3349_v32  ;;  %v4216_v29 = vld [vmem:[#allocation4 + $0x294] sm:$0xf]  ;;  %v2933_v34 = vor.u32 %v4152_v26, %v2930_v27  ;;  %v4181_v26 = vld [vmem:[#allocation4 + $0x174] sm:$0xf0]  ;;  %v4639_v27 = vld [vmem:[%s4704_s4] sm:$0xff] }
 0x101   :  { %1980 = vmatmul.bf16.vlgmr.msrb.gmra.mxu1 %v4610_v45  ;;  %v3186_v30 = vld [vmem:[#allocation4 + $0x2b0] sm:$0xf0]  ;;  %v455_v36 = vperm.slane %v4639_v27, 0 }
 0x102   :  { %1992 = vmatpush.bf16.msrb.mxu2 %v3377_v50  ;;  %v4288_v32 = vld [vmem:[#allocation4 + $0x4d4] sm:$0xf]  ;;  %v3189_v37 = vor.u32 %v4216_v29, %v3186_v30  ;;  %v3288_v30 = vld [vmem:[#allocation4 + $0x358] sm:$0xf] }
 0x103   :  { %2005 = vmatpush.bf16.msrb.mxu3 %v3633_v53  ;;  %v3474_v33 = vld [vmem:[#allocation4 + $0x4f0] sm:$0xf0] }
 0x104   :  { %2012 = vmatpush.bf16.msra.mxu0 %v3061_v46  ;;  %2025 = vmatpush.bf16.msra.mxu1 %v3317_v49  ;;  %v4144_v38 = vld [vmem:[#allocation4 + $0x54] sm:$0xf]  ;;  %v3477_v41 = vor.u32 %v4288_v32, %v3474_v33  ;;  %v3576_v33 = vld [vmem:[#allocation4 + $0x598] sm:$0xf] }
 0x105   :  { %1993 = vmatmul.bf16.vlgmr.msrb.gmra.mxu2 %v4614_v3  ;;  %v2898_v39 = vld [vmem:[#allocation4 + $0x70] sm:$0xf0] }
 0x106   :  { %2037 = vmatpush.bf16.msra.mxu2 %v3605_v54  ;;  %2006 = vmatmul.bf16.vlgmr.msrb.gmra.mxu3 %v4616_v9  ;;  %v4208_v42 = vld [vmem:[#allocation4 + $0x254] sm:$0xf]  ;;  %v2901_v48 = vor.u32 %v4144_v38, %v2898_v39  ;;  %v4381_v38 = vld [vmem:[#allocation4 + $0x7b4] sm:$0xf0] }
 0x107   :  { %2050 = vmatpush.bf16.msra.mxu3 %v3861_v57  ;;  %v3154_v43 = vld [vmem:[#allocation4 + $0x270] sm:$0xf0]  ;;  %v3096_v57 = vld [vmem:[#allocation4 + $0x1d8] sm:$0xf] }
 0x108   :  { %2013 = vmatpush.bf16.msra.mxu0 %v3029_v60  ;;  %2026 = vmatpush.bf16.msra.mxu1 %v3285_v63  ;;  %v4280_v46 = vld [vmem:[#allocation4 + $0x494] sm:$0xf]  ;;  %v3157_v52 = vor.u32 %v4208_v42, %v3154_v43  ;;  %v3097_v5 = vor.u32 %v4197_v58, %v3096_v57  ;;  %v4173_v42 = vld [vmem:[#allocation4 + $0x134] sm:$0xf0] }
 0x109   :  { %v3442_v47 = vld [vmem:[#allocation4 + $0x4b0] sm:$0xf0]  ;;  %v2968_v57 = vld [vmem:[#allocation4 + $0xd8] sm:$0xf] }
 0x10a   :  { %2038 = vmatpush.bf16.msra.mxu2 %v3573_v2  ;;  %v4344_v49 = vld [vmem:[#allocation4 + $0x694] sm:$0xf]  ;;  %v3445_v56 = vor.u32 %v4280_v46, %v3442_v47  ;;  %v4237_v46 = vld [vmem:[#allocation4 + $0x334] sm:$0xf0] }
 0x10b   :  { %2051 = vmatpush.bf16.msra.mxu3 %v3829_v6  ;;  %v3698_v50 = vld [vmem:[#allocation4 + $0x6b0] sm:$0xf0]  ;;  %v3064_v6 = vld [vmem:[#allocation4 + $0x198] sm:$0xf] }
 0x10c   :  { %2014 = vmatpush.bf16.msra.mxu0 %v2997_v10  ;;  %2027 = vmatpush.bf16.msra.mxu1 %v3253_v13  ;;  %v4136_v51 = vld [vmem:[#allocation4 + $0x14] sm:$0xf]  ;;  %v3701_v60 = vor.u32 %v4344_v49, %v3698_v50  ;;  %v4189_v10 = vld [vmem:[#allocation4 + $0x1b4] sm:$0xf0] }
 0x10d   :  { %v2866_v53 = vld [vmem:[#allocation4 + $0x30] sm:$0xf0]  ;;  %v3065_v20 = vor.u32 %v4189_v10, %v3064_v6  ;;  %v3544_v49 = vld [vmem:[#allocation4 + $0x558] sm:$0xf] }
 0x10e   :  { %2039 = vmatpush.bf16.msra.mxu2 %v3541_v16  ;;  %v4200_v54 = vld [vmem:[#allocation4 + $0x214] sm:$0xf]  ;;  %v2869_v0 = vor.u32 %v4136_v51, %v2866_v53  ;;  %v4309_v50 = vld [vmem:[#allocation4 + $0x574] sm:$0xf0] }
 0x10f   :  { %2052 = vmatpush.bf16.msra.mxu3 %v3797_v19  ;;  %v3122_v55 = vld [vmem:[#allocation4 + $0x230] sm:$0xf0]  ;;  %v4325_v19 = vld [vmem:[#allocation4 + $0x5f4] sm:$0xf0] }
 0x110   :  { %2015 = vmatpush.bf16.msra.mxu0 %v2965_v22  ;;  %2028 = vmatpush.bf16.msra.mxu1 %v3221_v25  ;;  %v4272_v62 = vld [vmem:[#allocation4 + $0x454] sm:$0xf]  ;;  %v3125_v4 = vor.u32 %v4200_v54, %v3122_v55  ;;  %v4389_v22 = vld [vmem:[#allocation4 + $0x7f4] sm:$0xf0]  ;;  %v3609_v29 = vor.u32 %v4325_v19, %v3608_v18 }
 0x111   :  { %v3410_v63 = vld [vmem:[#allocation4 + $0x470] sm:$0xf0]  ;;  %v3032_v25 = vld [vmem:[#allocation4 + $0x158] sm:$0xf]  ;;  %v3865_v32 = vor.u32 %v4389_v22, %v3864_v21  ;;  %v3193_v21 = vor.u32 %v4221_v12, %v3192_v11 }
 0x112   :  { %2040 = vmatpush.bf16.msra.mxu2 %v3509_v28  ;;  %v4336_v1 = vld [vmem:[#allocation4 + $0x654] sm:$0xf]  ;;  %v3413_v8 = vor.u32 %v4272_v62, %v3410_v63  ;;  %v3033_v35 = vor.u32 %v4181_v26, %v3032_v25  ;;  %v3800_v54 = vld [vmem:[#allocation4 + $0x758] sm:$0xf] }
 0x113   :  { %2053 = vmatpush.bf16.msra.mxu3 %v3765_v31  ;;  %v3666_v2 = vld [vmem:[#allocation4 + $0x670] sm:$0xf0]  ;;  %v4245_v31 = vld [vmem:[#allocation4 + $0x374] sm:$0xf0] }
 0x114   :  { %2016 = vmatpush.bf16.msra.mxu0 %v2933_v34  ;;  %2029 = vmatpush.bf16.msra.mxu1 %v3189_v37  ;;  %v3669_v13 = vor.u32 %v4336_v1, %v3666_v2  ;;  %v4264_v14 = vld [vmem:[#allocation4 + $0x414] sm:$0xf]  ;;  %v4317_v34 = vld [vmem:[#allocation4 + $0x5b4] sm:$0xf0]  ;;  %v3289_v39 = vor.u32 %v4245_v31, %v3288_v30 }
 0x115   :  { %v3378_v15 = vld [vmem:[#allocation4 + $0x430] sm:$0xf0]  ;;  %v3832_v37 = vld [vmem:[#allocation4 + $0x798] sm:$0xf]  ;;  %v3577_v43 = vor.u32 %v4317_v34, %v3576_v33 }
 0x116   :  { %2041 = vmatpush.bf16.msra.mxu2 %v3477_v41  ;;  %v4328_v16 = vld [vmem:[#allocation4 + $0x614] sm:$0xf]  ;;  %v3381_v24 = vor.u32 %v4264_v14, %v3378_v15  ;;  %v3000_v41 = vld [vmem:[#allocation4 + $0x118] sm:$0xf] }
 0x117   :  { %2054 = vmatpush.bf16.msra.mxu3 %v3733_v44  ;;  %v3634_v17 = vld [vmem:[#allocation4 + $0x630] sm:$0xf0]  ;;  %v3256_v44 = vld [vmem:[#allocation4 + $0x318] sm:$0xf]  ;;  %v3001_v53 = vor.u32 %v4173_v42, %v3000_v41 }
 0x118   :  { %2017 = vmatpush.bf16.msra.mxu0 %v2901_v48  ;;  %2030 = vmatpush.bf16.msra.mxu1 %v3157_v52  ;;  %v3637_v28 = vor.u32 %v4328_v16, %v3634_v17  ;;  %v3833_v48 = vor.u32 %v4381_v38, %v3832_v37  ;;  %v4373_v55 = vld [vmem:[#allocation4 + $0x774] sm:$0xf0] }
 0x119   :  { %v4165_v58 = vld [vmem:[#allocation4 + $0xf4] sm:$0xf0]  ;;  %v3801_v63 = vor.u32 %v4373_v55, %v3800_v54 }
 0x11a   :  { %2042 = vmatpush.bf16.msra.mxu2 %v3445_v56  ;;  %v3257_v56 = vor.u32 %v4237_v46, %v3256_v44  ;;  %v4229_v62 = vld [vmem:[#allocation4 + $0x2f4] sm:$0xf0]  ;;  %v2969_v2 = vor.u32 %v4165_v58, %v2968_v57  ;;  %v3098_v44 = vld [vmem:[#allocation4 + $0x1f8] sm:$0xf0] }
 0x11b   :  { %2055 = vmatpush.bf16.msra.mxu3 %v3701_v60  ;;  %v1760_v47 = vpop.f32.mrf.mxu0  ;;  %v1773_v52 = vpop.f32.mrf.mxu1  ;;  %v3545_v60 = vor.u32 %v4309_v50, %v3544_v49  ;;  %v4301_v1 = vld [vmem:[#allocation4 + $0x534] sm:$0xf0]  ;;  %v3225_v6 = vor.u32 %v4229_v62, %v3224_v61  ;;  %v4257_v46 = vld [vmem:[#allocation4 + $0x3dc] sm:$0xf] }
 0x11c   :  { %2018 = vmatpush.bf16.msra.mxu0 %v2869_v0  ;;  %2031 = vmatpush.bf16.msra.mxu1 %v3125_v4  ;;  %v1761_v51 = vadd.f32 %v1760_v47, %v455_v36  ;;  %v3512_v0 = vld [vmem:[#allocation4 + $0x518] sm:$0xf]  ;;  %v3354_v49 = vld [vmem:[#allocation4 + $0x3f8] sm:$0xf0] }
 0x11d   :  { %v3768_v4 = vld [vmem:[#allocation4 + $0x718] sm:$0xf]  ;;  %v3513_v10 = vor.u32 %v4301_v1, %v3512_v0  ;;  %v4185_v58 = vld [vmem:[#allocation4 + $0x19c] sm:$0xf] }
 0x11e   :  { %2043 = vmatpush.bf16.msra.mxu2 %v3413_v8  ;;  %v4646_v59 = vadd.f32 %v1773_v52, %v1761_v51  ;;  %v4157_v8 = vld [vmem:[#allocation4 + $0xb4] sm:$0xf0]  ;;  %v3066_v62 = vld [vmem:[#allocation4 + $0x1b8] sm:$0xf0] }
 0x11f   :  { %2056 = vmatpush.bf16.msra.mxu3 %v3669_v13  ;;  %2019 = vmatmul.bf16.vlgmr.msra.gmra.mxu0 %v4608_v40  ;;  %v3480_v15 = vld [vmem:[#allocation4 + $0x4d8] sm:$0xf]  ;;  %v3322_v0 = vld [vmem:[#allocation4 + $0x3b8] sm:$0xf0]  ;;  %v3069_v12 = vor.u32 %v4185_v58, %v3066_v62 }
 0x120   :  { %2063 = vmatpush.bf16.msrb.mxu0 %v3097_v5  ;;  %2076 = vmatpush.bf16.msrb.mxu1 %v3353_v7  ;;  %v4365_v5 = vld [vmem:[#allocation4 + $0x734] sm:$0xf0]  ;;  %v3514_v62 = vld [vmem:[#allocation4 + $0x538] sm:$0xf0] }
 0x121   :  { %2032 = vmatmul.bf16.vlgmr.msra.gmra.mxu1 %v4610_v45  ;;  %v2936_v7 = vld [vmem:[#allocation4 + $0x98] sm:$0xf]  ;;  %v3769_v14 = vor.u32 %v4365_v5, %v3768_v4 }
 0x122   :  { %2044 = vmatpush.bf16.msra.mxu2 %v3381_v24  ;;  %v4293_v16 = vld [vmem:[#allocation4 + $0x4f4] sm:$0xf0]  ;;  %v2937_v18 = vor.u32 %v4157_v8, %v2936_v7  ;;  %v4321_v8 = vld [vmem:[#allocation4 + $0x5dc] sm:$0xf] }
 0x123   :  { %2057 = vmatpush.bf16.msra.mxu3 %v3637_v28  ;;  %v1762_v13 = vpop.f32.mrf.mxu0  ;;  %v1775_v17 = vpop.f32.mrf.mxu1  ;;  %v3736_v19 = vld [vmem:[#allocation4 + $0x6d8] sm:$0xf]  ;;  %v3481_v24 = vor.u32 %v4293_v16, %v3480_v15 }
 0x124   :  { %2064 = vmatpush.bf16.msrb.mxu0 %v3065_v20  ;;  %2077 = vmatpush.bf16.msrb.mxu1 %v3321_v23  ;;  %v4357_v20 = vld [vmem:[#allocation4 + $0x6f4] sm:$0xf0]  ;;  %v4385_v13 = vld [vmem:[#allocation4 + $0x7dc] sm:$0xf] }
 0x125   :  { %2045 = vmatmul.bf16.vlgmr.msra.gmra.mxu2 %v4614_v3  ;;  %v2904_v22 = vld [vmem:[#allocation4 + $0x58] sm:$0xf]  ;;  %v3737_v28 = vor.u32 %v4357_v20, %v3736_v19  ;;  %v4177_v17 = vld [vmem:[#allocation4 + $0x15c] sm:$0xf] }
 0x126   :  { %2089 = vmatpush.bf16.msrb.mxu2 %v3609_v29  ;;  %2058 = vmatmul.bf16.vlgmr.msra.gmra.mxu3 %v4616_v9  ;;  %v4149_v23 = vld [vmem:[#allocation4 + $0x74] sm:$0xf0] }
 0x127   :  { %2102 = vmatpush.bf16.msrb.mxu3 %v3865_v32  ;;  %v3160_v25 = vld [vmem:[#allocation4 + $0x258] sm:$0xf]  ;;  %v2905_v32 = vor.u32 %v4149_v23, %v2904_v22  ;;  %v4241_v22 = vld [vmem:[#allocation4 + $0x35c] sm:$0xf] }
 0x128   :  { %2065 = vmatpush.bf16.msrb.mxu0 %v3033_v35  ;;  %2078 = vmatpush.bf16.msrb.mxu1 %v3289_v39  ;;  %v4213_v26 = vld [vmem:[#allocation4 + $0x274] sm:$0xf0]  ;;  %v4648_v31 = vpop.f32.mrf.mxu2  ;;  %v3290_v23 = vld [vmem:[#allocation4 + $0x378] sm:$0xf0] }
 0x129   :  { %v3448_v29 = vld [vmem:[#allocation4 + $0x498] sm:$0xf]  ;;  %v4650_v36 = vpop.f32.mrf.mxu3  ;;  %v3161_v37 = vor.u32 %v4213_v26, %v3160_v25  ;;  %v4313_v26 = vld [vmem:[#allocation4 + $0x59c] sm:$0xf] }
 0x12a   :  { %2090 = vmatpush.bf16.msrb.mxu2 %v3577_v43  ;;  %v4285_v30 = vld [vmem:[#allocation4 + $0x4b4] sm:$0xf0]  ;;  %v4193_v43 = vld [vmem:[#allocation4 + $0x1dc] sm:$0xf] }
 0x12b   :  { %2103 = vmatpush.bf16.msrb.mxu3 %v3833_v48  ;;  %v3704_v33 = vld [vmem:[#allocation4 + $0x698] sm:$0xf]  ;;  %v3449_v42 = vor.u32 %v4285_v30, %v3448_v29  ;;  %v4652_v47 = vpop.f32.mrf.mxu0  ;;  %v3101_v57 = vor.u32 %v4193_v43, %v3098_v44  ;;  %v4377_v30 = vld [vmem:[#allocation4 + $0x79c] sm:$0xf] }
 0x12c   :  { %2066 = vmatpush.bf16.msrb.mxu0 %v3001_v53  ;;  %2079 = vmatpush.bf16.msrb.mxu1 %v3257_v56  ;;  %v4349_v34 = vld [vmem:[#allocation4 + $0x6b4] sm:$0xf0]  ;;  %v4654_v52 = vpop.f32.mrf.mxu1  ;;  %v4305_v43 = vld [vmem:[#allocation4 + $0x55c] sm:$0xf] }
 0x12d   :  { %v2872_v35 = vld [vmem:[#allocation4 + $0x18] sm:$0xf]  ;;  %v3705_v48 = vor.u32 %v4349_v34, %v3704_v33  ;;  %v3293_v33 = vor.u32 %v4241_v22, %v3290_v23  ;;  %v4169_v34 = vld [vmem:[#allocation4 + $0x11c] sm:$0xf] }
 0x12e   :  { %2091 = vmatpush.bf16.msrb.mxu2 %v3545_v60  ;;  %v4141_v38 = vld [vmem:[#allocation4 + $0x34] sm:$0xf0]  ;;  %v3357_v60 = vor.u32 %v4257_v46, %v3354_v49  ;;  %v3546_v44 = vld [vmem:[#allocation4 + $0x578] sm:$0xf0] }
 0x12f   :  { %2104 = vmatpush.bf16.msrb.mxu3 %v3801_v63  ;;  %v3128_v39 = vld [vmem:[#allocation4 + $0x218] sm:$0xf]  ;;  %v2873_v53 = vor.u32 %v4141_v38, %v2872_v35  ;;  %v4249_v63 = vld [vmem:[#allocation4 + $0x39c] sm:$0xf] }
 0x130   :  { %2067 = vmatpush.bf16.msrb.mxu0 %v2969_v2  ;;  %2080 = vmatpush.bf16.msrb.mxu1 %v3225_v6  ;;  %v4205_v41 = vld [vmem:[#allocation4 + $0x234] sm:$0xf0]  ;;  %v1788_v6 = vpop.f32.mrf.mxu2  ;;  %v3325_v15 = vor.u32 %v4249_v63, %v3322_v0  ;;  %v3002_v35 = vld [vmem:[#allocation4 + $0x138] sm:$0xf0] }
 0x131   :  { %v3416_v50 = vld [vmem:[#allocation4 + $0x458] sm:$0xf]  ;;  %v3129_v56 = vor.u32 %v4205_v41, %v3128_v39  ;;  %v1801_v11 = vpop.f32.mrf.mxu3  ;;  %v4233_v38 = vld [vmem:[#allocation4 + $0x31c] sm:$0xf] }
 0x132   :  { %2092 = vmatpush.bf16.msrb.mxu2 %v3513_v10  ;;  %v4277_v51 = vld [vmem:[#allocation4 + $0x474] sm:$0xf0]  ;;  %v3610_v10 = vld [vmem:[#allocation4 + $0x5f8] sm:$0xf0] }
 0x133   :  { %2105 = vmatpush.bf16.msrb.mxu3 %v3769_v14  ;;  %v3672_v54 = vld [vmem:[#allocation4 + $0x658] sm:$0xf]  ;;  %v3417_v61 = vor.u32 %v4277_v51, %v3416_v50  ;;  %v3866_v14 = vld [vmem:[#allocation4 + $0x7f8] sm:$0xf0]  ;;  %v1814_v19 = vpop.f32.mrf.mxu0 }
 0x134   :  { %2068 = vmatpush.bf16.msrb.mxu0 %v2937_v18  ;;  %2081 = vmatpush.bf16.msrb.mxu1 %v3193_v21  ;;  %v4341_v55 = vld [vmem:[#allocation4 + $0x674] sm:$0xf0]  ;;  %v3034_v18 = vld [vmem:[#allocation4 + $0x178] sm:$0xf0]  ;;  %v3613_v21 = vor.u32 %v4321_v8, %v3610_v10  ;;  %v3869_v25 = vor.u32 %v4385_v13, %v3866_v14 }
 0x135   :  { %v3673_v1 = vor.u32 %v4341_v55, %v3672_v54  ;;  %v3384_v2 = vld [vmem:[#allocation4 + $0x418] sm:$0xf]  ;;  %v3037_v29 = vor.u32 %v4177_v17, %v3034_v18  ;;  %v3258_v39 = vld [vmem:[#allocation4 + $0x338] sm:$0xf0]  ;;  %v3549_v55 = vor.u32 %v4305_v43, %v3546_v44 }
 0x136   :  { %2093 = vmatpush.bf16.msrb.mxu2 %v3481_v24  ;;  %v4269_v4 = vld [vmem:[#allocation4 + $0x434] sm:$0xf0]  ;;  %v1827_v24 = vpop.f32.mrf.mxu1  ;;  %v4369_v49 = vld [vmem:[#allocation4 + $0x75c] sm:$0xf]  ;;  %v3261_v51 = vor.u32 %v4233_v38, %v3258_v39 }
 0x137   :  { %2106 = vmatpush.bf16.msrb.mxu3 %v3737_v28  ;;  %v3640_v5 = vld [vmem:[#allocation4 + $0x618] sm:$0xf]  ;;  %v3385_v16 = vor.u32 %v4269_v4, %v3384_v2  ;;  %v3578_v28 = vld [vmem:[#allocation4 + $0x5b8] sm:$0xf0] }
 0x138   :  { %2069 = vmatpush.bf16.msrb.mxu0 %v2905_v32  ;;  %2082 = vmatpush.bf16.msrb.mxu1 %v3161_v37  ;;  %v4333_v7 = vld [vmem:[#allocation4 + $0x634] sm:$0xf0]  ;;  %v3834_v32 = vld [vmem:[#allocation4 + $0x7b8] sm:$0xf0]  ;;  %v3581_v37 = vor.u32 %v4313_v26, %v3578_v28  ;;  %v4658_v41 = vpop.f32.mrf.mxu2 }
 0x139   :  { %v3641_v20 = vor.u32 %v4333_v7, %v3640_v5  ;;  %v4660_v46 = vpop.f32.mrf.mxu3  ;;  %v3802_v50 = vld [vmem:[#allocation4 + $0x778] sm:$0xf0] }
 0x13a   :  { %2094 = vmatpush.bf16.msrb.mxu2 %v3449_v42  ;;  %v3837_v42 = vor.u32 %v4377_v30, %v3834_v32  ;;  %v2970_v54 = vld [vmem:[#allocation4 + $0xf8] sm:$0xf0] }
 0x13b   :  { %2107 = vmatpush.bf16.msrb.mxu3 %v3705_v48  ;;  %v3005_v48 = vor.u32 %v4169_v34, %v3002_v35  ;;  %v3770_v2 = vld [vmem:[#allocation4 + $0x738] sm:$0xf0] }
 0x13c   :  { %2070 = vmatpush.bf16.msrb.mxu0 %v2873_v53  ;;  %2083 = vmatpush.bf16.msrb.mxu1 %v3129_v56  ;;  %v4161_v53 = vld [vmem:[#allocation4 + $0xdc] sm:$0xf]  ;;  %v4664_v58 = vpop.f32.mrf.mxu0 }
 0x13d   :  { %v4225_v56 = vld [vmem:[#allocation4 + $0x2dc] sm:$0xf]  ;;  %v2973_v0 = vor.u32 %v4161_v53, %v2970_v54 }
 0x13e   :  { %2095 = vmatpush.bf16.msrb.mxu2 %v3417_v61  ;;  %v4297_v61 = vld [vmem:[#allocation4 + $0x51c] sm:$0xf]  ;;  %v4666_v63 = vpop.f32.mrf.mxu1 }
 0x13f   :  { %2108 = vmatpush.bf16.msrb.mxu3 %v3673_v1  ;;  %2071 = vmatmul.bf16.vlgmr.msrb.gmra.mxu0 %v4608_v40  ;;  %v4361_v1 = vld [vmem:[#allocation4 + $0x71c] sm:$0xf]  ;;  %v3517_v7 = vor.u32 %v4297_v61, %v3514_v62 }
 0x140   :  { %2115 = vmatpush.bf16.msra.mxu0 %v3101_v57  ;;  %2128 = vmatpush.bf16.msra.mxu1 %v3357_v60  ;;  %v3226_v57 = vld [vmem:[#allocation4 + $0x2f8] sm:$0xf0]  ;;  %v3805_v60 = vor.u32 %v4369_v49, %v3802_v50  ;;  %v1840_v11 = vpop.f32.mrf.mxu2 }
 0x141   :  { %2084 = vmatmul.bf16.vlgmr.msrb.gmra.mxu1 %v4610_v45  ;;  %v3229_v4 = vor.u32 %v4225_v56, %v3226_v57  ;;  %v4153_v5 = vld [vmem:[#allocation4 + $0x9c] sm:$0xf] }
 0x142   :  { %2096 = vmatpush.bf16.msrb.mxu2 %v3385_v16  ;;  %v2938_v6 = vld [vmem:[#allocation4 + $0xb8] sm:$0xf0] }
 0x143   :  { %2109 = vmatpush.bf16.msrb.mxu3 %v3641_v20  ;;  %v4217_v8 = vld [vmem:[#allocation4 + $0x29c] sm:$0xf]  ;;  %v2941_v16 = vor.u32 %v4153_v5, %v2938_v6  ;;  %v4396_v5 = vld [vmem:[#allocation6 + $0x30] sm:$0xff] }
 0x144   :  { %2116 = vmatpush.bf16.msra.mxu0 %v3069_v12  ;;  %2129 = vmatpush.bf16.msra.mxu1 %v3325_v15  ;;  %v3194_v10 = vld [vmem:[#allocation4 + $0x2b8] sm:$0xf0]  ;;  %v3773_v12 = vor.u32 %v4361_v1, %v3770_v2  ;;  %v1853_v15 = vpop.f32.mrf.mxu3  ;;  %v4404_v6 = vld [vmem:[#allocation6 + $0x70] sm:$0xff] }
 0x145   :  { %2097 = vmatmul.bf16.vlgmr.msrb.gmra.mxu2 %v4614_v3  ;;  %v4289_v13 = vld [vmem:[#allocation4 + $0x4dc] sm:$0xf]  ;;  %v3197_v19 = vor.u32 %v4217_v8, %v3194_v10  ;;  %v4403_v15 = vld [vmem:[#allocation6 + $0x68] sm:$0xff] }
 0x146   :  { %2141 = vmatpush.bf16.msra.mxu2 %v3613_v21  ;;  %2110 = vmatmul.bf16.vlgmr.msrb.gmra.mxu3 %v4616_v9  ;;  %v3482_v14 = vld [vmem:[#allocation4 + $0x4f8] sm:$0xf0]  ;;  %v1879_v30 = vpop.f32.mrf.mxu1 }
 0x147   :  { %2154 = vmatpush.bf16.msra.mxu3 %v3869_v25  ;;  %v4353_v17 = vld [vmem:[#allocation4 + $0x6dc] sm:$0xf]  ;;  %v3485_v22 = vor.u32 %v4289_v13, %v3482_v14  ;;  %v1866_v25 = vpop.f32.mrf.mxu0  ;;  %v4395_v14 = vld [vmem:[#allocation6 + $0x28] sm:$0xff]  ;;  %v4392_v30 = vld [vmem:[#allocation6 + $0x10] sm:$0xff] }
 0x148   :  { %2117 = vmatpush.bf16.msra.mxu0 %v3037_v29  ;;  %2130 = vmatpush.bf16.msra.mxu1 %v3293_v33  ;;  %v3738_v18 = vld [vmem:[#allocation4 + $0x6f8] sm:$0xf0]  ;;  %v4668_v50 = vpop.f32.mrf.mxu2  ;;  %v457_v25 = vperm.slane %v4639_v27, 2 }
 0x149   :  { %v4145_v20 = vld [vmem:[#allocation4 + $0x5c] sm:$0xf]  ;;  %v3741_v26 = vor.u32 %v4353_v17, %v3738_v18  ;;  %v4420_v17 = vld [vmem:[#allocation6 + $0xf0] sm:$0xff]  ;;  %v456_v18 = vperm.slane %v4639_v27, 1 }
 0x14a   :  { %2142 = vmatpush.bf16.msra.mxu2 %v3581_v37  ;;  %v2906_v21 = vld [vmem:[#allocation4 + $0x78] sm:$0xf0] }
 0x14b   :  { %2155 = vmatpush.bf16.msra.mxu3 %v3837_v42  ;;  %v4209_v23 = vld [vmem:[#allocation4 + $0x25c] sm:$0xf]  ;;  %v2909_v32 = vor.u32 %v4145_v20, %v2906_v21  ;;  %v4419_v21 = vld [vmem:[#allocation6 + $0xe8] sm:$0xff] }
 0x14c   :  { %2118 = vmatpush.bf16.msra.mxu0 %v3005_v48  ;;  %2131 = vmatpush.bf16.msra.mxu1 %v3261_v51  ;;  %v3162_v24 = vld [vmem:[#allocation4 + $0x278] sm:$0xf0]  ;;  %v4670_v51 = vpop.f32.mrf.mxu3 }
 0x14d   :  { %v4281_v28 = vld [vmem:[#allocation4 + $0x49c] sm:$0xf]  ;;  %v3165_v35 = vor.u32 %v4209_v23, %v3162_v24 }
 0x14e   :  { %2143 = vmatpush.bf16.msra.mxu2 %v3549_v55  ;;  %v3450_v29 = vld [vmem:[#allocation4 + $0x4b8] sm:$0xf0] }
 0x14f   :  { %2156 = vmatpush.bf16.msra.mxu3 %v3805_v60  ;;  %v4345_v33 = vld [vmem:[#allocation4 + $0x69c] sm:$0xf]  ;;  %v3453_v39 = vor.u32 %v4281_v28, %v3450_v29  ;;  %v4418_v28 = vld [vmem:[#allocation6 + $0xe0] sm:$0xff] }
 0x150   :  { %2119 = vmatpush.bf16.msra.mxu0 %v2973_v0  ;;  %2132 = vmatpush.bf16.msra.mxu1 %v3229_v4  ;;  %v3706_v34 = vld [vmem:[#allocation4 + $0x6b8] sm:$0xf0]  ;;  %v1892_v11 = vpop.f32.mrf.mxu2 }
 0x151   :  { %v4137_v37 = vld [vmem:[#allocation4 + $0x1c] sm:$0xf]  ;;  %v3709_v44 = vor.u32 %v4345_v33, %v3706_v34  ;;  %v4400_v33 = vld [vmem:[#allocation6 + $0x50] sm:$0xff] }
 0x152   :  { %2144 = vmatpush.bf16.msra.mxu2 %v3517_v7  ;;  %v2874_v38 = vld [vmem:[#allocation4 + $0x38] sm:$0xf0] }
 0x153   :  { %2157 = vmatpush.bf16.msra.mxu3 %v3773_v12  ;;  %v4201_v42 = vld [vmem:[#allocation4 + $0x21c] sm:$0xf]  ;;  %v2877_v53 = vor.u32 %v4137_v37, %v2874_v38 }
 0x154   :  { %2120 = vmatpush.bf16.msra.mxu0 %v2941_v16  ;;  %2133 = vmatpush.bf16.msra.mxu1 %v3197_v19  ;;  %v3130_v43 = vld [vmem:[#allocation4 + $0x238] sm:$0xf0]  ;;  %v1905_v12 = vpop.f32.mrf.mxu3  ;;  %v4412_v16 = vld [vmem:[#allocation6 + $0xb0] sm:$0xff]  ;;  %v4411_v19 = vld [vmem:[#allocation6 + $0xa8] sm:$0xff] }
 0x155   :  { %v4273_v48 = vld [vmem:[#allocation4 + $0x45c] sm:$0xf]  ;;  %v3133_v56 = vor.u32 %v4201_v42, %v3130_v43  ;;  %v4427_v12 = vld [vmem:[#allocation6 + $0x128] sm:$0xff] }
 0x156   :  { %2145 = vmatpush.bf16.msra.mxu2 %v3485_v22  ;;  %v3418_v49 = vld [vmem:[#allocation4 + $0x478] sm:$0xf0]  ;;  %v1813_v22 = vadd.f32 %v4652_v47, %v456_v18  ;;  %v1787_v47 = vadd.f32 %v4648_v31, %v4646_v59  ;;  %v4399_v59 = vld [vmem:[#allocation6 + $0x48] sm:$0xff] }
 0x157   :  { %2158 = vmatpush.bf16.msra.mxu3 %v3741_v26  ;;  %v4337_v54 = vld [vmem:[#allocation4 + $0x65c] sm:$0xf]  ;;  %v3421_v61 = vor.u32 %v4273_v48, %v3418_v49  ;;  %v458_v26 = vperm.slane %v4639_v27, 3 }
 0x158   :  { %2121 = vmatpush.bf16.msra.mxu0 %v2909_v32  ;;  %v3674_v55 = vld [vmem:[#allocation4 + $0x678] sm:$0xf0]  ;;  %2134 = vmatpush.bf16.msra.mxu1 %v3165_v35  ;;  %v1826_v29 = vadd.f32 %v4654_v52, %v1813_v22  ;;  %v1865_v32 = vadd.f32 %v4664_v58, %v457_v25  ;;  %v4391_v52 = vld [vmem:[#allocation6 + $0x8] sm:$0xff]  ;;  %v1800_v43 = vadd.f32 %v4650_v36, %v1787_v47  ;;  %v4398_v36 = vld [vmem:[#allocation6 + $0x40] sm:$0xff] }
 0x159   :  { %v4397_v57 = vld [vmem:[#allocation6 + $0x38] sm:$0xff]  ;;  %v3677_v62 = vor.u32 %v4337_v54, %v3674_v55  ;;  %v4432_v22 = vld [vmem:[#allocation6 + $0x150] sm:$0xff]  ;;  %v4422_v47 = vld [vmem:[#allocation6 + $0x100] sm:$0xff] }
 0x15a   :  { %2146 = vmatpush.bf16.msra.mxu2 %v3453_v39  ;;  %v4405_v60 = vld [vmem:[#allocation6 + $0x78] sm:$0xff]  ;;  %v1839_v34 = vadd.f32 %v4658_v41, %v1826_v29  ;;  %v4408_v41 = vld [vmem:[#allocation6 + $0x90] sm:$0xff] }
 0x15b   :  { %2159 = vmatpush.bf16.msra.mxu3 %v3709_v44  ;;  %v4265_v0 = vld [vmem:[#allocation4 + $0x41c] sm:$0xf]  ;;  %v1878_v44 = vadd.f32 %v4666_v63, %v1865_v32  ;;  %v4430_v32 = vld [vmem:[#allocation6 + $0x140] sm:$0xff] }
 0x15c   :  { %v3386_v1 = vld [vmem:[#allocation4 + $0x438] sm:$0xf0]  ;;  %2122 = vmatpush.bf16.msra.mxu0 %v2877_v53  ;;  %2135 = vmatpush.bf16.msra.mxu1 %v3133_v56  ;;  %v1916_v20 = vpop.f32.mrf.mxu0  ;;  %v1852_v31 = vadd.f32 %v4660_v46, %v1839_v34  ;;  %v4416_v53 = vld [vmem:[#allocation6 + $0xd0] sm:$0xff]  ;;  %v4390_v56 = vld [vmem:[#allocation6] sm:$0xff] }
 0x15d   :  { %v4329_v2 = vld [vmem:[#allocation4 + $0x61c] sm:$0xf]  ;;  %v3389_v7 = vor.u32 %v4265_v0, %v3386_v1  ;;  %v1917_v35 = vadd.f32 %v1916_v20, %v458_v26  ;;  %v1891_v48 = vadd.f32 %v4668_v50, %v1878_v44  ;;  %v4415_v0 = vld [vmem:[#allocation6 + $0xc8] sm:$0xff]  ;;  %v459_v20 = vperm.slane %v4639_v27, 4 }
 0x15e   :  { %v3642_v4 = vld [vmem:[#allocation4 + $0x638] sm:$0xf0]  ;;  %2147 = vmatpush.bf16.msra.mxu2 %v3421_v61  ;;  %v1929_v23 = vpop.f32.mrf.mxu1  ;;  %v4407_v61 = vld [vmem:[#allocation6 + $0x88] sm:$0xff] }
 0x15f   :  { %2160 = vmatpush.bf16.msra.mxu3 %v3677_v62  ;;  %2123 = vmatmul.bf16.vlgmr.msra.gmra.mxu0 %v4608_v40  ;;  %v3645_v8 = vor.u32 %v4329_v2, %v3642_v4  ;;  %v4413_v10 = vld [vmem:[#allocation6 + $0xb8] sm:$0xff]  ;;  %v4394_v40 = vld [vmem:[#allocation6 + $0x20] sm:$0xff]  ;;  %v1930_v58 = vadd.f32 %v1929_v23, %v1917_v35  ;;  %v1904_v62 = vadd.f32 %v4670_v51, %v1891_v48  ;;  %v4428_v2 = vld [vmem:[#allocation6 + $0x130] sm:$0xff] }
 0x160   :  { %2699 = vmatpush.bf16.msrb.mxu0 %v4397_v57  ;;  %2712 = vmatpush.bf16.msrb.mxu1 %v4405_v60  ;;  %v4421_v13 = vld [vmem:[#allocation6 + $0xf8] sm:$0xff]  ;;  %v2167_v57 = vmax.f32 %v1800_v43, 0.0  ;;  %v2168_v60 = vmax.f32 %v1852_v31, 0.0  ;;  %v4431_v26 = vld [vmem:[#allocation6 + $0x148] sm:$0xff]  ;;  %v4442_v43 = vld [vmem:[#allocation6 + $0x1a0] sm:$0xff] }
 0x161   :  { %2136 = vmatmul.bf16.vlgmr.msra.gmra.mxu1 %v4610_v45  ;;  %v4402_v45 = vld [vmem:[#allocation6 + $0x60] sm:$0xff]  ;;  %v4393_v24 = vld [vmem:[#allocation6 + $0x18] sm:$0xff] }
 0x162   :  { %2148 = vmatpush.bf16.msra.mxu2 %v3389_v7  ;;  %v4409_v37 = vld [vmem:[#allocation6 + $0x98] sm:$0xff]  ;;  %v2175_v1 = vpack.c.bf16 %v2167_v57, %v2167_v57  ;;  %v2176_v4 = vpack.c.bf16 %v2168_v60, %v2168_v60  ;;  %v2169_v7 = vmax.f32 %v1904_v62, 0.0  ;;  %v4452_v62 = vld [vmem:[#allocation6 + $0x1f0] sm:$0xff] }
 0x163   :  { %2161 = vmatpush.bf16.msra.mxu3 %v3645_v8  ;;  %v4417_v39 = vld [vmem:[#allocation6 + $0xd8] sm:$0xff] }
 0x164   :  { %2700 = vmatpush.bf16.msrb.mxu0 %v4396_v5  ;;  %2713 = vmatpush.bf16.msrb.mxu1 %v4404_v6  ;;  %v1918_v38 = vpop.f32.mrf.mxu0  ;;  %v4429_v63 = vld [vmem:[#allocation6 + $0x138] sm:$0xff]  ;;  %v4406_v5 = vld [vmem:[#allocation6 + $0x80] sm:$0xff]  ;;  %v4436_v6 = vld [vmem:[#allocation6 + $0x170] sm:$0xff] }
 0x165   :  { %2149 = vmatmul.bf16.vlgmr.msra.gmra.mxu2 %v4614_v3  ;;  %v4401_v3 = vld [vmem:[#allocation6 + $0x58] sm:$0xff] }
 0x166   :  { %2725 = vmatpush.bf16.msrb.mxu2 %v4413_v10  ;;  %2162 = vmatmul.bf16.vlgmr.msra.gmra.mxu3 %v4616_v9  ;;  %v4410_v9 = vld [vmem:[#allocation6 + $0xa0] sm:$0xff]  ;;  %v1931_v42 = vpop.f32.mrf.mxu1  ;;  %v4437_v46 = vld [vmem:[#allocation6 + $0x178] sm:$0xff] }
 0x167   :  { %2738 = vmatpush.bf16.msrb.mxu3 %v4421_v13  ;;  %v4414_v10 = vld [vmem:[#allocation6 + $0xc0] sm:$0xff]  ;;  %v4435_v13 = vld [vmem:[#allocation6 + $0x168] sm:$0xff]  ;;  %v4445_v34 = vld [vmem:[#allocation6 + $0x1b8] sm:$0xff] }
 0x168   :  { %2701 = vmatpush.bf16.msrb.mxu0 %v4395_v14  ;;  %2714 = vmatpush.bf16.msrb.mxu1 %v4403_v15  ;;  %v1942_v49 = vpop.f32.mrf.mxu2  ;;  %v2177_v14 = vpack.c.bf16 %v2169_v7, %v2169_v7 }
 0x169   :  { %v1943_v54 = vadd.f32 %v1942_v49, %v1930_v58  ;;  %v1955_v55 = vpop.f32.mrf.mxu3  ;;  %v460_v58 = vperm.slane %v4639_v27, 5 }
 0x16a   :  { %2726 = vmatpush.bf16.msrb.mxu2 %v4412_v16  ;;  %v4426_v16 = vld [vmem:[#allocation6 + $0x120] sm:$0xff] }
 0x16b   :  { %2739 = vmatpush.bf16.msrb.mxu3 %v4420_v17  ;;  %v1956_v50 = vadd.f32 %v1955_v55, %v1943_v54  ;;  %v4434_v17 = vld [vmem:[#allocation6 + $0x160] sm:$0xff]  ;;  %v4439_v54 = vld [vmem:[#allocation6 + $0x188] sm:$0xff] }
 0x16c   :  { %2702 = vmatpush.bf16.msrb.mxu0 %v4394_v40  ;;  %2715 = vmatpush.bf16.msrb.mxu1 %v4402_v45  ;;  %v4425_v45 = vld [vmem:[#allocation6 + $0x118] sm:$0xff] }
 0x16d   :  { %v2170_v11 = vmax.f32 %v1956_v50, 0.0 }
 0x16e   :  { %2727 = vmatpush.bf16.msrb.mxu2 %v4411_v19  ;;  %v4433_v19 = vld [vmem:[#allocation6 + $0x158] sm:$0xff] }
 0x16f   :  { %2740 = vmatpush.bf16.msrb.mxu3 %v4419_v21  ;;  %v2178_v15 = vpack.c.bf16 %v2170_v11, %v2170_v11  ;;  %v4424_v21 = vld [vmem:[#allocation6 + $0x110] sm:$0xff] }
 0x170   :  { %2703 = vmatpush.bf16.msrb.mxu0 %v4393_v24  ;;  %2716 = vmatpush.bf16.msrb.mxu1 %v4401_v3  ;;  %v1944_v8 = vpop.f32.mrf.mxu2  ;;  %v4423_v3 = vld [vmem:[#allocation6 + $0x108] sm:$0xff] }
 0x171   :  { %v1957_v51 = vpop.f32.mrf.mxu3  ;;  %v461_v8 = vperm.slane %v4639_v27, 6 }
 0x172   :  { %2728 = vmatpush.bf16.msrb.mxu2 %v4410_v9 }
 0x173   :  { %2741 = vmatpush.bf16.msrb.mxu3 %v4418_v28 }
 0x174   :  { %2704 = vmatpush.bf16.msrb.mxu0 %v4392_v30  ;;  %2717 = vmatpush.bf16.msrb.mxu1 %v4400_v33 }
 0x176   :  { %2729 = vmatpush.bf16.msrb.mxu2 %v4409_v37  ;;  %v4444_v37 = vld [vmem:[#allocation6 + $0x1b0] sm:$0xff] }
 0x177   :  { %2742 = vmatpush.bf16.msrb.mxu3 %v4417_v39 }
 0x178   :  { %2705 = vmatpush.bf16.msrb.mxu0 %v4391_v52  ;;  %2718 = vmatpush.bf16.msrb.mxu1 %v4399_v59  ;;  %v4443_v52 = vld [vmem:[#allocation6 + $0x1a8] sm:$0xff]  ;;  %v4441_v59 = vld [vmem:[#allocation6 + $0x198] sm:$0xff] }
 0x17a   :  { %2730 = vmatpush.bf16.msrb.mxu2 %v4408_v41  ;;  %v4440_v41 = vld [vmem:[#allocation6 + $0x190] sm:$0xff] }
 0x17b   :  { %2743 = vmatpush.bf16.msrb.mxu3 %v4416_v53 }
 0x17c   :  { %2706 = vmatpush.bf16.msrb.mxu0 %v4390_v56  ;;  %2719 = vmatpush.bf16.msrb.mxu1 %v4398_v36  ;;  %v1968_v18 = vpop.f32.mrf.mxu0 }
 0x17d   :  { %v1969_v23 = vadd.f32 %v1968_v18, %v459_v20  ;;  %v4446_v18 = vld [vmem:[#allocation6 + $0x1c0] sm:$0xff] }
 0x17e   :  { %2731 = vmatpush.bf16.msrb.mxu2 %v4407_v61  ;;  %v1981_v40 = vpop.f32.mrf.mxu1  ;;  %v4453_v61 = vld [vmem:[#allocation6 + $0x1f8] sm:$0xff] }
 0x17f   :  { %2744 = vmatpush.bf16.msrb.mxu3 %v4415_v0  ;;  %2707 = vmatmul.bf16.vlgmr.msrb.gmra.mxu0 %v2175_v1  ;;  %v1982_v9 = vadd.f32 %v1981_v40, %v1969_v23 }
 0x180   :  { %2751 = vmatpush.bf16.msra.mxu0 %v4429_v63  ;;  %2764 = vmatpush.bf16.msra.mxu1 %v4437_v46  ;;  %v4438_v63 = vld [vmem:[#allocation6 + $0x180] sm:$0xff] }
 0x181   :  { %2720 = vmatmul.bf16.vlgmr.msrb.gmra.mxu1 %v2176_v4  ;;  %v4450_v4 = vld [vmem:[#allocation6 + $0x1e0] sm:$0xff] }
 0x182   :  { %2732 = vmatpush.bf16.msrb.mxu2 %v4406_v5 }
 0x183   :  { %2745 = vmatpush.bf16.msrb.mxu3 %v4414_v10  ;;  %v4448_v10 = vld [vmem:[#allocation6 + $0x1d0] sm:$0xff] }
 0x184   :  { %2752 = vmatpush.bf16.msra.mxu0 %v4428_v2  ;;  %2765 = vmatpush.bf16.msra.mxu1 %v4436_v6  ;;  %v1970_v24 = vpop.f32.mrf.mxu0  ;;  %v4451_v2 = vld [vmem:[#allocation6 + $0x1e8] sm:$0xff]  ;;  %v4449_v6 = vld [vmem:[#allocation6 + $0x1d8] sm:$0xff] }
 0x185   :  { %2733 = vmatmul.bf16.vlgmr.msrb.gmra.mxu2 %v2177_v14  ;;  %v462_v24 = vperm.slane %v4639_v27, 7 }
 0x186   :  { %2746 = vmatmul.bf16.vlgmr.msrb.gmra.mxu3 %v2178_v15  ;;  %v1983_v25 = vpop.f32.mrf.mxu1  ;;  %2777 = vmatpush.bf16.msra.mxu2 %v4445_v34 }
 0x187   :  { %2790 = vmatpush.bf16.msra.mxu3 %v4453_v61 }
 0x188   :  { %2753 = vmatpush.bf16.msra.mxu0 %v4427_v12  ;;  %2766 = vmatpush.bf16.msra.mxu1 %v4435_v13  ;;  %v1994_v28 = vpop.f32.mrf.mxu2  ;;  %v4447_v13 = vld [vmem:[#allocation6 + $0x1c8] sm:$0xff] }
 0x189   :  { %v1995_v29 = vadd.f32 %v1994_v28, %v1982_v9  ;;  %v2007_v30 = vpop.f32.mrf.mxu3 }
 0x18a   :  { %2778 = vmatpush.bf16.msra.mxu2 %v4444_v37  ;;  %v4463_v37 = vld [vmem:[%s4706_s6] ss:$0 sm:$0xff] }
 0x18b   :  { %v2008_v33 = vadd.f32 %v2007_v30, %v1995_v29  ;;  %2791 = vmatpush.bf16.msra.mxu3 %v4452_v62 }
 0x18c   :  { %2754 = vmatpush.bf16.msra.mxu0 %v4426_v16  ;;  %2767 = vmatpush.bf16.msra.mxu1 %v4434_v17 }
 0x18d   :  { %v2171_v35 = vmax.f32 %v2008_v33, 0.0 }
 0x18e   :  { %2779 = vmatpush.bf16.msra.mxu2 %v4443_v52 }
 0x18f   :  { %v2179_v38 = vpack.c.bf16 %v2171_v35, %v2171_v35  ;;  %2792 = vmatpush.bf16.msra.mxu3 %v4451_v2 }
 0x190   :  { %2755 = vmatpush.bf16.msra.mxu0 %v4425_v45  ;;  %2768 = vmatpush.bf16.msra.mxu1 %v4433_v19  ;;  %v1996_v39 = vpop.f32.mrf.mxu2 }
 0x191   :  { %v2009_v42 = vpop.f32.mrf.mxu3 }
 0x192   :  { %2780 = vmatpush.bf16.msra.mxu2 %v4442_v43 }
 0x193   :  { %2793 = vmatpush.bf16.msra.mxu3 %v4450_v4 }
 0x194   :  { %2756 = vmatpush.bf16.msra.mxu0 %v4424_v21  ;;  %2769 = vmatpush.bf16.msra.mxu1 %v4432_v22 }
 0x196   :  { %2781 = vmatpush.bf16.msra.mxu2 %v4441_v59 }
 0x197   :  { %2794 = vmatpush.bf16.msra.mxu3 %v4449_v6 }
 0x198   :  { %2757 = vmatpush.bf16.msra.mxu0 %v4423_v3  ;;  %2770 = vmatpush.bf16.msra.mxu1 %v4431_v26 }
 0x19a   :  { %2782 = vmatpush.bf16.msra.mxu2 %v4440_v41 }
 0x19b   :  { %2795 = vmatpush.bf16.msra.mxu3 %v4448_v10 }
 0x19c   :  { %2758 = vmatpush.bf16.msra.mxu0 %v4422_v47  ;;  %2771 = vmatpush.bf16.msra.mxu1 %v4430_v32  ;;  %v2020_v44 = vpop.f32.mrf.mxu0 }
 0x19d   :  { %v2021_v48 = vadd.f32 %v2020_v44, %v460_v58 }
 0x19e   :  { %v2033_v31 = vpop.f32.mrf.mxu1  ;;  %2783 = vmatpush.bf16.msra.mxu2 %v4439_v54 }
 0x19f   :  { %2759 = vmatmul.bf16.vlgmr.msra.gmra.mxu0 %v2179_v38  ;;  %v2034_v55 = vadd.f32 %v2033_v31, %v2021_v48  ;;  %2796 = vmatpush.bf16.msra.mxu3 %v4447_v13 }
 0x1a2   :  { %2784 = vmatpush.bf16.msra.mxu2 %v4438_v63 }
 0x1a3   :  { %2797 = vmatpush.bf16.msra.mxu3 %v4446_v18 }
 0x1a4   :  { %v2022_v49 = vpop.f32.mrf.mxu0 }
 0x1a6   :  { %v2035_v53 = vpop.f32.mrf.mxu1 }
 0x1a8   :  { %v2046_v56 = vpop.f32.mrf.mxu2 }
 0x1a9   :  { %v2047_v57 = vadd.f32 %v2046_v56, %v2034_v55  ;;  %v2059_v36 = vpop.f32.mrf.mxu3 }
 0x1ab   :  { %v2060_v60 = vadd.f32 %v2059_v36, %v2047_v57 }
 0x1ad   :  { %v2172_v46 = vmax.f32 %v2060_v60, 0.0 }
 0x1af   :  { %v2180_v0 = vpack.c.bf16 %v2172_v46, %v2172_v46 }
 0x1b0   :  { %v2048_v50 = vpop.f32.mrf.mxu2 }
 0x1b1   :  { %v2061_v1 = vpop.f32.mrf.mxu3  ;;  %2772 = vmatmul.bf16.vlgmr.msra.gmra.mxu1 %v2180_v0 }
 0x1bc   :  { %v2072_v5 = vpop.f32.mrf.mxu0 }
 0x1bd   :  { %v2073_v11 = vadd.f32 %v2072_v5, %v461_v8 }
 0x1be   :  { %v2085_v7 = vpop.f32.mrf.mxu1 }
 0x1bf   :  { %v2086_v14 = vadd.f32 %v2085_v7, %v2073_v11 }
 0x1c4   :  { %v2074_v51 = vpop.f32.mrf.mxu0 }
 0x1c6   :  { %v2087_v12 = vpop.f32.mrf.mxu1 }
 0x1c8   :  { %v2098_v15 = vpop.f32.mrf.mxu2 }
 0x1c9   :  { %v2099_v16 = vadd.f32 %v2098_v15, %v2086_v14  ;;  %v2111_v17 = vpop.f32.mrf.mxu3 }
 0x1cb   :  { %v2112_v40 = vadd.f32 %v2111_v17, %v2099_v16 }
 0x1cd   :  { %v2173_v45 = vmax.f32 %v2112_v40, 0.0 }
 0x1cf   :  { %v2181_v19 = vpack.c.bf16 %v2173_v45, %v2173_v45 }
 0x1d0   :  { %v2100_v20 = vpop.f32.mrf.mxu2 }
 0x1d1   :  { %v2113_v21 = vpop.f32.mrf.mxu3  ;;  %2785 = vmatmul.bf16.vlgmr.msra.gmra.mxu2 %v2181_v19 }
 0x1dc   :  { %v2124_v22 = vpop.f32.mrf.mxu0 }
 0x1dd   :  { %v2125_v25 = vadd.f32 %v2124_v22, %v462_v24 }
 0x1de   :  { %v2137_v23 = vpop.f32.mrf.mxu1 }
 0x1df   :  { %v2138_v9 = vadd.f32 %v2137_v23, %v2125_v25 }
 0x1e4   :  { %v2126_v3 = vpop.f32.mrf.mxu0 }
 0x1e6   :  { %v2139_v26 = vpop.f32.mrf.mxu1 }
 0x1e8   :  { %v2150_v28 = vpop.f32.mrf.mxu2 }
 0x1e9   :  { %v2151_v29 = vadd.f32 %v2150_v28, %v2138_v9  ;;  %v2163_v30 = vpop.f32.mrf.mxu3 }
 0x1eb   :  { %v2164_v47 = vadd.f32 %v2163_v30, %v2151_v29 }
 0x1ed   :  { %v2174_v32 = vmax.f32 %v2164_v47, 0.0 }
 0x1ef   :  { %v2182_v33 = vpack.c.bf16 %v2174_v32, %v2174_v32 }
 0x1f0   :  { %v2152_v34 = vpop.f32.mrf.mxu2 }
 0x1f1   :  { %v2165_v35 = vpop.f32.mrf.mxu3  ;;  %2798 = vmatmul.bf16.vlgmr.msra.gmra.mxu3 %v2182_v33 }
 0x1fc   :  { %v2708_v38 = vpop.f32.mrf.mxu0 }
 0x1fd   :  { %v2709_v39 = vadd.f32 %v4463_v37, %v2708_v38 }
 0x1fe   :  { %v2721_v27 = vpop.f32.mrf.mxu1 }
 0x1ff   :  { %v2722_v42 = vadd.f32 %v2721_v27, %v2709_v39 }
 0x204   :  { %v2710_v52 = vpop.f32.mrf.mxu0 }
 0x206   :  { %v2723_v43 = vpop.f32.mrf.mxu1 }
 0x208   :  { %v2734_v44 = vpop.f32.mrf.mxu2 }
 0x209   :  { %v2735_v59 = vadd.f32 %v2734_v44, %v2722_v42  ;;  %v2747_v31 = vpop.f32.mrf.mxu3 }
 0x20b   :  { %v2748_v58 = vadd.f32 %v2747_v31, %v2735_v59 }
 0x210   :  { %v2736_v41 = vpop.f32.mrf.mxu2 }
 0x211   :  { %v2749_v48 = vpop.f32.mrf.mxu3 }
 0x21c   :  { %v2760_v49 = vpop.f32.mrf.mxu0 }
 0x21d   :  { %v2761_v53 = vadd.f32 %v2760_v49, %v2748_v58 }
 0x224   :  { %v2762_v54 = vpop.f32.mrf.mxu0 }
 0x22e   :  { %v2773_v55 = vpop.f32.mrf.mxu1 }
 0x22f   :  { %v2774_v63 = vadd.f32 %v2773_v55, %v2761_v53 }
 0x236   :  { %v2775_v56 = vpop.f32.mrf.mxu1 }
 0x254   :  { %v2786_v57 = vpop.f32.mrf.mxu2 }
 0x255   :  { %v2787_v60 = vadd.f32 %v2786_v57, %v2774_v63 }
 0x25c   :  { %v2788_v36 = vpop.f32.mrf.mxu2 }
 0x274   :  { %v2799_v61 = vpop.f32.mrf.mxu3 }
 0x275   :  { %v2800_v46 = vadd.f32 %v2799_v61, %v2787_v60 }
 0x277   :  { %2803 = vst [vmem:[%s4707_s7] sm:$0xff] %v2800_v46 }
 0x27c   :  { %v2801_v62 = vpop.f32.mrf.mxu3 }
 0x27d   :  { %2808 = vsyncpa [#allocation3], 1 }
 0x27e   :  { %2809 = vsyncpa [#allocation5], 1 }

// kernel: _forward.1
= control target key start
LH: loop header
LB: loop body
LE: loop exit
PB: predicated region body
PF: predicated region fallthrough
CT: control target
= control target key end

     0   :  { %12 = vsyncpa [#allocation3], 0  ;;  %s4700_s0 = inlined_call_operand.vmem [shape: bf16[8,32], index: 0, kind: input, shape index: {}]   ;;  %s4701_s1 = inlined_call_operand.hbm [shape: bf16[32,512], index: 1, kind: input, shape index: {}]   ;;  %s4702_s2 = inlined_call_operand.vmem [shape: f32[1,512], index: 2, kind: input, shape index: {}]   ;;  %s4703_s3 = inlined_call_operand.hbm [shape: bf16[512,1024], index: 3, kind: input, shape index: {}]   ;;  %s4704_s4 = inlined_call_operand.vmem [shape: f32[1,1024], index: 4, kind: input, shape index: {}]   ;;  %s4705_s5 = inlined_call_operand.hbm [shape: bf16[1024,128], index: 5, kind: input, shape index: {}]   ;;  %s4706_s6 = inlined_call_operand.vmem [shape: f32[1,128], index: 6, kind: input, shape index: {}]   ;;  %s4707_s7 = inlined_call_operand.vmem [shape: f32[8,128], index: 7, kind: output, shape index: {}]  }
   0x1   :  { %13 = vsyncpa [#allocation5], 0  ;;  %s35_s26 = sshll.u32 %s4703_s3, 4  ;;  %s4540_s27 = smov [#allocation4]   ;;  %s36_s26 = int_to_ptr.hbm [resolvable:$true] %s35_s26 }
   0x2   :  { %s37_s28 = sshll.u32 %s4540_s27, 4  ;;  %s20_s8 = sshll.u32 %s4701_s1, 4  ;;  %s38_s28 = int_to_ptr.vmem [resolvable:$true] %s37_s28  ;;  %s21_s8 = int_to_ptr.hbm [resolvable:$true] %s20_s8 }
   0x3   :  { %s4541_s9 = smov 512   ;;  %s4542_s10 = smov 32  }
   0x4   :  { %43 = dma.hbm_to_vmem [thread:$0]  %s36_s26, 32768, %s38_s28, [#allocation5], %s4541_s9, %s4541_s9, %s4542_s10  }
   0x5   :  { %s4543_s11 = smov [#allocation2]   ;;  %s4544_s13 = smov 256  }
   0x6   :  { %s22_s12 = sshll.u32 %s4543_s11, 4  ;;  %s4545_s14 = smov 16   ;;  %s23_s12 = int_to_ptr.vmem [resolvable:$true] %s22_s12 }
   0x7   :  { %28 = dma.hbm_to_vmem [thread:$0]  %s21_s8, 1024, %s23_s12, [#allocation3], %s4544_s13, %s4544_s13, %s4545_s14  }
   0x8   :  { %s50_s16 = sshll.u32 %s4705_s5, 4  ;;  %s4546_s17 = smov [#allocation6]   ;;  %s51_s16 = int_to_ptr.hbm [resolvable:$true] %s50_s16 }
   0x9   :  { %s52_s18 = sshll.u32 %s4546_s17, 4  ;;  %s4547_s19 = smov 64   ;;  %s53_s18 = int_to_ptr.vmem [resolvable:$true] %s52_s18 }
   0xa   :  { %s4548_s1 = smov 4  }
   0xb   :  { %58 = dma.hbm_to_vmem [thread:$0]  %s51_s16, 8192, %s53_s18, [#allocation5], %s4547_s19, %s4547_s19, %s4548_s1  }
   0xc   :  { %4536 = dma.done.wait [#allocation3], 1024  }
   0xd   :  { %4537 = vsyncadd [#allocation3], 4294966272 }
   0xe   :  { %4538 = dma.done.wait [#allocation5], 40960  }
   0xf   :  { %4539 = vsyncadd [#allocation5], 4294926336  ;;  %vm133_vm0 = vcmask 261120   ;;  %v2828_v0 = vld [vmem:[#allocation2 + $0x20] sm:$0xf] }
  0x10   :  { %v4132_v1 = vld [vmem:[#allocation2 + $0x2c] sm:$0xf0]  ;;  %v4130_v2 = vld [vmem:[#allocation2 + $0x24] sm:$0xf]  ;;  %v2830_v4 = vld [vmem:[#allocation2 + $0x30] sm:$0xf0] }
  0x11   :  { %v2829_v3 = vor.u32 %v4132_v1, %v2828_v0  ;;  %v2836_v5 = vld [vmem:[#allocation2 + $0x28] sm:$0xf]  ;;  %v4133_v6 = vld [vmem:[#allocation2 + $0x34] sm:$0xf0]  ;;  %v2833_v7 = vor.u32 %v4130_v2, %v2830_v4  ;;  %v4131_v9 = vld [vmem:[#allocation2 + $0x2c] sm:$0xf] }
  0x12   :  { %v2837_v8 = vor.u32 %v4133_v6, %v2836_v5  ;;  %v2838_v10 = vld [vmem:[#allocation2 + $0x38] sm:$0xf0]  ;;  %v2812_v11 = vld [vmem:[#allocation2] sm:$0xf]  ;;  %v4128_v13 = vld [vmem:[#allocation2 + $0xc] sm:$0xf0] }
  0x13   :  { %143 = vmatpush.bf16.msra.mxu0 %v2829_v3  ;;  %v2841_v12 = vor.u32 %v4131_v9, %v2838_v10  ;;  %v4126_v14 = vld [vmem:[#allocation2 + $0x4] sm:$0xf]  ;;  %v2814_v15 = vld [vmem:[#allocation2 + $0x10] sm:$0xf0]  ;;  %156 = vmatpush.bf16.msra.mxu1 %v2833_v7  ;;  %v2813_v16 = vor.u32 %v4128_v13, %v2812_v11  ;;  %v2820_v18 = vld [vmem:[#allocation2 + $0x8] sm:$0xf] }
  0x14   :  { %169 = vmatpush.bf16.msra.mxu2 %v2837_v8  ;;  %v2817_v17 = vor.u32 %v4126_v14, %v2814_v15  ;;  %v4129_v19 = vld [vmem:[#allocation2 + $0x14] sm:$0xf0]  ;;  %v4127_v20 = vld [vmem:[#allocation2 + $0xc] sm:$0xf]  ;;  %v2822_v22 = vld [vmem:[#allocation2 + $0x18] sm:$0xf0] }
  0x15   :  { %182 = vmatpush.bf16.msra.mxu3 %v2841_v12  ;;  %v2821_v21 = vor.u32 %v4129_v19, %v2820_v18  ;;  %v74_v23 = vld [vmem:[%s4700_s0] sm:$0xf]  ;;  %v2825_v25 = vor.u32 %v4127_v20, %v2822_v22 }
  0x16   :  { %v3072_v24 = vld [vmem:[#allocation4 + $0x1c0] sm:$0xf] }
  0x17   :  { %v4194_v26 = vld [vmem:[#allocation4 + $0x1dc] sm:$0xf0]  ;;  %144 = vmatpush.bf16.msra.mxu0 %v2813_v16  ;;  %157 = vmatpush.bf16.msra.mxu1 %v2817_v17 }
  0x18   :  { %v3328_v27 = vld [vmem:[#allocation4 + $0x3c0] sm:$0xf]  ;;  %v3073_v29 = vor.u32 %v4194_v26, %v3072_v24  ;;  %170 = vmatpush.bf16.msra.mxu2 %v2821_v21 }
  0x19   :  { %v4258_v28 = vld [vmem:[#allocation4 + $0x3dc] sm:$0xf0]  ;;  %183 = vmatpush.bf16.msra.mxu3 %v2825_v25 }
  0x1a   :  { %v3329_v30 = vor.u32 %v4258_v28, %v3328_v27  ;;  %v3040_v31 = vld [vmem:[#allocation4 + $0x180] sm:$0xf]  ;;  %2842 = vmatmul.msk.bf16.vlgmr.msra.gmra.mxu0 %vm133_vm0, %v74_v23  ;;  %2843 = vmatmul.msk.bf16.vlgmr.msra.gmra.mxu1 %vm133_vm0, %v74_v23 }
  0x1b   :  { %v4186_v32 = vld [vmem:[#allocation4 + $0x19c] sm:$0xf0]  ;;  %1751 = vmatpush.bf16.msrb.mxu0 %v3073_v29  ;;  %2844 = vmatmul.msk.bf16.vlgmr.msra.gmra.mxu2 %vm133_vm0, %v74_v23 }
  0x1c   :  { %v3296_v33 = vld [vmem:[#allocation4 + $0x380] sm:$0xf]  ;;  %v3041_v37 = vor.u32 %v4186_v32, %v3040_v31  ;;  %1764 = vmatpush.bf16.msrb.mxu1 %v3329_v30  ;;  %2845 = vmatmul.msk.bf16.vlgmr.msra.gmra.mxu3 %vm133_vm0, %v74_v23 }
  0x1d   :  { %v4250_v34 = vld [vmem:[#allocation4 + $0x39c] sm:$0xf0] }
  0x1e   :  { %v3584_v35 = vld [vmem:[#allocation4 + $0x5c0] sm:$0xf]  ;;  %v3297_v42 = vor.u32 %v4250_v34, %v3296_v33 }
  0x1f   :  { %v4322_v36 = vld [vmem:[#allocation4 + $0x5dc] sm:$0xf0]  ;;  %1752 = vmatpush.bf16.msrb.mxu0 %v3041_v37 }
  0x20   :  { %v3585_v38 = vor.u32 %v4322_v36, %v3584_v35  ;;  %v3840_v39 = vld [vmem:[#allocation4 + $0x7c0] sm:$0xf]  ;;  %1765 = vmatpush.bf16.msrb.mxu1 %v3297_v42 }
  0x21   :  { %v4386_v40 = vld [vmem:[#allocation4 + $0x7dc] sm:$0xf0] }
  0x22   :  { %v3008_v41 = vld [vmem:[#allocation4 + $0x140] sm:$0xf]  ;;  %v3841_v43 = vor.u32 %v4386_v40, %v3840_v39  ;;  %1777 = vmatpush.bf16.msrb.mxu2 %v3585_v38 }
  0x23   :  { %v4178_v44 = vld [vmem:[#allocation4 + $0x15c] sm:$0xf0] }
  0x24   :  { %v3264_v45 = vld [vmem:[#allocation4 + $0x340] sm:$0xf]  ;;  %1790 = vmatpush.bf16.msrb.mxu3 %v3841_v43  ;;  %v3009_v52 = vor.u32 %v4178_v44, %v3008_v41 }
  0x25   :  { %v4242_v46 = vld [vmem:[#allocation4 + $0x35c] sm:$0xf0] }
  0x26   :  { %v3552_v47 = vld [vmem:[#allocation4 + $0x580] sm:$0xf]  ;;  %v3265_v57 = vor.u32 %v4242_v46, %v3264_v45  ;;  %1753 = vmatpush.bf16.msrb.mxu0 %v3009_v52 }
  0x27   :  { %v4314_v48 = vld [vmem:[#allocation4 + $0x59c] sm:$0xf0] }
  0x28   :  { %v3808_v49 = vld [vmem:[#allocation4 + $0x780] sm:$0xf]  ;;  %v3553_v50 = vor.u32 %v4314_v48, %v3552_v47  ;;  %1766 = vmatpush.bf16.msrb.mxu1 %v3265_v57  ;;  %v4190_v47 = vld [vmem:[#allocation4 + $0x1c4] sm:$0xf] }
  0x29   :  { %v4378_v51 = vld [vmem:[#allocation4 + $0x79c] sm:$0xf0]  ;;  %v3074_v48 = vld [vmem:[#allocation4 + $0x1e0] sm:$0xf0] }
  0x2a   :  { %v3809_v53 = vor.u32 %v4378_v51, %v3808_v49  ;;  %v2976_v54 = vld [vmem:[#allocation4 + $0x100] sm:$0xf]  ;;  %1778 = vmatpush.bf16.msrb.mxu2 %v3553_v50  ;;  %v4254_v49 = vld [vmem:[#allocation4 + $0x3c4] sm:$0xf] }
  0x2b   :  { %v4170_v55 = vld [vmem:[#allocation4 + $0x11c] sm:$0xf0]  ;;  %v3330_v50 = vld [vmem:[#allocation4 + $0x3e0] sm:$0xf0] }
  0x2c   :  { %v3520_v56 = vld [vmem:[#allocation4 + $0x540] sm:$0xf]  ;;  %1791 = vmatpush.bf16.msrb.mxu3 %v3809_v53  ;;  %v2977_v0 = vor.u32 %v4170_v55, %v2976_v54  ;;  %v4182_v54 = vld [vmem:[#allocation4 + $0x184] sm:$0xf] }
  0x2d   :  { %v4306_v58 = vld [vmem:[#allocation4 + $0x55c] sm:$0xf0] }
  0x2e   :  { %v3776_v59 = vld [vmem:[#allocation4 + $0x740] sm:$0xf]  ;;  %v3521_v63 = vor.u32 %v4306_v58, %v3520_v56  ;;  %1754 = vmatpush.bf16.msrb.mxu0 %v2977_v0  ;;  %v3042_v0 = vld [vmem:[#allocation4 + $0x1a0] sm:$0xf0] }
  0x2f   :  { %v4370_v60 = vld [vmem:[#allocation4 + $0x75c] sm:$0xf0] }
  0x30   :  { %v3232_v61 = vld [vmem:[#allocation4 + $0x300] sm:$0xf]  ;;  %v3777_v1 = vor.u32 %v4370_v60, %v3776_v59  ;;  %1779 = vmatpush.bf16.msrb.mxu2 %v3521_v63  ;;  %v3077_v59 = vor.u32 %v4190_v47, %v3074_v48  ;;  %v3333_v63 = vor.u32 %v4254_v49, %v3330_v50  ;;  %v4150_v47 = vld [vmem:[#allocation4 + $0x84] sm:$0xf] }
  0x31   :  { %v4234_v62 = vld [vmem:[#allocation4 + $0x31c] sm:$0xf0]  ;;  %v2914_v48 = vld [vmem:[#allocation4 + $0xa0] sm:$0xf0] }
  0x32   :  { %v2944_v2 = vld [vmem:[#allocation4 + $0xc0] sm:$0xf]  ;;  %v3233_v5 = vor.u32 %v4234_v62, %v3232_v61  ;;  %1792 = vmatpush.bf16.msrb.mxu3 %v3777_v1  ;;  %v4318_v61 = vld [vmem:[#allocation4 + $0x5c4] sm:$0xf] }
  0x33   :  { %v3488_v3 = vld [vmem:[#allocation4 + $0x500] sm:$0xf]  ;;  %v3586_v62 = vld [vmem:[#allocation4 + $0x5e0] sm:$0xf0] }
  0x34   :  { %v4298_v4 = vld [vmem:[#allocation4 + $0x51c] sm:$0xf0]  ;;  %1767 = vmatpush.bf16.msrb.mxu1 %v3233_v5  ;;  %v4382_v1 = vld [vmem:[#allocation4 + $0x7c4] sm:$0xf] }
  0x35   :  { %v4162_v6 = vld [vmem:[#allocation4 + $0xdc] sm:$0xf0]  ;;  %v3489_v11 = vor.u32 %v4298_v4, %v3488_v3  ;;  %v4246_v3 = vld [vmem:[#allocation4 + $0x384] sm:$0xf] }
  0x36   :  { %v3744_v7 = vld [vmem:[#allocation4 + $0x700] sm:$0xf]  ;;  %v2945_v12 = vor.u32 %v4162_v6, %v2944_v2  ;;  %v3842_v2 = vld [vmem:[#allocation4 + $0x7e0] sm:$0xf0] }
  0x37   :  { %v4362_v8 = vld [vmem:[#allocation4 + $0x71c] sm:$0xf0]  ;;  %1780 = vmatpush.bf16.msrb.mxu2 %v3489_v11  ;;  %v3298_v4 = vld [vmem:[#allocation4 + $0x3a0] sm:$0xf0] }
  0x38   :  { %v3200_v9 = vld [vmem:[#allocation4 + $0x2c0] sm:$0xf]  ;;  %v3745_v13 = vor.u32 %v4362_v8, %v3744_v7  ;;  %1755 = vmatpush.bf16.msrb.mxu0 %v2945_v12  ;;  %v3589_v7 = vor.u32 %v4318_v61, %v3586_v62  ;;  %v3045_v8 = vor.u32 %v4182_v54, %v3042_v0  ;;  %v4310_v11 = vld [vmem:[#allocation4 + $0x584] sm:$0xf] }
  0x39   :  { %v4226_v10 = vld [vmem:[#allocation4 + $0x2dc] sm:$0xf0]  ;;  %v3554_v12 = vld [vmem:[#allocation4 + $0x5a0] sm:$0xf0] }
  0x3a   :  { %v2912_v14 = vld [vmem:[#allocation4 + $0x80] sm:$0xf]  ;;  %v3201_v17 = vor.u32 %v4226_v10, %v3200_v9  ;;  %1793 = vmatpush.bf16.msrb.mxu3 %v3745_v13  ;;  %v3845_v9 = vor.u32 %v4382_v1, %v3842_v2  ;;  %v4174_v10 = vld [vmem:[#allocation4 + $0x144] sm:$0xf]  ;;  %v3301_v13 = vor.u32 %v4246_v3, %v3298_v4 }
  0x3b   :  { %v3456_v15 = vld [vmem:[#allocation4 + $0x4c0] sm:$0xf]  ;;  %v4214_v49 = vld [vmem:[#allocation4 + $0x284] sm:$0xf] }
  0x3c   :  { %v4290_v16 = vld [vmem:[#allocation4 + $0x4dc] sm:$0xf0]  ;;  %1768 = vmatpush.bf16.msrb.mxu1 %v3201_v17  ;;  %v4238_v17 = vld [vmem:[#allocation4 + $0x344] sm:$0xf] }
  0x3d   :  { %v4154_v18 = vld [vmem:[#allocation4 + $0x9c] sm:$0xf0]  ;;  %v3457_v23 = vor.u32 %v4290_v16, %v3456_v15  ;;  %v4374_v15 = vld [vmem:[#allocation4 + $0x784] sm:$0xf] }
  0x3e   :  { %v3712_v19 = vld [vmem:[#allocation4 + $0x6c0] sm:$0xf]  ;;  %v2913_v24 = vor.u32 %v4154_v18, %v2912_v14  ;;  %v3010_v14 = vld [vmem:[#allocation4 + $0x160] sm:$0xf0] }
  0x3f   :  { %v4354_v20 = vld [vmem:[#allocation4 + $0x6dc] sm:$0xf0]  ;;  %1781 = vmatpush.bf16.msrb.mxu2 %v3457_v23  ;;  %v3810_v16 = vld [vmem:[#allocation4 + $0x7a0] sm:$0xf0] }
  0x40   :  { %v3168_v21 = vld [vmem:[#allocation4 + $0x280] sm:$0xf]  ;;  %v3713_v25 = vor.u32 %v4354_v20, %v3712_v19  ;;  %1756 = vmatpush.bf16.msrb.mxu0 %v2913_v24  ;;  %v3266_v18 = vld [vmem:[#allocation4 + $0x360] sm:$0xf0]  ;;  %v3557_v19 = vor.u32 %v4310_v11, %v3554_v12  ;;  %v3013_v20 = vor.u32 %v4174_v10, %v3010_v14 }
  0x41   :  { %v4218_v22 = vld [vmem:[#allocation4 + $0x29c] sm:$0xf0]  ;;  %v4302_v23 = vld [vmem:[#allocation4 + $0x544] sm:$0xf] }
  0x42   :  { %v2880_v26 = vld [vmem:[#allocation4 + $0x40] sm:$0xf]  ;;  %v3169_v29 = vor.u32 %v4218_v22, %v3168_v21  ;;  %1794 = vmatpush.bf16.msrb.mxu3 %v3713_v25  ;;  %v3813_v21 = vor.u32 %v4374_v15, %v3810_v16  ;;  %v4166_v22 = vld [vmem:[#allocation4 + $0x104] sm:$0xf]  ;;  %v3269_v25 = vor.u32 %v4238_v17, %v3266_v18 }
  0x43   :  { %v3424_v27 = vld [vmem:[#allocation4 + $0x480] sm:$0xf]  ;;  %v3522_v24 = vld [vmem:[#allocation4 + $0x560] sm:$0xf0] }
  0x44   :  { %v4282_v28 = vld [vmem:[#allocation4 + $0x49c] sm:$0xf0]  ;;  %1769 = vmatpush.bf16.msrb.mxu1 %v3169_v29  ;;  %v4230_v29 = vld [vmem:[#allocation4 + $0x304] sm:$0xf] }
  0x45   :  { %v4146_v30 = vld [vmem:[#allocation4 + $0x5c] sm:$0xf0]  ;;  %v3425_v35 = vor.u32 %v4282_v28, %v3424_v27  ;;  %v4366_v27 = vld [vmem:[#allocation4 + $0x744] sm:$0xf] }
  0x46   :  { %v3680_v31 = vld [vmem:[#allocation4 + $0x680] sm:$0xf]  ;;  %v2881_v37 = vor.u32 %v4146_v30, %v2880_v26  ;;  %v2978_v26 = vld [vmem:[#allocation4 + $0x120] sm:$0xf0] }
  0x47   :  { %v4346_v32 = vld [vmem:[#allocation4 + $0x69c] sm:$0xf0]  ;;  %1782 = vmatpush.bf16.msrb.mxu2 %v3425_v35  ;;  %v3778_v28 = vld [vmem:[#allocation4 + $0x760] sm:$0xf0] }
  0x48   :  { %v3136_v33 = vld [vmem:[#allocation4 + $0x240] sm:$0xf]  ;;  %v3681_v38 = vor.u32 %v4346_v32, %v3680_v31  ;;  %1757 = vmatpush.bf16.msrb.mxu0 %v2881_v37  ;;  %v3234_v30 = vld [vmem:[#allocation4 + $0x320] sm:$0xf0]  ;;  %v3525_v31 = vor.u32 %v4302_v23, %v3522_v24  ;;  %v2981_v32 = vor.u32 %v4166_v22, %v2978_v26 }
  0x49   :  { %v4210_v34 = vld [vmem:[#allocation4 + $0x25c] sm:$0xf0]  ;;  %v4294_v35 = vld [vmem:[#allocation4 + $0x504] sm:$0xf]  ;;  %v3237_v37 = vor.u32 %v4230_v29, %v3234_v30 }
  0x4a   :  { %v2848_v36 = vld [vmem:[#allocation4] sm:$0xf]  ;;  %v3137_v42 = vor.u32 %v4210_v34, %v3136_v33  ;;  %1795 = vmatpush.bf16.msrb.mxu3 %v3681_v38  ;;  %v3781_v33 = vor.u32 %v4366_v27, %v3778_v28  ;;  %v4158_v34 = vld [vmem:[#allocation4 + $0xc4] sm:$0xf] }
  0x4b   :  { %v4138_v39 = vld [vmem:[#allocation4 + $0x1c] sm:$0xf0]  ;;  %v2946_v38 = vld [vmem:[#allocation4 + $0xe0] sm:$0xf0] }
  0x4c   :  { %v3392_v40 = vld [vmem:[#allocation4 + $0x440] sm:$0xf]  ;;  %v2849_v52 = vor.u32 %v4138_v39, %v2848_v36  ;;  %1770 = vmatpush.bf16.msrb.mxu1 %v3137_v42  ;;  %v3490_v36 = vld [vmem:[#allocation4 + $0x520] sm:$0xf0] }
  0x4d   :  { %v4274_v41 = vld [vmem:[#allocation4 + $0x45c] sm:$0xf0]  ;;  %v4358_v39 = vld [vmem:[#allocation4 + $0x704] sm:$0xf] }
  0x4e   :  { %v3104_v43 = vld [vmem:[#allocation4 + $0x200] sm:$0xf]  ;;  %v3393_v51 = vor.u32 %v4274_v41, %v3392_v40  ;;  %1758 = vmatpush.bf16.msrb.mxu0 %v2849_v52  ;;  %v3746_v40 = vld [vmem:[#allocation4 + $0x720] sm:$0xf0] }
  0x4f   :  { %v3648_v44 = vld [vmem:[#allocation4 + $0x640] sm:$0xf]  ;;  %v4222_v41 = vld [vmem:[#allocation4 + $0x2c4] sm:$0xf] }
  0x50   :  { %v4338_v45 = vld [vmem:[#allocation4 + $0x65c] sm:$0xf0]  ;;  %1783 = vmatpush.bf16.msrb.mxu2 %v3393_v51  ;;  %v3202_v42 = vld [vmem:[#allocation4 + $0x2e0] sm:$0xf0]  ;;  %v2917_v51 = vor.u32 %v4150_v47, %v2914_v48  ;;  %v4251_v47 = vld [vmem:[#allocation4 + $0x3a4] sm:$0xf0] }
  0x51   :  { %v4202_v46 = vld [vmem:[#allocation4 + $0x21c] sm:$0xf0]  ;;  %v3649_v53 = vor.u32 %v4338_v45, %v3648_v44  ;;  %v2949_v44 = vor.u32 %v4158_v34, %v2946_v38  ;;  %v3749_v45 = vor.u32 %v4358_v39, %v3746_v40  ;;  %v3170_v50 = vld [vmem:[#allocation4 + $0x2a0] sm:$0xf0]  ;;  %v3336_v34 = vld [vmem:[#allocation4 + $0x3c8] sm:$0xf] }
  0x52   :  { %v3360_v55 = vld [vmem:[#allocation4 + $0x400] sm:$0xf]  ;;  %v3105_v58 = vor.u32 %v4202_v46, %v3104_v43  ;;  %1803 = vmatpush.bf16.msra.mxu0 %v3077_v59  ;;  %v3493_v43 = vor.u32 %v4294_v35, %v3490_v36  ;;  %v3205_v46 = vor.u32 %v4222_v41, %v3202_v42  ;;  %v3173_v52 = vor.u32 %v4214_v49, %v3170_v50  ;;  %v3458_v54 = vld [vmem:[#allocation4 + $0x4e0] sm:$0xf0]  ;;  %v4259_v35 = vld [vmem:[#allocation4 + $0x3e4] sm:$0xf0] }
  0x53   :  { %v4266_v56 = vld [vmem:[#allocation4 + $0x41c] sm:$0xf0]  ;;  %1796 = vmatpush.bf16.msrb.mxu3 %v3649_v53  ;;  %v4286_v53 = vld [vmem:[#allocation4 + $0x4c4] sm:$0xf]  ;;  %v3337_v42 = vor.u32 %v4259_v35, %v3336_v34 }
  0x54   :  { %v3616_v57 = vld [vmem:[#allocation4 + $0x600] sm:$0xf]  ;;  %v3361_v5 = vor.u32 %v4266_v56, %v3360_v55  ;;  %1771 = vmatpush.bf16.msrb.mxu1 %v3105_v58  ;;  %v4350_v55 = vld [vmem:[#allocation4 + $0x6c4] sm:$0xf]  ;;  %v3461_v56 = vor.u32 %v4286_v53, %v3458_v54  ;;  %v3592_v53 = vld [vmem:[#allocation4 + $0x5c8] sm:$0xf] }
  0x55   :  { %v4330_v60 = vld [vmem:[#allocation4 + $0x61c] sm:$0xf0]  ;;  %v4142_v59 = vld [vmem:[#allocation4 + $0x44] sm:$0xf]  ;;  %v4323_v54 = vld [vmem:[#allocation4 + $0x5e4] sm:$0xf0] }
  0x56   :  { %v3617_v6 = vor.u32 %v4330_v60, %v3616_v57  ;;  %1784 = vmatpush.bf16.msrb.mxu2 %v3361_v5  ;;  %1804 = vmatpush.bf16.msra.mxu0 %v3045_v8  ;;  %v3714_v57 = vld [vmem:[#allocation4 + $0x6e0] sm:$0xf0] }
  0x57   :  { %v3717_v58 = vor.u32 %v4350_v55, %v3714_v57  ;;  %v2882_v60 = vld [vmem:[#allocation4 + $0x60] sm:$0xf0]  ;;  %v3848_v55 = vld [vmem:[#allocation4 + $0x7c8] sm:$0xf] }
  0x58   :  { %1816 = vmatpush.bf16.msra.mxu1 %v3333_v63  ;;  %1797 = vmatpush.bf16.msrb.mxu3 %v3617_v6  ;;  %v2885_v61 = vor.u32 %v4142_v59, %v2882_v60  ;;  %v4206_v62 = vld [vmem:[#allocation4 + $0x244] sm:$0xf]  ;;  %v4387_v59 = vld [vmem:[#allocation4 + $0x7e4] sm:$0xf0] }
  0x59   :  { %v3138_v63 = vld [vmem:[#allocation4 + $0x260] sm:$0xf0]  ;;  %v3016_v60 = vld [vmem:[#allocation4 + $0x148] sm:$0xf] }
  0x5a   :  { %1829 = vmatpush.bf16.msra.mxu2 %v3589_v7  ;;  %1805 = vmatpush.bf16.msra.mxu0 %v3013_v20  ;;  %v3141_v0 = vor.u32 %v4206_v62, %v3138_v63  ;;  %v4278_v1 = vld [vmem:[#allocation4 + $0x484] sm:$0xf]  ;;  %v3272_v63 = vld [vmem:[#allocation4 + $0x348] sm:$0xf] }
  0x5b   :  { %v3426_v2 = vld [vmem:[#allocation4 + $0x4a0] sm:$0xf0] }
  0x5c   :  { %1842 = vmatpush.bf16.msra.mxu3 %v3845_v9  ;;  %1817 = vmatpush.bf16.msra.mxu1 %v3301_v13  ;;  %v4342_v3 = vld [vmem:[#allocation4 + $0x684] sm:$0xf]  ;;  %v3429_v4 = vor.u32 %v4278_v1, %v3426_v2  ;;  %v3593_v2 = vor.u32 %v4323_v54, %v3592_v53  ;;  %v4147_v53 = vld [vmem:[#allocation4 + $0x64] sm:$0xf0] }
  0x5d   :  { %v3682_v5 = vld [vmem:[#allocation4 + $0x6a0] sm:$0xf0]  ;;  %v3144_v54 = vld [vmem:[#allocation4 + $0x248] sm:$0xf] }
  0x5e   :  { %1830 = vmatpush.bf16.msra.mxu2 %v3557_v19  ;;  %1806 = vmatpush.bf16.msra.mxu0 %v2981_v32  ;;  %v3685_v6 = vor.u32 %v4342_v3, %v3682_v5  ;;  %v4134_v7 = vld [vmem:[#allocation4 + $0x4] sm:$0xf]  ;;  %v4195_v32 = vld [vmem:[#allocation4 + $0x1e4] sm:$0xf0] }
  0x5f   :  { %v2850_v8 = vld [vmem:[#allocation4 + $0x20] sm:$0xf0] }
  0x60   :  { %1843 = vmatpush.bf16.msra.mxu3 %v3813_v21  ;;  %1818 = vmatpush.bf16.msra.mxu1 %v3269_v25  ;;  %v4198_v9 = vld [vmem:[#allocation4 + $0x204] sm:$0xf]  ;;  %v2853_v10 = vor.u32 %v4134_v7, %v2850_v8  ;;  %v83_v25 = vld [vmem:[%s4702_s2] sm:$0xf]  ;;  %v4315_v7 = vld [vmem:[#allocation4 + $0x5a4] sm:$0xf0] }
  0x61   :  { %v3106_v11 = vld [vmem:[#allocation4 + $0x220] sm:$0xf0]  ;;  %v85_v26 = vperm.slane %v83_v25, 0  ;;  %v86_v27 = vperm.slane %v83_v25, 1  ;;  %v87_v38 = vperm.slane %v83_v25, 2  ;;  %v88_v41 = vperm.slane %v83_v25, 3 }
  0x62   :  { %1831 = vmatpush.bf16.msra.mxu2 %v3525_v31  ;;  %1807 = vmatpush.bf16.msra.mxu0 %v2949_v44  ;;  %v3109_v12 = vor.u32 %v4198_v9, %v3106_v11  ;;  %v4270_v13 = vld [vmem:[#allocation4 + $0x444] sm:$0xf]  ;;  %v3080_v31 = vld [vmem:[#allocation4 + $0x1c8] sm:$0xf] }
  0x63   :  { %v3394_v14 = vld [vmem:[#allocation4 + $0x460] sm:$0xf0]  ;;  %v3081_v39 = vor.u32 %v4195_v32, %v3080_v31  ;;  %v4187_v44 = vld [vmem:[#allocation4 + $0x1a4] sm:$0xf0] }
  0x64   :  { %1844 = vmatpush.bf16.msra.mxu3 %v3781_v33  ;;  %1819 = vmatpush.bf16.msra.mxu1 %v3237_v37  ;;  %v3397_v15 = vor.u32 %v4270_v13, %v3394_v14  ;;  %v4334_v16 = vld [vmem:[#allocation4 + $0x644] sm:$0xf]  ;;  %v3816_v8 = vld [vmem:[#allocation4 + $0x788] sm:$0xf] }
  0x65   :  { %v3650_v17 = vld [vmem:[#allocation4 + $0x660] sm:$0xf0]  ;;  %v4379_v11 = vld [vmem:[#allocation4 + $0x7a4] sm:$0xf0] }
  0x66   :  { %1832 = vmatpush.bf16.msra.mxu2 %v3493_v43  ;;  %1808 = vmatpush.bf16.msra.mxu0 %v2917_v51  ;;  %v3653_v18 = vor.u32 %v4334_v16, %v3650_v17  ;;  %v4262_v19 = vld [vmem:[#allocation4 + $0x404] sm:$0xf]  ;;  %v3048_v43 = vld [vmem:[#allocation4 + $0x188] sm:$0xf] }
  0x67   :  { %v3362_v20 = vld [vmem:[#allocation4 + $0x420] sm:$0xf0]  ;;  %v4171_v13 = vld [vmem:[#allocation4 + $0x124] sm:$0xf0] }
  0x68   :  { %1845 = vmatpush.bf16.msra.mxu3 %v3749_v45  ;;  %1820 = vmatpush.bf16.msra.mxu1 %v3205_v46  ;;  %v3365_v21 = vor.u32 %v4262_v19, %v3362_v20  ;;  %v4326_v22 = vld [vmem:[#allocation4 + $0x604] sm:$0xf]  ;;  %v3304_v46 = vld [vmem:[#allocation4 + $0x388] sm:$0xf]  ;;  %v3817_v19 = vor.u32 %v4379_v11, %v3816_v8  ;;  %v4255_v8 = vld [vmem:[#allocation4 + $0x3cc] sm:$0xf] }
  0x69   :  { %v3618_v23 = vld [vmem:[#allocation4 + $0x620] sm:$0xf0]  ;;  %v3240_v14 = vld [vmem:[#allocation4 + $0x308] sm:$0xf] }
  0x6a   :  { %1833 = vmatpush.bf16.msra.mxu2 %v3461_v56  ;;  %1809 = vmatpush.bf16.msra.mxu0 %v2885_v61  ;;  %v3621_v24 = vor.u32 %v4326_v22, %v3618_v23  ;;  %v4179_v61 = vld [vmem:[#allocation4 + $0x164] sm:$0xf0] }
  0x6b   :  { %v3017_v5 = vor.u32 %v4179_v61, %v3016_v60  ;;  %v4307_v22 = vld [vmem:[#allocation4 + $0x564] sm:$0xf0] }
  0x6c   :  { %1821 = vmatpush.bf16.msra.mxu1 %v3173_v52  ;;  %1846 = vmatpush.bf16.msra.mxu3 %v3717_v58  ;;  %v3049_v52 = vor.u32 %v4187_v44, %v3048_v43  ;;  %v3305_v58 = vor.u32 %v4251_v47, %v3304_v46  ;;  %v4371_v25 = vld [vmem:[#allocation4 + $0x764] sm:$0xf0] }
  0x6d   :  { %v3496_v32 = vld [vmem:[#allocation4 + $0x508] sm:$0xf] }
  0x6e   :  { %1834 = vmatpush.bf16.msra.mxu2 %v3429_v4  ;;  %1810 = vmatpush.bf16.msra.mxu0 %v2853_v10  ;;  %v3849_v4 = vor.u32 %v4387_v59, %v3848_v55  ;;  %v3464_v46 = vld [vmem:[#allocation4 + $0x4c8] sm:$0xf] }
  0x6f   :  { %v4291_v47 = vld [vmem:[#allocation4 + $0x4e4] sm:$0xf0] }
  0x70   :  { %1822 = vmatpush.bf16.msra.mxu1 %v3141_v0  ;;  %1847 = vmatpush.bf16.msra.mxu3 %v3685_v6  ;;  %v4243_v0 = vld [vmem:[#allocation4 + $0x364] sm:$0xf0] }
  0x71   :  { %v3560_v6 = vld [vmem:[#allocation4 + $0x588] sm:$0xf]  ;;  %v3273_v10 = vor.u32 %v4243_v0, %v3272_v63 }
  0x72   :  { %1835 = vmatpush.bf16.msra.mxu2 %v3397_v15  ;;  %v4235_v15 = vld [vmem:[#allocation4 + $0x324] sm:$0xf0]  ;;  %v3561_v17 = vor.u32 %v4315_v7, %v3560_v6  ;;  %v3082_v7 = vld [vmem:[#allocation4 + $0x1e8] sm:$0xf0] }
  0x73   :  { %v3241_v23 = vor.u32 %v4235_v15, %v3240_v14  ;;  %v4211_v55 = vld [vmem:[#allocation4 + $0x264] sm:$0xf0] }
  0x74   :  { %1823 = vmatpush.bf16.msra.mxu1 %v3109_v12  ;;  %1848 = vmatpush.bf16.msra.mxu3 %v3653_v18  ;;  %v2984_v12 = vld [vmem:[#allocation4 + $0x108] sm:$0xf] }
  0x75   :  { %v2985_v20 = vor.u32 %v4171_v13, %v2984_v12  ;;  %v4283_v59 = vld [vmem:[#allocation4 + $0x4a4] sm:$0xf0] }
  0x76   :  { %1836 = vmatpush.bf16.msra.mxu2 %v3365_v21  ;;  %v3528_v21 = vld [vmem:[#allocation4 + $0x548] sm:$0xf] }
  0x77   :  { %v3688_v60 = vld [vmem:[#allocation4 + $0x688] sm:$0xf] }
  0x78   :  { %1849 = vmatpush.bf16.msra.mxu3 %v3621_v24  ;;  %v3784_v24 = vld [vmem:[#allocation4 + $0x748] sm:$0xf] }
  0x79   :  { %v3785_v31 = vor.u32 %v4371_v25, %v3784_v24  ;;  %v4347_v63 = vld [vmem:[#allocation4 + $0x6a4] sm:$0xf0]  ;;  %v3306_v24 = vld [vmem:[#allocation4 + $0x3a8] sm:$0xf0] }
  0x7a   :  { %v2856_v0 = vld [vmem:[#allocation4 + $0x8] sm:$0xf]  ;;  %v3689_v11 = vor.u32 %v4347_v63, %v3688_v60  ;;  %v3786_v63 = vld [vmem:[#allocation4 + $0x768] sm:$0xf0] }
  0x7b   :  { %v3400_v12 = vld [vmem:[#allocation4 + $0x448] sm:$0xf] }
  0x7c   :  { %v4275_v13 = vld [vmem:[#allocation4 + $0x464] sm:$0xf0] }
  0x97   :  { %v146_v28 = vpop.f32.mrf.mxu0  ;;  %v159_v30 = vpop.f32.mrf.mxu1 }
  0x98   :  { %v147_v29 = vadd.f32 %v146_v28, %v85_v26  ;;  %v160_v33 = vadd.f32 %v159_v30, %v86_v27  ;;  %v2952_v26 = vld [vmem:[#allocation4 + $0xc8] sm:$0xf]  ;;  %v3529_v30 = vor.u32 %v4307_v22, %v3528_v21  ;;  %v3401_v21 = vor.u32 %v4275_v13, %v3400_v12  ;;  %v3050_v22 = vld [vmem:[#allocation4 + $0x1a8] sm:$0xf0] }
  0x99   :  { %v4163_v27 = vld [vmem:[#allocation4 + $0xe4] sm:$0xf0]  ;;  %v4359_v12 = vld [vmem:[#allocation4 + $0x70c] sm:$0xf] }
  0x9a   :  { %v189_v36 = vmax.f32 %v147_v29, 0.0  ;;  %v190_v37 = vmax.f32 %v160_v33, 0.0  ;;  %v3208_v28 = vld [vmem:[#allocation4 + $0x2c8] sm:$0xf]  ;;  %v2953_v34 = vor.u32 %v4163_v27, %v2952_v26  ;;  %v3754_v13 = vld [vmem:[#allocation4 + $0x728] sm:$0xf0] }
  0x9b   :  { %v4227_v29 = vld [vmem:[#allocation4 + $0x2e4] sm:$0xf0] }
  0x9c   :  { %v4608_v40 = vpack.c.bf16 %v189_v36, %v189_v36  ;;  %v4610_v45 = vpack.c.bf16 %v190_v37, %v190_v37  ;;  %v4299_v33 = vld [vmem:[#allocation4 + $0x524] sm:$0xf0]  ;;  %v3209_v35 = vor.u32 %v4227_v29, %v3208_v28 }
  0x9d   :  { %v3752_v36 = vld [vmem:[#allocation4 + $0x708] sm:$0xf]  ;;  %v3497_v43 = vor.u32 %v4299_v33, %v3496_v32 }
  0x9e   :  { %v172_v48 = vpop.f32.mrf.mxu2  ;;  %1759 = vmatmul.bf16.vlgmr.msrb.gmra.mxu0 %v4608_v40  ;;  %1772 = vmatmul.bf16.vlgmr.msrb.gmra.mxu1 %v4610_v45  ;;  %v4363_v37 = vld [vmem:[#allocation4 + $0x724] sm:$0xf0] }
  0x9f   :  { %v173_v49 = vadd.f32 %v172_v48, %v87_v38  ;;  %v185_v50 = vpop.f32.mrf.mxu3  ;;  %1855 = vmatpush.bf16.msrb.mxu0 %v3081_v39  ;;  %v148_v51 = vpop.f32.mrf.mxu0  ;;  %1868 = vmatpush.bf16.msrb.mxu1 %v3337_v42  ;;  %v2920_v38 = vld [vmem:[#allocation4 + $0x88] sm:$0xf]  ;;  %v3753_v44 = vor.u32 %v4363_v37, %v3752_v36  ;;  %v4175_v36 = vld [vmem:[#allocation4 + $0x14c] sm:$0xf] }
  0xa0   :  { %v186_v56 = vadd.f32 %v185_v50, %v88_v41  ;;  %v161_v57 = vpop.f32.mrf.mxu1  ;;  %v4155_v39 = vld [vmem:[#allocation4 + $0xa4] sm:$0xf0] }
  0xa1   :  { %v191_v62 = vmax.f32 %v173_v49, 0.0  ;;  %v3176_v41 = vld [vmem:[#allocation4 + $0x288] sm:$0xf]  ;;  %v2921_v48 = vor.u32 %v4155_v39, %v2920_v38  ;;  %v3018_v38 = vld [vmem:[#allocation4 + $0x168] sm:$0xf0] }
  0xa2   :  { %v192_v1 = vmax.f32 %v186_v56, 0.0  ;;  %v4219_v42 = vld [vmem:[#allocation4 + $0x2a4] sm:$0xf0]  ;;  %v3465_v56 = vor.u32 %v4291_v47, %v3464_v46  ;;  %v4239_v39 = vld [vmem:[#allocation4 + $0x34c] sm:$0xf] }
  0xa3   :  { %v4614_v3 = vpack.c.bf16 %v191_v62, %v191_v62  ;;  %1856 = vmatpush.bf16.msrb.mxu0 %v3049_v52  ;;  %1869 = vmatpush.bf16.msrb.mxu1 %v3305_v58  ;;  %v3177_v49 = vor.u32 %v4219_v42, %v3176_v41  ;;  %v3720_v50 = vld [vmem:[#allocation4 + $0x6c8] sm:$0xf]  ;;  %v3145_v62 = vor.u32 %v4211_v55, %v3144_v54  ;;  %v3274_v41 = vld [vmem:[#allocation4 + $0x368] sm:$0xf0] }
  0xa4   :  { %v4616_v9 = vpack.c.bf16 %v192_v1, %v192_v1  ;;  %v4355_v51 = vld [vmem:[#allocation4 + $0x6e4] sm:$0xf0]  ;;  %v4311_v46 = vld [vmem:[#allocation4 + $0x58c] sm:$0xf] }
  0xa5   :  { %1785 = vmatmul.bf16.vlgmr.msrb.gmra.mxu2 %v4614_v3  ;;  %v2888_v52 = vld [vmem:[#allocation4 + $0x48] sm:$0xf]  ;;  %v3721_v57 = vor.u32 %v4355_v51, %v3720_v50  ;;  %v3562_v47 = vld [vmem:[#allocation4 + $0x5a8] sm:$0xf0] }
  0xa6   :  { %1798 = vmatmul.bf16.vlgmr.msrb.gmra.mxu3 %v4616_v9  ;;  %1881 = vmatpush.bf16.msrb.mxu2 %v3593_v2  ;;  %v174_v16 = vpop.f32.mrf.mxu2  ;;  %v3432_v58 = vld [vmem:[#allocation4 + $0x488] sm:$0xf]  ;;  %v2889_v61 = vor.u32 %v4147_v53, %v2888_v52  ;;  %v4375_v50 = vld [vmem:[#allocation4 + $0x78c] sm:$0xf] }
  0xa7   :  { %1894 = vmatpush.bf16.msrb.mxu3 %v3849_v4  ;;  %v187_v18 = vpop.f32.mrf.mxu3  ;;  %1857 = vmatpush.bf16.msrb.mxu0 %v3017_v5  ;;  %v4139_v1 = vld [vmem:[#allocation4 + $0x24] sm:$0xf0]  ;;  %v4191_v5 = vld [vmem:[#allocation4 + $0x1cc] sm:$0xf]  ;;  %v3433_v6 = vor.u32 %v4283_v59, %v3432_v58 }
  0xa8   :  { %1870 = vmatpush.bf16.msrb.mxu1 %v3273_v10  ;;  %v3112_v2 = vld [vmem:[#allocation4 + $0x208] sm:$0xf]  ;;  %v3338_v10 = vld [vmem:[#allocation4 + $0x3e8] sm:$0xf0]  ;;  %v2857_v14 = vor.u32 %v4139_v1, %v2856_v0  ;;  %v3085_v18 = vor.u32 %v4191_v5, %v3082_v7 }
  0xa9   :  { %v4203_v4 = vld [vmem:[#allocation4 + $0x224] sm:$0xf0]  ;;  %v3818_v51 = vld [vmem:[#allocation4 + $0x7a8] sm:$0xf0] }
  0xaa   :  { %1882 = vmatpush.bf16.msrb.mxu2 %v3561_v17  ;;  %v3113_v15 = vor.u32 %v4203_v4, %v3112_v2  ;;  %v3656_v16 = vld [vmem:[#allocation4 + $0x648] sm:$0xf]  ;;  %v4167_v52 = vld [vmem:[#allocation4 + $0x10c] sm:$0xf] }
  0xab   :  { %1895 = vmatpush.bf16.msrb.mxu3 %v3817_v19  ;;  %1858 = vmatpush.bf16.msrb.mxu0 %v2985_v20  ;;  %v4339_v17 = vld [vmem:[#allocation4 + $0x664] sm:$0xf0]  ;;  %v3341_v19 = vor.u32 %v4255_v8, %v3338_v10  ;;  %v4183_v20 = vld [vmem:[#allocation4 + $0x18c] sm:$0xf] }
  0xac   :  { %1871 = vmatpush.bf16.msrb.mxu1 %v3241_v23  ;;  %v4247_v23 = vld [vmem:[#allocation4 + $0x38c] sm:$0xf]  ;;  %v3657_v25 = vor.u32 %v4339_v17, %v3656_v16  ;;  %v3368_v26 = vld [vmem:[#allocation4 + $0x408] sm:$0xf]  ;;  %v3053_v32 = vor.u32 %v4183_v20, %v3050_v22 }
  0xad   :  { %v4267_v27 = vld [vmem:[#allocation4 + $0x424] sm:$0xf0]  ;;  %v3309_v33 = vor.u32 %v4247_v23, %v3306_v24  ;;  %v2986_v53 = vld [vmem:[#allocation4 + $0x128] sm:$0xf0] }
  0xae   :  { %1883 = vmatpush.bf16.msrb.mxu2 %v3529_v30  ;;  %1811 = vmatmul.bf16.vlgmr.msra.gmra.mxu0 %v4608_v40  ;;  %v3624_v28 = vld [vmem:[#allocation4 + $0x608] sm:$0xf]  ;;  %v4319_v30 = vld [vmem:[#allocation4 + $0x5cc] sm:$0xf]  ;;  %v3369_v37 = vor.u32 %v4267_v27, %v3368_v26  ;;  %v2989_v60 = vor.u32 %v4167_v52, %v2986_v53 }
  0xaf   :  { %1896 = vmatpush.bf16.msrb.mxu3 %v3785_v31  ;;  %1824 = vmatmul.bf16.vlgmr.msra.gmra.mxu1 %v4610_v45  ;;  %v4331_v29 = vld [vmem:[#allocation4 + $0x624] sm:$0xf0]  ;;  %v3594_v31 = vld [vmem:[#allocation4 + $0x5e8] sm:$0xf0] }
  0xb0   :  { %1859 = vmatpush.bf16.msrb.mxu0 %v2953_v34  ;;  %1872 = vmatpush.bf16.msrb.mxu1 %v3209_v35  ;;  %v4383_v34 = vld [vmem:[#allocation4 + $0x7cc] sm:$0xf]  ;;  %v3625_v42 = vor.u32 %v4331_v29, %v3624_v28 }
  0xb1   :  { %v3850_v35 = vld [vmem:[#allocation4 + $0x7e8] sm:$0xf0] }
  0xb2   :  { %1884 = vmatpush.bf16.msrb.mxu2 %v3497_v43  ;;  %v3597_v43 = vor.u32 %v4319_v30, %v3594_v31  ;;  %v4231_v54 = vld [vmem:[#allocation4 + $0x30c] sm:$0xf] }
  0xb3   :  { %1897 = vmatpush.bf16.msrb.mxu3 %v3753_v44  ;;  %v3853_v44 = vor.u32 %v4383_v34, %v3850_v35  ;;  %v3242_v55 = vld [vmem:[#allocation4 + $0x328] sm:$0xf0] }
  0xb4   :  { %1860 = vmatpush.bf16.msrb.mxu0 %v2921_v48  ;;  %1873 = vmatpush.bf16.msrb.mxu1 %v3177_v49  ;;  %v3021_v48 = vor.u32 %v4175_v36, %v3018_v38  ;;  %v3277_v49 = vor.u32 %v4239_v39, %v3274_v41  ;;  %v4303_v58 = vld [vmem:[#allocation4 + $0x54c] sm:$0xf] }
  0xb5   :  { %1837 = vmatmul.bf16.vlgmr.msra.gmra.mxu2 %v4614_v3  ;;  %v3530_v59 = vld [vmem:[#allocation4 + $0x568] sm:$0xf0] }
  0xb6   :  { %1850 = vmatmul.bf16.vlgmr.msra.gmra.mxu3 %v4616_v9  ;;  %1885 = vmatpush.bf16.msrb.mxu2 %v3465_v56  ;;  %v3565_v56 = vor.u32 %v4311_v46, %v3562_v47  ;;  %v4159_v0 = vld [vmem:[#allocation4 + $0xcc] sm:$0xf]  ;;  %v3533_v5 = vor.u32 %v4303_v58, %v3530_v59  ;;  %v4196_v46 = vld [vmem:[#allocation4 + $0x1ec] sm:$0xf0] }
  0xb7   :  { %1898 = vmatpush.bf16.msrb.mxu3 %v3721_v57  ;;  %v3821_v57 = vor.u32 %v4375_v50, %v3818_v51  ;;  %v2954_v1 = vld [vmem:[#allocation4 + $0xe8] sm:$0xf0]  ;;  %v3344_v47 = vld [vmem:[#allocation4 + $0x3d0] sm:$0xf] }
  0xb8   :  { %1861 = vmatpush.bf16.msrb.mxu0 %v2889_v61  ;;  %1874 = vmatpush.bf16.msrb.mxu1 %v3145_v62  ;;  %v3245_v61 = vor.u32 %v4231_v54, %v3242_v55  ;;  %v4367_v62 = vld [vmem:[#allocation4 + $0x74c] sm:$0xf]  ;;  %v2957_v10 = vor.u32 %v4159_v0, %v2954_v1  ;;  %v3056_v58 = vld [vmem:[#allocation4 + $0x190] sm:$0xf] }
  0xb9   :  { %v4223_v2 = vld [vmem:[#allocation4 + $0x2cc] sm:$0xf] }
  0xba   :  { %1886 = vmatpush.bf16.msrb.mxu2 %v3433_v6  ;;  %v3210_v4 = vld [vmem:[#allocation4 + $0x2e8] sm:$0xf0]  ;;  %v3789_v6 = vor.u32 %v4367_v62, %v3786_v63  ;;  %v4252_v62 = vld [vmem:[#allocation4 + $0x3ac] sm:$0xf0] }
  0xbb   :  { %1899 = vmatpush.bf16.msrb.mxu3 %v3689_v11  ;;  %v4295_v7 = vld [vmem:[#allocation4 + $0x50c] sm:$0xf]  ;;  %v3213_v11 = vor.u32 %v4223_v2, %v3210_v4 }
  0xbc   :  { %1862 = vmatpush.bf16.msrb.mxu0 %v2857_v14  ;;  %1875 = vmatpush.bf16.msrb.mxu1 %v3113_v15  ;;  %v3498_v8 = vld [vmem:[#allocation4 + $0x528] sm:$0xf0] }
  0xbd   :  { %v4151_v14 = vld [vmem:[#allocation4 + $0x8c] sm:$0xf] }
  0xbe   :  { %1887 = vmatpush.bf16.msrb.mxu2 %v3401_v21  ;;  %v2922_v15 = vld [vmem:[#allocation4 + $0xa8] sm:$0xf0] }
  0xbf   :  { %1900 = vmatpush.bf16.msrb.mxu3 %v3657_v25  ;;  %1863 = vmatmul.bf16.vlgmr.msrb.gmra.mxu0 %v4608_v40  ;;  %v4215_v16 = vld [vmem:[#allocation4 + $0x28c] sm:$0xf]  ;;  %v2925_v22 = vor.u32 %v4151_v14, %v2922_v15  ;;  %v4180_v14 = vld [vmem:[#allocation4 + $0x16c] sm:$0xf0] }
  0xc0   :  { %1907 = vmatpush.bf16.msra.mxu0 %v3085_v18  ;;  %1920 = vmatpush.bf16.msra.mxu1 %v3341_v19  ;;  %v3178_v17 = vld [vmem:[#allocation4 + $0x2a8] sm:$0xf0]  ;;  %v3501_v18 = vor.u32 %v4295_v7, %v3498_v8  ;;  %v3757_v19 = vor.u32 %v4359_v12, %v3754_v13  ;;  %v3024_v13 = vld [vmem:[#allocation4 + $0x150] sm:$0xf] }
  0xc1   :  { %1876 = vmatmul.bf16.vlgmr.msrb.gmra.mxu1 %v4610_v45  ;;  %v4287_v20 = vld [vmem:[#allocation4 + $0x4cc] sm:$0xf]  ;;  %v3181_v23 = vor.u32 %v4215_v16, %v3178_v17  ;;  %v3280_v17 = vld [vmem:[#allocation4 + $0x350] sm:$0xf] }
  0xc2   :  { %1888 = vmatpush.bf16.msrb.mxu2 %v3369_v37  ;;  %v3466_v21 = vld [vmem:[#allocation4 + $0x4e8] sm:$0xf0] }
  0xc3   :  { %1901 = vmatpush.bf16.msrb.mxu3 %v3625_v42  ;;  %v4351_v24 = vld [vmem:[#allocation4 + $0x6cc] sm:$0xf]  ;;  %v3469_v30 = vor.u32 %v4287_v20, %v3466_v21  ;;  %v3568_v20 = vld [vmem:[#allocation4 + $0x590] sm:$0xf] }
  0xc4   :  { %1908 = vmatpush.bf16.msra.mxu0 %v3053_v32  ;;  %1921 = vmatpush.bf16.msra.mxu1 %v3309_v33  ;;  %v3722_v25 = vld [vmem:[#allocation4 + $0x6e8] sm:$0xf0]  ;;  %v4316_v21 = vld [vmem:[#allocation4 + $0x5ac] sm:$0xf0] }
  0xc5   :  { %1889 = vmatmul.bf16.vlgmr.msrb.gmra.mxu2 %v4614_v3  ;;  %v4143_v26 = vld [vmem:[#allocation4 + $0x4c] sm:$0xf]  ;;  %v3725_v31 = vor.u32 %v4351_v24, %v3722_v25  ;;  %v4380_v24 = vld [vmem:[#allocation4 + $0x7ac] sm:$0xf0] }
  0xc6   :  { %1933 = vmatpush.bf16.msra.mxu2 %v3597_v43  ;;  %1902 = vmatmul.bf16.vlgmr.msrb.gmra.mxu3 %v4616_v9  ;;  %v2890_v27 = vld [vmem:[#allocation4 + $0x68] sm:$0xf0]  ;;  %v3088_v43 = vld [vmem:[#allocation4 + $0x1d0] sm:$0xf] }
  0xc7   :  { %1946 = vmatpush.bf16.msra.mxu3 %v3853_v44  ;;  %v4207_v28 = vld [vmem:[#allocation4 + $0x24c] sm:$0xf]  ;;  %v2893_v35 = vor.u32 %v4143_v26, %v2890_v27  ;;  %v2992_v26 = vld [vmem:[#allocation4 + $0x110] sm:$0xf] }
  0xc8   :  { %1909 = vmatpush.bf16.msra.mxu0 %v3021_v48  ;;  %1922 = vmatpush.bf16.msra.mxu1 %v3277_v49  ;;  %v3146_v29 = vld [vmem:[#allocation4 + $0x268] sm:$0xf0]  ;;  %v4260_v48 = vld [vmem:[#allocation4 + $0x3ec] sm:$0xf0] }
  0xc9   :  { %v4279_v32 = vld [vmem:[#allocation4 + $0x48c] sm:$0xf]  ;;  %v3149_v36 = vor.u32 %v4207_v28, %v3146_v29  ;;  %v4172_v27 = vld [vmem:[#allocation4 + $0x12c] sm:$0xf0]  ;;  %v3569_v28 = vor.u32 %v4316_v21, %v3568_v20  ;;  %v3090_v20 = vld [vmem:[#allocation4 + $0x1f0] sm:$0xf0] }
  0xca   :  { %1934 = vmatpush.bf16.msra.mxu2 %v3565_v56  ;;  %v3434_v33 = vld [vmem:[#allocation4 + $0x4a8] sm:$0xf0]  ;;  %v3089_v56 = vor.u32 %v4196_v46, %v3088_v43  ;;  %v3248_v29 = vld [vmem:[#allocation4 + $0x310] sm:$0xf]  ;;  %v4256_v21 = vld [vmem:[#allocation4 + $0x3d4] sm:$0xf] }
  0xcb   :  { %1947 = vmatpush.bf16.msra.mxu3 %v3821_v57  ;;  %v4343_v34 = vld [vmem:[#allocation4 + $0x68c] sm:$0xf]  ;;  %v3437_v44 = vor.u32 %v4279_v32, %v3434_v33  ;;  %v3345_v57 = vor.u32 %v4260_v48, %v3344_v47  ;;  %v3536_v32 = vld [vmem:[#allocation4 + $0x550] sm:$0xf] }
  0xcc   :  { %1910 = vmatpush.bf16.msra.mxu0 %v2989_v60  ;;  %1923 = vmatpush.bf16.msra.mxu1 %v3245_v61  ;;  %v3690_v37 = vld [vmem:[#allocation4 + $0x6a8] sm:$0xf0]  ;;  %v4188_v60 = vld [vmem:[#allocation4 + $0x1ac] sm:$0xf0] }
  0xcd   :  { %v4135_v38 = vld [vmem:[#allocation4 + $0xc] sm:$0xf]  ;;  %v3693_v49 = vor.u32 %v4343_v34, %v3690_v37  ;;  %v3312_v61 = vld [vmem:[#allocation4 + $0x390] sm:$0xf]  ;;  %v3057_v7 = vor.u32 %v4188_v60, %v3056_v58  ;;  %v2993_v34 = vor.u32 %v4172_v27, %v2992_v26 }
  0xce   :  { %1935 = vmatpush.bf16.msra.mxu2 %v3533_v5  ;;  %v2858_v39 = vld [vmem:[#allocation4 + $0x28] sm:$0xf0]  ;;  %v3600_v5 = vld [vmem:[#allocation4 + $0x5d0] sm:$0xf]  ;;  %v3313_v8 = vor.u32 %v4252_v62, %v3312_v61 }
  0xcf   :  { %1948 = vmatpush.bf16.msra.mxu3 %v3789_v6  ;;  %v4199_v41 = vld [vmem:[#allocation4 + $0x20c] sm:$0xf]  ;;  %v2861_v52 = vor.u32 %v4135_v38, %v2858_v39  ;;  %v4324_v6 = vld [vmem:[#allocation4 + $0x5ec] sm:$0xf0] }
  0xd0   :  { %1911 = vmatpush.bf16.msra.mxu0 %v2957_v10  ;;  %1924 = vmatpush.bf16.msra.mxu1 %v3213_v11  ;;  %v3114_v42 = vld [vmem:[#allocation4 + $0x228] sm:$0xf0]  ;;  %v3856_v10 = vld [vmem:[#allocation4 + $0x7d0] sm:$0xf]  ;;  %v3601_v16 = vor.u32 %v4324_v6, %v3600_v5 }
  0xd1   :  { %v4271_v50 = vld [vmem:[#allocation4 + $0x44c] sm:$0xf]  ;;  %v3117_v53 = vor.u32 %v4199_v41, %v3114_v42  ;;  %v4388_v11 = vld [vmem:[#allocation4 + $0x7ec] sm:$0xf0] }
  0xd2   :  { %1936 = vmatpush.bf16.msra.mxu2 %v3501_v18  ;;  %v3402_v51 = vld [vmem:[#allocation4 + $0x468] sm:$0xf0]  ;;  %v4244_v18 = vld [vmem:[#allocation4 + $0x36c] sm:$0xf0] }
  0xd3   :  { %1949 = vmatpush.bf16.msra.mxu3 %v3757_v19  ;;  %v4335_v54 = vld [vmem:[#allocation4 + $0x64c] sm:$0xf]  ;;  %v3405_v59 = vor.u32 %v4271_v50, %v3402_v51  ;;  %v3857_v19 = vor.u32 %v4388_v11, %v3856_v10  ;;  %v3281_v25 = vor.u32 %v4244_v18, %v3280_v17  ;;  %v4308_v33 = vld [vmem:[#allocation4 + $0x56c] sm:$0xf0] }
  0xd4   :  { %1912 = vmatpush.bf16.msra.mxu0 %v2925_v22  ;;  %1925 = vmatpush.bf16.msra.mxu1 %v3181_v23  ;;  %v3658_v55 = vld [vmem:[#allocation4 + $0x668] sm:$0xf0]  ;;  %v3025_v22 = vor.u32 %v4180_v14, %v3024_v13  ;;  %v3824_v23 = vld [vmem:[#allocation4 + $0x790] sm:$0xf]  ;;  %v3537_v41 = vor.u32 %v4308_v33, %v3536_v32 }
  0xd5   :  { %v3661_v63 = vor.u32 %v4335_v54, %v3658_v55  ;;  %v4263_v0 = vld [vmem:[#allocation4 + $0x40c] sm:$0xf]  ;;  %v2960_v38 = vld [vmem:[#allocation4 + $0xd0] sm:$0xf] }
  0xd6   :  { %1937 = vmatpush.bf16.msra.mxu2 %v3469_v30  ;;  %v3370_v1 = vld [vmem:[#allocation4 + $0x428] sm:$0xf0]  ;;  %v4236_v30 = vld [vmem:[#allocation4 + $0x32c] sm:$0xf0] }
  0xd7   :  { %1950 = vmatpush.bf16.msra.mxu3 %v3725_v31  ;;  %v4327_v2 = vld [vmem:[#allocation4 + $0x60c] sm:$0xf]  ;;  %v3373_v12 = vor.u32 %v4263_v0, %v3370_v1  ;;  %v3825_v31 = vor.u32 %v4380_v24, %v3824_v23  ;;  %v3249_v37 = vor.u32 %v4236_v30, %v3248_v29  ;;  %v4164_v39 = vld [vmem:[#allocation4 + $0xec] sm:$0xf0]  ;;  %v3346_v23 = vld [vmem:[#allocation4 + $0x3f0] sm:$0xf0] }
  0xd8   :  { %1913 = vmatpush.bf16.msra.mxu0 %v2893_v35  ;;  %1926 = vmatpush.bf16.msra.mxu1 %v3149_v36  ;;  %v3626_v4 = vld [vmem:[#allocation4 + $0x628] sm:$0xf0]  ;;  %v3792_v35 = vld [vmem:[#allocation4 + $0x750] sm:$0xf]  ;;  %v2961_v48 = vor.u32 %v4164_v39, %v2960_v38  ;;  %v3349_v32 = vor.u32 %v4256_v21, %v3346_v23  ;;  %v3506_v21 = vld [vmem:[#allocation4 + $0x530] sm:$0xf0] }
  0xd9   :  { %v3629_v15 = vor.u32 %v4327_v2, %v3626_v4  ;;  %v4372_v36 = vld [vmem:[#allocation4 + $0x76c] sm:$0xf0]  ;;  %v4360_v23 = vld [vmem:[#allocation4 + $0x714] sm:$0xf] }
  0xda   :  { %1938 = vmatpush.bf16.msra.mxu2 %v3437_v44  ;;  %v3216_v42 = vld [vmem:[#allocation4 + $0x2d0] sm:$0xf]  ;;  %v3793_v44 = vor.u32 %v4372_v36, %v3792_v35  ;;  %v4248_v35 = vld [vmem:[#allocation4 + $0x394] sm:$0xf] }
  0xdb   :  { %1951 = vmatpush.bf16.msra.mxu3 %v3693_v49  ;;  %v4228_v43 = vld [vmem:[#allocation4 + $0x2ec] sm:$0xf0]  ;;  %v3314_v36 = vld [vmem:[#allocation4 + $0x3b0] sm:$0xf0] }
  0xdc   :  { %1914 = vmatpush.bf16.msra.mxu0 %v2861_v52  ;;  %1927 = vmatpush.bf16.msra.mxu1 %v3117_v53  ;;  %v3504_v46 = vld [vmem:[#allocation4 + $0x510] sm:$0xf]  ;;  %v3217_v51 = vor.u32 %v4228_v43, %v3216_v42  ;;  %v4320_v43 = vld [vmem:[#allocation4 + $0x5d4] sm:$0xf] }
  0xdd   :  { %v4300_v47 = vld [vmem:[#allocation4 + $0x52c] sm:$0xf0] }
  0xde   :  { %1939 = vmatpush.bf16.msra.mxu2 %v3405_v59  ;;  %v3760_v49 = vld [vmem:[#allocation4 + $0x710] sm:$0xf]  ;;  %v3505_v54 = vor.u32 %v4300_v47, %v3504_v46  ;;  %v4384_v47 = vld [vmem:[#allocation4 + $0x7d4] sm:$0xf] }
  0xdf   :  { %1952 = vmatpush.bf16.msra.mxu3 %v3661_v63  ;;  %1915 = vmatmul.bf16.vlgmr.msra.gmra.mxu0 %v4608_v40  ;;  %v4364_v50 = vld [vmem:[#allocation4 + $0x72c] sm:$0xf0] }
  0xe0   :  { %1959 = vmatpush.bf16.msrb.mxu0 %v3089_v56  ;;  %1972 = vmatpush.bf16.msrb.mxu1 %v3345_v57  ;;  %v2928_v52 = vld [vmem:[#allocation4 + $0x90] sm:$0xf]  ;;  %v3761_v57 = vor.u32 %v4364_v50, %v3760_v49  ;;  %v3317_v49 = vor.u32 %v4248_v35, %v3314_v36  ;;  %v4352_v35 = vld [vmem:[#allocation4 + $0x6d4] sm:$0xf] }
  0xe1   :  { %1928 = vmatmul.bf16.vlgmr.msra.gmra.mxu1 %v4610_v45  ;;  %v4156_v53 = vld [vmem:[#allocation4 + $0xac] sm:$0xf0]  ;;  %v3730_v36 = vld [vmem:[#allocation4 + $0x6f0] sm:$0xf0] }
  0xe2   :  { %1940 = vmatpush.bf16.msra.mxu2 %v3373_v12  ;;  %v3184_v55 = vld [vmem:[#allocation4 + $0x290] sm:$0xf]  ;;  %v2929_v60 = vor.u32 %v4156_v53, %v2928_v52  ;;  %v3026_v52 = vld [vmem:[#allocation4 + $0x170] sm:$0xf0] }
  0xe3   :  { %1953 = vmatpush.bf16.msra.mxu3 %v3629_v15  ;;  %v4220_v56 = vld [vmem:[#allocation4 + $0x2ac] sm:$0xf0] }
  0xe4   :  { %1960 = vmatpush.bf16.msrb.mxu0 %v3057_v7  ;;  %1973 = vmatpush.bf16.msrb.mxu1 %v3313_v8  ;;  %v3472_v58 = vld [vmem:[#allocation4 + $0x4d0] sm:$0xf]  ;;  %v3185_v63 = vor.u32 %v4220_v56, %v3184_v55  ;;  %v4240_v55 = vld [vmem:[#allocation4 + $0x354] sm:$0xf] }
  0xe5   :  { %1941 = vmatmul.bf16.vlgmr.msra.gmra.mxu2 %v4614_v3  ;;  %v4292_v59 = vld [vmem:[#allocation4 + $0x4ec] sm:$0xf0]  ;;  %v3282_v56 = vld [vmem:[#allocation4 + $0x370] sm:$0xf0] }
  0xe6   :  { %1985 = vmatpush.bf16.msrb.mxu2 %v3601_v16  ;;  %1954 = vmatmul.bf16.vlgmr.msra.gmra.mxu3 %v4616_v9  ;;  %v3728_v61 = vld [vmem:[#allocation4 + $0x6d0] sm:$0xf]  ;;  %v3473_v2 = vor.u32 %v4292_v59, %v3472_v58  ;;  %v4312_v58 = vld [vmem:[#allocation4 + $0x594] sm:$0xf] }
  0xe7   :  { %1998 = vmatpush.bf16.msrb.mxu3 %v3857_v19  ;;  %v4356_v62 = vld [vmem:[#allocation4 + $0x6ec] sm:$0xf0]  ;;  %v4192_v19 = vld [vmem:[#allocation4 + $0x1d4] sm:$0xf] }
  0xe8   :  { %1961 = vmatpush.bf16.msrb.mxu0 %v3025_v22  ;;  %1974 = vmatpush.bf16.msrb.mxu1 %v3281_v25  ;;  %v2896_v0 = vld [vmem:[#allocation4 + $0x50] sm:$0xf]  ;;  %v3729_v6 = vor.u32 %v4356_v62, %v3728_v61  ;;  %v3093_v30 = vor.u32 %v4192_v19, %v3090_v20  ;;  %v3570_v59 = vld [vmem:[#allocation4 + $0x5b0] sm:$0xf0] }
  0xe9   :  { %v4148_v1 = vld [vmem:[#allocation4 + $0x6c] sm:$0xf0]  ;;  %v4376_v61 = vld [vmem:[#allocation4 + $0x794] sm:$0xf] }
  0xea   :  { %1986 = vmatpush.bf16.msrb.mxu2 %v3569_v28  ;;  %v3152_v4 = vld [vmem:[#allocation4 + $0x250] sm:$0xf]  ;;  %v2897_v10 = vor.u32 %v4148_v1, %v2896_v0  ;;  %v3826_v62 = vld [vmem:[#allocation4 + $0x7b0] sm:$0xf0] }
  0xeb   :  { %1999 = vmatpush.bf16.msrb.mxu3 %v3825_v31  ;;  %v4212_v5 = vld [vmem:[#allocation4 + $0x26c] sm:$0xf0]  ;;  %v4184_v31 = vld [vmem:[#allocation4 + $0x194] sm:$0xf] }
  0xec   :  { %1962 = vmatpush.bf16.msrb.mxu0 %v2993_v34  ;;  %1975 = vmatpush.bf16.msrb.mxu1 %v3249_v37  ;;  %v3440_v7 = vld [vmem:[#allocation4 + $0x490] sm:$0xf]  ;;  %v3153_v14 = vor.u32 %v4212_v5, %v3152_v4  ;;  %v3058_v34 = vld [vmem:[#allocation4 + $0x1b0] sm:$0xf0] }
  0xed   :  { %v4284_v8 = vld [vmem:[#allocation4 + $0x4ac] sm:$0xf0]  ;;  %v3061_v46 = vor.u32 %v4184_v31, %v3058_v34  ;;  %v4168_v0 = vld [vmem:[#allocation4 + $0x114] sm:$0xf] }
  0xee   :  { %1987 = vmatpush.bf16.msrb.mxu2 %v3537_v41  ;;  %v3696_v11 = vld [vmem:[#allocation4 + $0x690] sm:$0xf]  ;;  %v3441_v18 = vor.u32 %v4284_v8, %v3440_v7  ;;  %v2994_v1 = vld [vmem:[#allocation4 + $0x130] sm:$0xf0] }
  0xef   :  { %2000 = vmatpush.bf16.msrb.mxu3 %v3793_v44  ;;  %v4348_v12 = vld [vmem:[#allocation4 + $0x6ac] sm:$0xf0]  ;;  %v3602_v44 = vld [vmem:[#allocation4 + $0x5f0] sm:$0xf0] }
  0xf0   :  { %1963 = vmatpush.bf16.msrb.mxu0 %v2961_v48  ;;  %1976 = vmatpush.bf16.msrb.mxu1 %v3217_v51  ;;  %v2864_v13 = vld [vmem:[#allocation4 + $0x10] sm:$0xf]  ;;  %v3697_v22 = vor.u32 %v4348_v12, %v3696_v11  ;;  %v3858_v48 = vld [vmem:[#allocation4 + $0x7f0] sm:$0xf0] }
  0xf1   :  { %v4140_v15 = vld [vmem:[#allocation4 + $0x2c] sm:$0xf0]  ;;  %v4176_v51 = vld [vmem:[#allocation4 + $0x154] sm:$0xf] }
  0xf2   :  { %1988 = vmatpush.bf16.msrb.mxu2 %v3505_v54  ;;  %v3120_v16 = vld [vmem:[#allocation4 + $0x210] sm:$0xf]  ;;  %v2865_v26 = vor.u32 %v4140_v15, %v2864_v13  ;;  %v3605_v54 = vor.u32 %v4320_v43, %v3602_v44  ;;  %v4232_v4 = vld [vmem:[#allocation4 + $0x314] sm:$0xf]  ;;  %v3733_v44 = vor.u32 %v4352_v35, %v3730_v36 }
  0xf3   :  { %2001 = vmatpush.bf16.msrb.mxu3 %v3761_v57  ;;  %v4204_v17 = vld [vmem:[#allocation4 + $0x22c] sm:$0xf0]  ;;  %v3861_v57 = vor.u32 %v4384_v47, %v3858_v48  ;;  %v3250_v5 = vld [vmem:[#allocation4 + $0x330] sm:$0xf0] }
  0xf4   :  { %1964 = vmatpush.bf16.msrb.mxu0 %v2929_v60  ;;  %1977 = vmatpush.bf16.msrb.mxu1 %v3185_v63  ;;  %v3408_v24 = vld [vmem:[#allocation4 + $0x450] sm:$0xf]  ;;  %v3121_v29 = vor.u32 %v4204_v17, %v3120_v16  ;;  %v3029_v60 = vor.u32 %v4176_v51, %v3026_v52  ;;  %v3285_v63 = vor.u32 %v4240_v55, %v3282_v56  ;;  %v4304_v7 = vld [vmem:[#allocation4 + $0x554] sm:$0xf] }
  0xf5   :  { %v4276_v25 = vld [vmem:[#allocation4 + $0x46c] sm:$0xf0]  ;;  %v3538_v8 = vld [vmem:[#allocation4 + $0x570] sm:$0xf0]  ;;  %v3253_v13 = vor.u32 %v4232_v4, %v3250_v5 }
  0xf6   :  { %1989 = vmatpush.bf16.msrb.mxu2 %v3473_v2  ;;  %v3664_v27 = vld [vmem:[#allocation4 + $0x650] sm:$0xf]  ;;  %v3409_v33 = vor.u32 %v4276_v25, %v3408_v24  ;;  %v3573_v2 = vor.u32 %v4312_v58, %v3570_v59  ;;  %v4368_v11 = vld [vmem:[#allocation4 + $0x754] sm:$0xf]  ;;  %v3541_v16 = vor.u32 %v4304_v7, %v3538_v8  ;;  %v4197_v58 = vld [vmem:[#allocation4 + $0x1f4] sm:$0xf0] }
  0xf7   :  { %2002 = vmatpush.bf16.msrb.mxu3 %v3729_v6  ;;  %v4340_v28 = vld [vmem:[#allocation4 + $0x66c] sm:$0xf0]  ;;  %v3829_v6 = vor.u32 %v4376_v61, %v3826_v62  ;;  %v3794_v12 = vld [vmem:[#allocation4 + $0x770] sm:$0xf0]  ;;  %v3352_v59 = vld [vmem:[#allocation4 + $0x3d8] sm:$0xf] }
  0xf8   :  { %1965 = vmatpush.bf16.msrb.mxu0 %v2897_v10  ;;  %1978 = vmatpush.bf16.msrb.mxu1 %v3153_v14  ;;  %v3665_v37 = vor.u32 %v4340_v28, %v3664_v27  ;;  %v3376_v38 = vld [vmem:[#allocation4 + $0x410] sm:$0xf]  ;;  %v2997_v10 = vor.u32 %v4168_v0, %v2994_v1  ;;  %v4160_v14 = vld [vmem:[#allocation4 + $0xd4] sm:$0xf]  ;;  %v3797_v19 = vor.u32 %v4368_v11, %v3794_v12  ;;  %v4261_v61 = vld [vmem:[#allocation4 + $0x3f4] sm:$0xf0] }
  0xf9   :  { %v4268_v39 = vld [vmem:[#allocation4 + $0x42c] sm:$0xf0]  ;;  %v2962_v15 = vld [vmem:[#allocation4 + $0xf0] sm:$0xf0]  ;;  %v3353_v7 = vor.u32 %v4261_v61, %v3352_v59  ;;  %v3320_v11 = vld [vmem:[#allocation4 + $0x398] sm:$0xf] }
  0xfa   :  { %1990 = vmatpush.bf16.msrb.mxu2 %v3441_v18  ;;  %v3632_v41 = vld [vmem:[#allocation4 + $0x610] sm:$0xf]  ;;  %v3377_v50 = vor.u32 %v4268_v39, %v3376_v38  ;;  %v4224_v17 = vld [vmem:[#allocation4 + $0x2d4] sm:$0xf]  ;;  %v4253_v12 = vld [vmem:[#allocation4 + $0x3b4] sm:$0xf0] }
  0xfb   :  { %2003 = vmatpush.bf16.msrb.mxu3 %v3697_v22  ;;  %v4332_v42 = vld [vmem:[#allocation4 + $0x62c] sm:$0xf0]  ;;  %v3218_v18 = vld [vmem:[#allocation4 + $0x2f0] sm:$0xf0]  ;;  %v2965_v22 = vor.u32 %v4160_v14, %v2962_v15  ;;  %v3224_v61 = vld [vmem:[#allocation4 + $0x2d8] sm:$0xf] }
  0xfc   :  { %1966 = vmatpush.bf16.msrb.mxu0 %v2865_v26  ;;  %1979 = vmatpush.bf16.msrb.mxu1 %v3121_v29  ;;  %v3633_v53 = vor.u32 %v4332_v42, %v3632_v41  ;;  %v4296_v20 = vld [vmem:[#allocation4 + $0x514] sm:$0xf]  ;;  %v3221_v25 = vor.u32 %v4224_v17, %v3218_v18  ;;  %v3608_v18 = vld [vmem:[#allocation4 + $0x5d8] sm:$0xf] }
  0xfd   :  { %v3762_v24 = vld [vmem:[#allocation4 + $0x730] sm:$0xf0]  ;;  %v3509_v28 = vor.u32 %v4296_v20, %v3506_v21  ;;  %v3864_v21 = vld [vmem:[#allocation4 + $0x7d8] sm:$0xf] }
  0xfe   :  { %1991 = vmatpush.bf16.msrb.mxu2 %v3409_v33  ;;  %v4152_v26 = vld [vmem:[#allocation4 + $0x94] sm:$0xf]  ;;  %v3765_v31 = vor.u32 %v4360_v23, %v3762_v24  ;;  %v3321_v23 = vor.u32 %v4253_v12, %v3320_v11  ;;  %v3192_v11 = vld [vmem:[#allocation4 + $0x298] sm:$0xf] }
  0xff   :  { %2004 = vmatpush.bf16.msrb.mxu3 %v3665_v37  ;;  %1967 = vmatmul.bf16.vlgmr.msrb.gmra.mxu0 %v4608_v40  ;;  %v2930_v27 = vld [vmem:[#allocation4 + $0xb0] sm:$0xf0]  ;;  %v4221_v12 = vld [vmem:[#allocation4 + $0x2b4] sm:$0xf0] }
 0x100   :  { %2011 = vmatpush.bf16.msra.mxu0 %v3093_v30  ;;  %2024 = vmatpush.bf16.msra.mxu1 %v3349_v32  ;;  %v4216_v29 = vld [vmem:[#allocation4 + $0x294] sm:$0xf]  ;;  %v2933_v34 = vor.u32 %v4152_v26, %v2930_v27  ;;  %v4181_v26 = vld [vmem:[#allocation4 + $0x174] sm:$0xf0]  ;;  %v4639_v27 = vld [vmem:[%s4704_s4] sm:$0xff] }
 0x101   :  { %1980 = vmatmul.bf16.vlgmr.msrb.gmra.mxu1 %v4610_v45  ;;  %v3186_v30 = vld [vmem:[#allocation4 + $0x2b0] sm:$0xf0]  ;;  %v455_v36 = vperm.slane %v4639_v27, 0 }
 0x102   :  { %1992 = vmatpush.bf16.msrb.mxu2 %v3377_v50  ;;  %v4288_v32 = vld [vmem:[#allocation4 + $0x4d4] sm:$0xf]  ;;  %v3189_v37 = vor.u32 %v4216_v29, %v3186_v30  ;;  %v3288_v30 = vld [vmem:[#allocation4 + $0x358] sm:$0xf] }
 0x103   :  { %2005 = vmatpush.bf16.msrb.mxu3 %v3633_v53  ;;  %v3474_v33 = vld [vmem:[#allocation4 + $0x4f0] sm:$0xf0] }
 0x104   :  { %2012 = vmatpush.bf16.msra.mxu0 %v3061_v46  ;;  %2025 = vmatpush.bf16.msra.mxu1 %v3317_v49  ;;  %v4144_v38 = vld [vmem:[#allocation4 + $0x54] sm:$0xf]  ;;  %v3477_v41 = vor.u32 %v4288_v32, %v3474_v33  ;;  %v3576_v33 = vld [vmem:[#allocation4 + $0x598] sm:$0xf] }
 0x105   :  { %1993 = vmatmul.bf16.vlgmr.msrb.gmra.mxu2 %v4614_v3  ;;  %v2898_v39 = vld [vmem:[#allocation4 + $0x70] sm:$0xf0] }
 0x106   :  { %2037 = vmatpush.bf16.msra.mxu2 %v3605_v54  ;;  %2006 = vmatmul.bf16.vlgmr.msrb.gmra.mxu3 %v4616_v9  ;;  %v4208_v42 = vld [vmem:[#allocation4 + $0x254] sm:$0xf]  ;;  %v2901_v48 = vor.u32 %v4144_v38, %v2898_v39  ;;  %v4381_v38 = vld [vmem:[#allocation4 + $0x7b4] sm:$0xf0] }
 0x107   :  { %2050 = vmatpush.bf16.msra.mxu3 %v3861_v57  ;;  %v3154_v43 = vld [vmem:[#allocation4 + $0x270] sm:$0xf0]  ;;  %v3096_v57 = vld [vmem:[#allocation4 + $0x1d8] sm:$0xf] }
 0x108   :  { %2013 = vmatpush.bf16.msra.mxu0 %v3029_v60  ;;  %2026 = vmatpush.bf16.msra.mxu1 %v3285_v63  ;;  %v4280_v46 = vld [vmem:[#allocation4 + $0x494] sm:$0xf]  ;;  %v3157_v52 = vor.u32 %v4208_v42, %v3154_v43  ;;  %v3097_v5 = vor.u32 %v4197_v58, %v3096_v57  ;;  %v4173_v42 = vld [vmem:[#allocation4 + $0x134] sm:$0xf0] }
 0x109   :  { %v3442_v47 = vld [vmem:[#allocation4 + $0x4b0] sm:$0xf0]  ;;  %v2968_v57 = vld [vmem:[#allocation4 + $0xd8] sm:$0xf] }
 0x10a   :  { %2038 = vmatpush.bf16.msra.mxu2 %v3573_v2  ;;  %v4344_v49 = vld [vmem:[#allocation4 + $0x694] sm:$0xf]  ;;  %v3445_v56 = vor.u32 %v4280_v46, %v3442_v47  ;;  %v4237_v46 = vld [vmem:[#allocation4 + $0x334] sm:$0xf0] }
 0x10b   :  { %2051 = vmatpush.bf16.msra.mxu3 %v3829_v6  ;;  %v3698_v50 = vld [vmem:[#allocation4 + $0x6b0] sm:$0xf0]  ;;  %v3064_v6 = vld [vmem:[#allocation4 + $0x198] sm:$0xf] }
 0x10c   :  { %2014 = vmatpush.bf16.msra.mxu0 %v2997_v10  ;;  %2027 = vmatpush.bf16.msra.mxu1 %v3253_v13  ;;  %v4136_v51 = vld [vmem:[#allocation4 + $0x14] sm:$0xf]  ;;  %v3701_v60 = vor.u32 %v4344_v49, %v3698_v50  ;;  %v4189_v10 = vld [vmem:[#allocation4 + $0x1b4] sm:$0xf0] }
 0x10d   :  { %v2866_v53 = vld [vmem:[#allocation4 + $0x30] sm:$0xf0]  ;;  %v3065_v20 = vor.u32 %v4189_v10, %v3064_v6  ;;  %v3544_v49 = vld [vmem:[#allocation4 + $0x558] sm:$0xf] }
 0x10e   :  { %2039 = vmatpush.bf16.msra.mxu2 %v3541_v16  ;;  %v4200_v54 = vld [vmem:[#allocation4 + $0x214] sm:$0xf]  ;;  %v2869_v0 = vor.u32 %v4136_v51, %v2866_v53  ;;  %v4309_v50 = vld [vmem:[#allocation4 + $0x574] sm:$0xf0] }
 0x10f   :  { %2052 = vmatpush.bf16.msra.mxu3 %v3797_v19  ;;  %v3122_v55 = vld [vmem:[#allocation4 + $0x230] sm:$0xf0]  ;;  %v4325_v19 = vld [vmem:[#allocation4 + $0x5f4] sm:$0xf0] }
 0x110   :  { %2015 = vmatpush.bf16.msra.mxu0 %v2965_v22  ;;  %2028 = vmatpush.bf16.msra.mxu1 %v3221_v25  ;;  %v4272_v62 = vld [vmem:[#allocation4 + $0x454] sm:$0xf]  ;;  %v3125_v4 = vor.u32 %v4200_v54, %v3122_v55  ;;  %v4389_v22 = vld [vmem:[#allocation4 + $0x7f4] sm:$0xf0]  ;;  %v3609_v29 = vor.u32 %v4325_v19, %v3608_v18 }
 0x111   :  { %v3410_v63 = vld [vmem:[#allocation4 + $0x470] sm:$0xf0]  ;;  %v3032_v25 = vld [vmem:[#allocation4 + $0x158] sm:$0xf]  ;;  %v3865_v32 = vor.u32 %v4389_v22, %v3864_v21  ;;  %v3193_v21 = vor.u32 %v4221_v12, %v3192_v11 }
 0x112   :  { %2040 = vmatpush.bf16.msra.mxu2 %v3509_v28  ;;  %v4336_v1 = vld [vmem:[#allocation4 + $0x654] sm:$0xf]  ;;  %v3413_v8 = vor.u32 %v4272_v62, %v3410_v63  ;;  %v3033_v35 = vor.u32 %v4181_v26, %v3032_v25  ;;  %v3800_v54 = vld [vmem:[#allocation4 + $0x758] sm:$0xf] }
 0x113   :  { %2053 = vmatpush.bf16.msra.mxu3 %v3765_v31  ;;  %v3666_v2 = vld [vmem:[#allocation4 + $0x670] sm:$0xf0]  ;;  %v4245_v31 = vld [vmem:[#allocation4 + $0x374] sm:$0xf0] }
 0x114   :  { %2016 = vmatpush.bf16.msra.mxu0 %v2933_v34  ;;  %2029 = vmatpush.bf16.msra.mxu1 %v3189_v37  ;;  %v3669_v13 = vor.u32 %v4336_v1, %v3666_v2  ;;  %v4264_v14 = vld [vmem:[#allocation4 + $0x414] sm:$0xf]  ;;  %v4317_v34 = vld [vmem:[#allocation4 + $0x5b4] sm:$0xf0]  ;;  %v3289_v39 = vor.u32 %v4245_v31, %v3288_v30 }
 0x115   :  { %v3378_v15 = vld [vmem:[#allocation4 + $0x430] sm:$0xf0]  ;;  %v3832_v37 = vld [vmem:[#allocation4 + $0x798] sm:$0xf]  ;;  %v3577_v43 = vor.u32 %v4317_v34, %v3576_v33 }
 0x116   :  { %2041 = vmatpush.bf16.msra.mxu2 %v3477_v41  ;;  %v4328_v16 = vld [vmem:[#allocation4 + $0x614] sm:$0xf]  ;;  %v3381_v24 = vor.u32 %v4264_v14, %v3378_v15  ;;  %v3000_v41 = vld [vmem:[#allocation4 + $0x118] sm:$0xf] }
 0x117   :  { %2054 = vmatpush.bf16.msra.mxu3 %v3733_v44  ;;  %v3634_v17 = vld [vmem:[#allocation4 + $0x630] sm:$0xf0]  ;;  %v3256_v44 = vld [vmem:[#allocation4 + $0x318] sm:$0xf]  ;;  %v3001_v53 = vor.u32 %v4173_v42, %v3000_v41 }
 0x118   :  { %2017 = vmatpush.bf16.msra.mxu0 %v2901_v48  ;;  %2030 = vmatpush.bf16.msra.mxu1 %v3157_v52  ;;  %v3637_v28 = vor.u32 %v4328_v16, %v3634_v17  ;;  %v3833_v48 = vor.u32 %v4381_v38, %v3832_v37  ;;  %v4373_v55 = vld [vmem:[#allocation4 + $0x774] sm:$0xf0] }
 0x119   :  { %v4165_v58 = vld [vmem:[#allocation4 + $0xf4] sm:$0xf0]  ;;  %v3801_v63 = vor.u32 %v4373_v55, %v3800_v54 }
 0x11a   :  { %2042 = vmatpush.bf16.msra.mxu2 %v3445_v56  ;;  %v3257_v56 = vor.u32 %v4237_v46, %v3256_v44  ;;  %v4229_v62 = vld [vmem:[#allocation4 + $0x2f4] sm:$0xf0]  ;;  %v2969_v2 = vor.u32 %v4165_v58, %v2968_v57  ;;  %v3098_v44 = vld [vmem:[#allocation4 + $0x1f8] sm:$0xf0] }
 0x11b   :  { %2055 = vmatpush.bf16.msra.mxu3 %v3701_v60  ;;  %v1760_v47 = vpop.f32.mrf.mxu0  ;;  %v1773_v52 = vpop.f32.mrf.mxu1  ;;  %v3545_v60 = vor.u32 %v4309_v50, %v3544_v49  ;;  %v4301_v1 = vld [vmem:[#allocation4 + $0x534] sm:$0xf0]  ;;  %v3225_v6 = vor.u32 %v4229_v62, %v3224_v61  ;;  %v4257_v46 = vld [vmem:[#allocation4 + $0x3dc] sm:$0xf] }
 0x11c   :  { %2018 = vmatpush.bf16.msra.mxu0 %v2869_v0  ;;  %2031 = vmatpush.bf16.msra.mxu1 %v3125_v4  ;;  %v1761_v51 = vadd.f32 %v1760_v47, %v455_v36  ;;  %v3512_v0 = vld [vmem:[#allocation4 + $0x518] sm:$0xf]  ;;  %v3354_v49 = vld [vmem:[#allocation4 + $0x3f8] sm:$0xf0] }
 0x11d   :  { %v3768_v4 = vld [vmem:[#allocation4 + $0x718] sm:$0xf]  ;;  %v3513_v10 = vor.u32 %v4301_v1, %v3512_v0  ;;  %v4185_v58 = vld [vmem:[#allocation4 + $0x19c] sm:$0xf] }
 0x11e   :  { %2043 = vmatpush.bf16.msra.mxu2 %v3413_v8  ;;  %v4646_v59 = vadd.f32 %v1773_v52, %v1761_v51  ;;  %v4157_v8 = vld [vmem:[#allocation4 + $0xb4] sm:$0xf0]  ;;  %v3066_v62 = vld [vmem:[#allocation4 + $0x1b8] sm:$0xf0] }
 0x11f   :  { %2056 = vmatpush.bf16.msra.mxu3 %v3669_v13  ;;  %2019 = vmatmul.bf16.vlgmr.msra.gmra.mxu0 %v4608_v40  ;;  %v3480_v15 = vld [vmem:[#allocation4 + $0x4d8] sm:$0xf]  ;;  %v3322_v0 = vld [vmem:[#allocation4 + $0x3b8] sm:$0xf0]  ;;  %v3069_v12 = vor.u32 %v4185_v58, %v3066_v62 }
 0x120   :  { %2063 = vmatpush.bf16.msrb.mxu0 %v3097_v5  ;;  %2076 = vmatpush.bf16.msrb.mxu1 %v3353_v7  ;;  %v4365_v5 = vld [vmem:[#allocation4 + $0x734] sm:$0xf0]  ;;  %v3514_v62 = vld [vmem:[#allocation4 + $0x538] sm:$0xf0] }
 0x121   :  { %2032 = vmatmul.bf16.vlgmr.msra.gmra.mxu1 %v4610_v45  ;;  %v2936_v7 = vld [vmem:[#allocation4 + $0x98] sm:$0xf]  ;;  %v3769_v14 = vor.u32 %v4365_v5, %v3768_v4 }
 0x122   :  { %2044 = vmatpush.bf16.msra.mxu2 %v3381_v24  ;;  %v4293_v16 = vld [vmem:[#allocation4 + $0x4f4] sm:$0xf0]  ;;  %v2937_v18 = vor.u32 %v4157_v8, %v2936_v7  ;;  %v4321_v8 = vld [vmem:[#allocation4 + $0x5dc] sm:$0xf] }
 0x123   :  { %2057 = vmatpush.bf16.msra.mxu3 %v3637_v28  ;;  %v1762_v13 = vpop.f32.mrf.mxu0  ;;  %v1775_v17 = vpop.f32.mrf.mxu1  ;;  %v3736_v19 = vld [vmem:[#allocation4 + $0x6d8] sm:$0xf]  ;;  %v3481_v24 = vor.u32 %v4293_v16, %v3480_v15 }
 0x124   :  { %2064 = vmatpush.bf16.msrb.mxu0 %v3065_v20  ;;  %2077 = vmatpush.bf16.msrb.mxu1 %v3321_v23  ;;  %v4357_v20 = vld [vmem:[#allocation4 + $0x6f4] sm:$0xf0]  ;;  %v4385_v13 = vld [vmem:[#allocation4 + $0x7dc] sm:$0xf] }
 0x125   :  { %2045 = vmatmul.bf16.vlgmr.msra.gmra.mxu2 %v4614_v3  ;;  %v2904_v22 = vld [vmem:[#allocation4 + $0x58] sm:$0xf]  ;;  %v3737_v28 = vor.u32 %v4357_v20, %v3736_v19  ;;  %v4177_v17 = vld [vmem:[#allocation4 + $0x15c] sm:$0xf] }
 0x126   :  { %2089 = vmatpush.bf16.msrb.mxu2 %v3609_v29  ;;  %2058 = vmatmul.bf16.vlgmr.msra.gmra.mxu3 %v4616_v9  ;;  %v4149_v23 = vld [vmem:[#allocation4 + $0x74] sm:$0xf0] }
 0x127   :  { %2102 = vmatpush.bf16.msrb.mxu3 %v3865_v32  ;;  %v3160_v25 = vld [vmem:[#allocation4 + $0x258] sm:$0xf]  ;;  %v2905_v32 = vor.u32 %v4149_v23, %v2904_v22  ;;  %v4241_v22 = vld [vmem:[#allocation4 + $0x35c] sm:$0xf] }
 0x128   :  { %2065 = vmatpush.bf16.msrb.mxu0 %v3033_v35  ;;  %2078 = vmatpush.bf16.msrb.mxu1 %v3289_v39  ;;  %v4213_v26 = vld [vmem:[#allocation4 + $0x274] sm:$0xf0]  ;;  %v4648_v31 = vpop.f32.mrf.mxu2  ;;  %v3290_v23 = vld [vmem:[#allocation4 + $0x378] sm:$0xf0] }
 0x129   :  { %v3448_v29 = vld [vmem:[#allocation4 + $0x498] sm:$0xf]  ;;  %v4650_v36 = vpop.f32.mrf.mxu3  ;;  %v3161_v37 = vor.u32 %v4213_v26, %v3160_v25  ;;  %v4313_v26 = vld [vmem:[#allocation4 + $0x59c] sm:$0xf] }
 0x12a   :  { %2090 = vmatpush.bf16.msrb.mxu2 %v3577_v43  ;;  %v4285_v30 = vld [vmem:[#allocation4 + $0x4b4] sm:$0xf0]  ;;  %v4193_v43 = vld [vmem:[#allocation4 + $0x1dc] sm:$0xf] }
 0x12b   :  { %2103 = vmatpush.bf16.msrb.mxu3 %v3833_v48  ;;  %v3704_v33 = vld [vmem:[#allocation4 + $0x698] sm:$0xf]  ;;  %v3449_v42 = vor.u32 %v4285_v30, %v3448_v29  ;;  %v4652_v47 = vpop.f32.mrf.mxu0  ;;  %v3101_v57 = vor.u32 %v4193_v43, %v3098_v44  ;;  %v4377_v30 = vld [vmem:[#allocation4 + $0x79c] sm:$0xf] }
 0x12c   :  { %2066 = vmatpush.bf16.msrb.mxu0 %v3001_v53  ;;  %2079 = vmatpush.bf16.msrb.mxu1 %v3257_v56  ;;  %v4349_v34 = vld [vmem:[#allocation4 + $0x6b4] sm:$0xf0]  ;;  %v4654_v52 = vpop.f32.mrf.mxu1  ;;  %v4305_v43 = vld [vmem:[#allocation4 + $0x55c] sm:$0xf] }
 0x12d   :  { %v2872_v35 = vld [vmem:[#allocation4 + $0x18] sm:$0xf]  ;;  %v3705_v48 = vor.u32 %v4349_v34, %v3704_v33  ;;  %v3293_v33 = vor.u32 %v4241_v22, %v3290_v23  ;;  %v4169_v34 = vld [vmem:[#allocation4 + $0x11c] sm:$0xf] }
 0x12e   :  { %2091 = vmatpush.bf16.msrb.mxu2 %v3545_v60  ;;  %v4141_v38 = vld [vmem:[#allocation4 + $0x34] sm:$0xf0]  ;;  %v3357_v60 = vor.u32 %v4257_v46, %v3354_v49  ;;  %v3546_v44 = vld [vmem:[#allocation4 + $0x578] sm:$0xf0] }
 0x12f   :  { %2104 = vmatpush.bf16.msrb.mxu3 %v3801_v63  ;;  %v3128_v39 = vld [vmem:[#allocation4 + $0x218] sm:$0xf]  ;;  %v2873_v53 = vor.u32 %v4141_v38, %v2872_v35  ;;  %v4249_v63 = vld [vmem:[#allocation4 + $0x39c] sm:$0xf] }
 0x130   :  { %2067 = vmatpush.bf16.msrb.mxu0 %v2969_v2  ;;  %2080 = vmatpush.bf16.msrb.mxu1 %v3225_v6  ;;  %v4205_v41 = vld [vmem:[#allocation4 + $0x234] sm:$0xf0]  ;;  %v1788_v6 = vpop.f32.mrf.mxu2  ;;  %v3325_v15 = vor.u32 %v4249_v63, %v3322_v0  ;;  %v3002_v35 = vld [vmem:[#allocation4 + $0x138] sm:$0xf0] }
 0x131   :  { %v3416_v50 = vld [vmem:[#allocation4 + $0x458] sm:$0xf]  ;;  %v3129_v56 = vor.u32 %v4205_v41, %v3128_v39  ;;  %v1801_v11 = vpop.f32.mrf.mxu3  ;;  %v4233_v38 = vld [vmem:[#allocation4 + $0x31c] sm:$0xf] }
 0x132   :  { %2092 = vmatpush.bf16.msrb.mxu2 %v3513_v10  ;;  %v4277_v51 = vld [vmem:[#allocation4 + $0x474] sm:$0xf0]  ;;  %v3610_v10 = vld [vmem:[#allocation4 + $0x5f8] sm:$0xf0] }
 0x133   :  { %2105 = vmatpush.bf16.msrb.mxu3 %v3769_v14  ;;  %v3672_v54 = vld [vmem:[#allocation4 + $0x658] sm:$0xf]  ;;  %v3417_v61 = vor.u32 %v4277_v51, %v3416_v50  ;;  %v3866_v14 = vld [vmem:[#allocation4 + $0x7f8] sm:$0xf0]  ;;  %v1814_v19 = vpop.f32.mrf.mxu0 }
 0x134   :  { %2068 = vmatpush.bf16.msrb.mxu0 %v2937_v18  ;;  %2081 = vmatpush.bf16.msrb.mxu1 %v3193_v21  ;;  %v4341_v55 = vld [vmem:[#allocation4 + $0x674] sm:$0xf0]  ;;  %v3034_v18 = vld [vmem:[#allocation4 + $0x178] sm:$0xf0]  ;;  %v3613_v21 = vor.u32 %v4321_v8, %v3610_v10  ;;  %v3869_v25 = vor.u32 %v4385_v13, %v3866_v14 }
 0x135   :  { %v3673_v1 = vor.u32 %v4341_v55, %v3672_v54  ;;  %v3384_v2 = vld [vmem:[#allocation4 + $0x418] sm:$0xf]  ;;  %v3037_v29 = vor.u32 %v4177_v17, %v3034_v18  ;;  %v3258_v39 = vld [vmem:[#allocation4 + $0x338] sm:$0xf0]  ;;  %v3549_v55 = vor.u32 %v4305_v43, %v3546_v44 }
 0x136   :  { %2093 = vmatpush.bf16.msrb.mxu2 %v3481_v24  ;;  %v4269_v4 = vld [vmem:[#allocation4 + $0x434] sm:$0xf0]  ;;  %v1827_v24 = vpop.f32.mrf.mxu1  ;;  %v4369_v49 = vld [vmem:[#allocation4 + $0x75c] sm:$0xf]  ;;  %v3261_v51 = vor.u32 %v4233_v38, %v3258_v39 }
 0x137   :  { %2106 = vmatpush.bf16.msrb.mxu3 %v3737_v28  ;;  %v3640_v5 = vld [vmem:[#allocation4 + $0x618] sm:$0xf]  ;;  %v3385_v16 = vor.u32 %v4269_v4, %v3384_v2  ;;  %v3578_v28 = vld [vmem:[#allocation4 + $0x5b8] sm:$0xf0] }
 0x138   :  { %2069 = vmatpush.bf16.msrb.mxu0 %v2905_v32  ;;  %2082 = vmatpush.bf16.msrb.mxu1 %v3161_v37  ;;  %v4333_v7 = vld [vmem:[#allocation4 + $0x634] sm:$0xf0]  ;;  %v3834_v32 = vld [vmem:[#allocation4 + $0x7b8] sm:$0xf0]  ;;  %v3581_v37 = vor.u32 %v4313_v26, %v3578_v28  ;;  %v4658_v41 = vpop.f32.mrf.mxu2 }
 0x139   :  { %v3641_v20 = vor.u32 %v4333_v7, %v3640_v5  ;;  %v4660_v46 = vpop.f32.mrf.mxu3  ;;  %v3802_v50 = vld [vmem:[#allocation4 + $0x778] sm:$0xf0] }
 0x13a   :  { %2094 = vmatpush.bf16.msrb.mxu2 %v3449_v42  ;;  %v3837_v42 = vor.u32 %v4377_v30, %v3834_v32  ;;  %v2970_v54 = vld [vmem:[#allocation4 + $0xf8] sm:$0xf0] }
 0x13b   :  { %2107 = vmatpush.bf16.msrb.mxu3 %v3705_v48  ;;  %v3005_v48 = vor.u32 %v4169_v34, %v3002_v35  ;;  %v3770_v2 = vld [vmem:[#allocation4 + $0x738] sm:$0xf0] }
 0x13c   :  { %2070 = vmatpush.bf16.msrb.mxu0 %v2873_v53  ;;  %2083 = vmatpush.bf16.msrb.mxu1 %v3129_v56  ;;  %v4161_v53 = vld [vmem:[#allocation4 + $0xdc] sm:$0xf]  ;;  %v4664_v58 = vpop.f32.mrf.mxu0 }
 0x13d   :  { %v4225_v56 = vld [vmem:[#allocation4 + $0x2dc] sm:$0xf]  ;;  %v2973_v0 = vor.u32 %v4161_v53, %v2970_v54 }
 0x13e   :  { %2095 = vmatpush.bf16.msrb.mxu2 %v3417_v61  ;;  %v4297_v61 = vld [vmem:[#allocation4 + $0x51c] sm:$0xf]  ;;  %v4666_v63 = vpop.f32.mrf.mxu1 }
 0x13f   :  { %2108 = vmatpush.bf16.msrb.mxu3 %v3673_v1  ;;  %2071 = vmatmul.bf16.vlgmr.msrb.gmra.mxu0 %v4608_v40  ;;  %v4361_v1 = vld [vmem:[#allocation4 + $0x71c] sm:$0xf]  ;;  %v3517_v7 = vor.u32 %v4297_v61, %v3514_v62 }
 0x140   :  { %2115 = vmatpush.bf16.msra.mxu0 %v3101_v57  ;;  %2128 = vmatpush.bf16.msra.mxu1 %v3357_v60  ;;  %v3226_v57 = vld [vmem:[#allocation4 + $0x2f8] sm:$0xf0]  ;;  %v3805_v60 = vor.u32 %v4369_v49, %v3802_v50  ;;  %v1840_v11 = vpop.f32.mrf.mxu2 }
 0x141   :  { %2084 = vmatmul.bf16.vlgmr.msrb.gmra.mxu1 %v4610_v45  ;;  %v3229_v4 = vor.u32 %v4225_v56, %v3226_v57  ;;  %v4153_v5 = vld [vmem:[#allocation4 + $0x9c] sm:$0xf] }
 0x142   :  { %2096 = vmatpush.bf16.msrb.mxu2 %v3385_v16  ;;  %v2938_v6 = vld [vmem:[#allocation4 + $0xb8] sm:$0xf0] }
 0x143   :  { %2109 = vmatpush.bf16.msrb.mxu3 %v3641_v20  ;;  %v4217_v8 = vld [vmem:[#allocation4 + $0x29c] sm:$0xf]  ;;  %v2941_v16 = vor.u32 %v4153_v5, %v2938_v6  ;;  %v4396_v5 = vld [vmem:[#allocation6 + $0x30] sm:$0xff] }
 0x144   :  { %2116 = vmatpush.bf16.msra.mxu0 %v3069_v12  ;;  %2129 = vmatpush.bf16.msra.mxu1 %v3325_v15  ;;  %v3194_v10 = vld [vmem:[#allocation4 + $0x2b8] sm:$0xf0]  ;;  %v3773_v12 = vor.u32 %v4361_v1, %v3770_v2  ;;  %v1853_v15 = vpop.f32.mrf.mxu3  ;;  %v4404_v6 = vld [vmem:[#allocation6 + $0x70] sm:$0xff] }
 0x145   :  { %2097 = vmatmul.bf16.vlgmr.msrb.gmra.mxu2 %v4614_v3  ;;  %v4289_v13 = vld [vmem:[#allocation4 + $0x4dc] sm:$0xf]  ;;  %v3197_v19 = vor.u32 %v4217_v8, %v3194_v10  ;;  %v4403_v15 = vld [vmem:[#allocation6 + $0x68] sm:$0xff] }
 0x146   :  { %2141 = vmatpush.bf16.msra.mxu2 %v3613_v21  ;;  %2110 = vmatmul.bf16.vlgmr.msrb.gmra.mxu3 %v4616_v9  ;;  %v3482_v14 = vld [vmem:[#allocation4 + $0x4f8] sm:$0xf0]  ;;  %v1879_v30 = vpop.f32.mrf.mxu1 }
 0x147   :  { %2154 = vmatpush.bf16.msra.mxu3 %v3869_v25  ;;  %v4353_v17 = vld [vmem:[#allocation4 + $0x6dc] sm:$0xf]  ;;  %v3485_v22 = vor.u32 %v4289_v13, %v3482_v14  ;;  %v1866_v25 = vpop.f32.mrf.mxu0  ;;  %v4395_v14 = vld [vmem:[#allocation6 + $0x28] sm:$0xff]  ;;  %v4392_v30 = vld [vmem:[#allocation6 + $0x10] sm:$0xff] }
 0x148   :  { %2117 = vmatpush.bf16.msra.mxu0 %v3037_v29  ;;  %2130 = vmatpush.bf16.msra.mxu1 %v3293_v33  ;;  %v3738_v18 = vld [vmem:[#allocation4 + $0x6f8] sm:$0xf0]  ;;  %v4668_v50 = vpop.f32.mrf.mxu2  ;;  %v457_v25 = vperm.slane %v4639_v27, 2 }
 0x149   :  { %v4145_v20 = vld [vmem:[#allocation4 + $0x5c] sm:$0xf]  ;;  %v3741_v26 = vor.u32 %v4353_v17, %v3738_v18  ;;  %v4420_v17 = vld [vmem:[#allocation6 + $0xf0] sm:$0xff]  ;;  %v456_v18 = vperm.slane %v4639_v27, 1 }
 0x14a   :  { %2142 = vmatpush.bf16.msra.mxu2 %v3581_v37  ;;  %v2906_v21 = vld [vmem:[#allocation4 + $0x78] sm:$0xf0] }
 0x14b   :  { %2155 = vmatpush.bf16.msra.mxu3 %v3837_v42  ;;  %v4209_v23 = vld [vmem:[#allocation4 + $0x25c] sm:$0xf]  ;;  %v2909_v32 = vor.u32 %v4145_v20, %v2906_v21  ;;  %v4419_v21 = vld [vmem:[#allocation6 + $0xe8] sm:$0xff] }
 0x14c   :  { %2118 = vmatpush.bf16.msra.mxu0 %v3005_v48  ;;  %2131 = vmatpush.bf16.msra.mxu1 %v3261_v51  ;;  %v3162_v24 = vld [vmem:[#allocation4 + $0x278] sm:$0xf0]  ;;  %v4670_v51 = vpop.f32.mrf.mxu3 }
 0x14d   :  { %v4281_v28 = vld [vmem:[#allocation4 + $0x49c] sm:$0xf]  ;;  %v3165_v35 = vor.u32 %v4209_v23, %v3162_v24 }
 0x14e   :  { %2143 = vmatpush.bf16.msra.mxu2 %v3549_v55  ;;  %v3450_v29 = vld [vmem:[#allocation4 + $0x4b8] sm:$0xf0] }
 0x14f   :  { %2156 = vmatpush.bf16.msra.mxu3 %v3805_v60  ;;  %v4345_v33 = vld [vmem:[#allocation4 + $0x69c] sm:$0xf]  ;;  %v3453_v39 = vor.u32 %v4281_v28, %v3450_v29  ;;  %v4418_v28 = vld [vmem:[#allocation6 + $0xe0] sm:$0xff] }
 0x150   :  { %2119 = vmatpush.bf16.msra.mxu0 %v2973_v0  ;;  %2132 = vmatpush.bf16.msra.mxu1 %v3229_v4  ;;  %v3706_v34 = vld [vmem:[#allocation4 + $0x6b8] sm:$0xf0]  ;;  %v1892_v11 = vpop.f32.mrf.mxu2 }
 0x151   :  { %v4137_v37 = vld [vmem:[#allocation4 + $0x1c] sm:$0xf]  ;;  %v3709_v44 = vor.u32 %v4345_v33, %v3706_v34  ;;  %v4400_v33 = vld [vmem:[#allocation6 + $0x50] sm:$0xff] }
 0x152   :  { %2144 = vmatpush.bf16.msra.mxu2 %v3517_v7  ;;  %v2874_v38 = vld [vmem:[#allocation4 + $0x38] sm:$0xf0] }
 0x153   :  { %2157 = vmatpush.bf16.msra.mxu3 %v3773_v12  ;;  %v4201_v42 = vld [vmem:[#allocation4 + $0x21c] sm:$0xf]  ;;  %v2877_v53 = vor.u32 %v4137_v37, %v2874_v38 }
 0x154   :  { %2120 = vmatpush.bf16.msra.mxu0 %v2941_v16  ;;  %2133 = vmatpush.bf16.msra.mxu1 %v3197_v19  ;;  %v3130_v43 = vld [vmem:[#allocation4 + $0x238] sm:$0xf0]  ;;  %v1905_v12 = vpop.f32.mrf.mxu3  ;;  %v4412_v16 = vld [vmem:[#allocation6 + $0xb0] sm:$0xff]  ;;  %v4411_v19 = vld [vmem:[#allocation6 + $0xa8] sm:$0xff] }
 0x155   :  { %v4273_v48 = vld [vmem:[#allocation4 + $0x45c] sm:$0xf]  ;;  %v3133_v56 = vor.u32 %v4201_v42, %v3130_v43  ;;  %v4427_v12 = vld [vmem:[#allocation6 + $0x128] sm:$0xff] }
 0x156   :  { %2145 = vmatpush.bf16.msra.mxu2 %v3485_v22  ;;  %v3418_v49 = vld [vmem:[#allocation4 + $0x478] sm:$0xf0]  ;;  %v1813_v22 = vadd.f32 %v4652_v47, %v456_v18  ;;  %v1787_v47 = vadd.f32 %v4648_v31, %v4646_v59  ;;  %v4399_v59 = vld [vmem:[#allocation6 + $0x48] sm:$0xff] }
 0x157   :  { %2158 = vmatpush.bf16.msra.mxu3 %v3741_v26  ;;  %v4337_v54 = vld [vmem:[#allocation4 + $0x65c] sm:$0xf]  ;;  %v3421_v61 = vor.u32 %v4273_v48, %v3418_v49  ;;  %v458_v26 = vperm.slane %v4639_v27, 3 }
 0x158   :  { %2121 = vmatpush.bf16.msra.mxu0 %v2909_v32  ;;  %v3674_v55 = vld [vmem:[#allocation4 + $0x678] sm:$0xf0]  ;;  %2134 = vmatpush.bf16.msra.mxu1 %v3165_v35  ;;  %v1826_v29 = vadd.f32 %v4654_v52, %v1813_v22  ;;  %v1865_v32 = vadd.f32 %v4664_v58, %v457_v25  ;;  %v4391_v52 = vld [vmem:[#allocation6 + $0x8] sm:$0xff]  ;;  %v1800_v43 = vadd.f32 %v4650_v36, %v1787_v47  ;;  %v4398_v36 = vld [vmem:[#allocation6 + $0x40] sm:$0xff] }
 0x159   :  { %v4397_v57 = vld [vmem:[#allocation6 + $0x38] sm:$0xff]  ;;  %v3677_v62 = vor.u32 %v4337_v54, %v3674_v55  ;;  %v4432_v22 = vld [vmem:[#allocation6 + $0x150] sm:$0xff]  ;;  %v4422_v47 = vld [vmem:[#allocation6 + $0x100] sm:$0xff] }
 0x15a   :  { %2146 = vmatpush.bf16.msra.mxu2 %v3453_v39  ;;  %v4405_v60 = vld [vmem:[#allocation6 + $0x78] sm:$0xff]  ;;  %v1839_v34 = vadd.f32 %v4658_v41, %v1826_v29  ;;  %v4408_v41 = vld [vmem:[#allocation6 + $0x90] sm:$0xff] }
 0x15b   :  { %2159 = vmatpush.bf16.msra.mxu3 %v3709_v44  ;;  %v4265_v0 = vld [vmem:[#allocation4 + $0x41c] sm:$0xf]  ;;  %v1878_v44 = vadd.f32 %v4666_v63, %v1865_v32  ;;  %v4430_v32 = vld [vmem:[#allocation6 + $0x140] sm:$0xff] }
 0x15c   :  { %v3386_v1 = vld [vmem:[#allocation4 + $0x438] sm:$0xf0]  ;;  %2122 = vmatpush.bf16.msra.mxu0 %v2877_v53  ;;  %2135 = vmatpush.bf16.msra.mxu1 %v3133_v56  ;;  %v1916_v20 = vpop.f32.mrf.mxu0  ;;  %v1852_v31 = vadd.f32 %v4660_v46, %v1839_v34  ;;  %v4416_v53 = vld [vmem:[#allocation6 + $0xd0] sm:$0xff]  ;;  %v4390_v56 = vld [vmem:[#allocation6] sm:$0xff] }
 0x15d   :  { %v4329_v2 = vld [vmem:[#allocation4 + $0x61c] sm:$0xf]  ;;  %v3389_v7 = vor.u32 %v4265_v0, %v3386_v1  ;;  %v1917_v35 = vadd.f32 %v1916_v20, %v458_v26  ;;  %v1891_v48 = vadd.f32 %v4668_v50, %v1878_v44  ;;  %v4415_v0 = vld [vmem:[#allocation6 + $0xc8] sm:$0xff]  ;;  %v459_v20 = vperm.slane %v4639_v27, 4 }
 0x15e   :  { %v3642_v4 = vld [vmem:[#allocation4 + $0x638] sm:$0xf0]  ;;  %2147 = vmatpush.bf16.msra.mxu2 %v3421_v61  ;;  %v1929_v23 = vpop.f32.mrf.mxu1  ;;  %v4407_v61 = vld [vmem:[#allocation6 + $0x88] sm:$0xff] }
 0x15f   :  { %2160 = vmatpush.bf16.msra.mxu3 %v3677_v62  ;;  %2123 = vmatmul.bf16.vlgmr.msra.gmra.mxu0 %v4608_v40  ;;  %v3645_v8 = vor.u32 %v4329_v2, %v3642_v4  ;;  %v4413_v10 = vld [vmem:[#allocation6 + $0xb8] sm:$0xff]  ;;  %v4394_v40 = vld [vmem:[#allocation6 + $0x20] sm:$0xff]  ;;  %v1930_v58 = vadd.f32 %v1929_v23, %v1917_v35  ;;  %v1904_v62 = vadd.f32 %v4670_v51, %v1891_v48  ;;  %v4428_v2 = vld [vmem:[#allocation6 + $0x130] sm:$0xff] }
 0x160   :  { %2699 = vmatpush.bf16.msrb.mxu0 %v4397_v57  ;;  %2712 = vmatpush.bf16.msrb.mxu1 %v4405_v60  ;;  %v4421_v13 = vld [vmem:[#allocation6 + $0xf8] sm:$0xff]  ;;  %v2167_v57 = vmax.f32 %v1800_v43, 0.0  ;;  %v2168_v60 = vmax.f32 %v1852_v31, 0.0  ;;  %v4431_v26 = vld [vmem:[#allocation6 + $0x148] sm:$0xff]  ;;  %v4442_v43 = vld [vmem:[#allocation6 + $0x1a0] sm:$0xff] }
 0x161   :  { %2136 = vmatmul.bf16.vlgmr.msra.gmra.mxu1 %v4610_v45  ;;  %v4402_v45 = vld [vmem:[#allocation6 + $0x60] sm:$0xff]  ;;  %v4393_v24 = vld [vmem:[#allocation6 + $0x18] sm:$0xff] }
 0x162   :  { %2148 = vmatpush.bf16.msra.mxu2 %v3389_v7  ;;  %v4409_v37 = vld [vmem:[#allocation6 + $0x98] sm:$0xff]  ;;  %v2175_v1 = vpack.c.bf16 %v2167_v57, %v2167_v57  ;;  %v2176_v4 = vpack.c.bf16 %v2168_v60, %v2168_v60  ;;  %v2169_v7 = vmax.f32 %v1904_v62, 0.0  ;;  %v4452_v62 = vld [vmem:[#allocation6 + $0x1f0] sm:$0xff] }
 0x163   :  { %2161 = vmatpush.bf16.msra.mxu3 %v3645_v8  ;;  %v4417_v39 = vld [vmem:[#allocation6 + $0xd8] sm:$0xff] }
 0x164   :  { %2700 = vmatpush.bf16.msrb.mxu0 %v4396_v5  ;;  %2713 = vmatpush.bf16.msrb.mxu1 %v4404_v6  ;;  %v1918_v38 = vpop.f32.mrf.mxu0  ;;  %v4429_v63 = vld [vmem:[#allocation6 + $0x138] sm:$0xff]  ;;  %v4406_v5 = vld [vmem:[#allocation6 + $0x80] sm:$0xff]  ;;  %v4436_v6 = vld [vmem:[#allocation6 + $0x170] sm:$0xff] }
 0x165   :  { %2149 = vmatmul.bf16.vlgmr.msra.gmra.mxu2 %v4614_v3  ;;  %v4401_v3 = vld [vmem:[#allocation6 + $0x58] sm:$0xff] }
 0x166   :  { %2725 = vmatpush.bf16.msrb.mxu2 %v4413_v10  ;;  %2162 = vmatmul.bf16.vlgmr.msra.gmra.mxu3 %v4616_v9  ;;  %v4410_v9 = vld [vmem:[#allocation6 + $0xa0] sm:$0xff]  ;;  %v1931_v42 = vpop.f32.mrf.mxu1  ;;  %v4437_v46 = vld [vmem:[#allocation6 + $0x178] sm:$0xff] }
 0x167   :  { %2738 = vmatpush.bf16.msrb.mxu3 %v4421_v13  ;;  %v4414_v10 = vld [vmem:[#allocation6 + $0xc0] sm:$0xff]  ;;  %v4435_v13 = vld [vmem:[#allocation6 + $0x168] sm:$0xff]  ;;  %v4445_v34 = vld [vmem:[#allocation6 + $0x1b8] sm:$0xff] }
 0x168   :  { %2701 = vmatpush.bf16.msrb.mxu0 %v4395_v14  ;;  %2714 = vmatpush.bf16.msrb.mxu1 %v4403_v15  ;;  %v1942_v49 = vpop.f32.mrf.mxu2  ;;  %v2177_v14 = vpack.c.bf16 %v2169_v7, %v2169_v7 }
 0x169   :  { %v1943_v54 = vadd.f32 %v1942_v49, %v1930_v58  ;;  %v1955_v55 = vpop.f32.mrf.mxu3  ;;  %v460_v58 = vperm.slane %v4639_v27, 5 }
 0x16a   :  { %2726 = vmatpush.bf16.msrb.mxu2 %v4412_v16  ;;  %v4426_v16 = vld [vmem:[#allocation6 + $0x120] sm:$0xff] }
 0x16b   :  { %2739 = vmatpush.bf16.msrb.mxu3 %v4420_v17  ;;  %v1956_v50 = vadd.f32 %v1955_v55, %v1943_v54  ;;  %v4434_v17 = vld [vmem:[#allocation6 + $0x160] sm:$0xff]  ;;  %v4439_v54 = vld [vmem:[#allocation6 + $0x188] sm:$0xff] }
 0x16c   :  { %2702 = vmatpush.bf16.msrb.mxu0 %v4394_v40  ;;  %2715 = vmatpush.bf16.msrb.mxu1 %v4402_v45  ;;  %v4425_v45 = vld [vmem:[#allocation6 + $0x118] sm:$0xff] }
 0x16d   :  { %v2170_v11 = vmax.f32 %v1956_v50, 0.0 }
 0x16e   :  { %2727 = vmatpush.bf16.msrb.mxu2 %v4411_v19  ;;  %v4433_v19 = vld [vmem:[#allocation6 + $0x158] sm:$0xff] }
 0x16f   :  { %2740 = vmatpush.bf16.msrb.mxu3 %v4419_v21  ;;  %v2178_v15 = vpack.c.bf16 %v2170_v11, %v2170_v11  ;;  %v4424_v21 = vld [vmem:[#allocation6 + $0x110] sm:$0xff] }
 0x170   :  { %2703 = vmatpush.bf16.msrb.mxu0 %v4393_v24  ;;  %2716 = vmatpush.bf16.msrb.mxu1 %v4401_v3  ;;  %v1944_v8 = vpop.f32.mrf.mxu2  ;;  %v4423_v3 = vld [vmem:[#allocation6 + $0x108] sm:$0xff] }
 0x171   :  { %v1957_v51 = vpop.f32.mrf.mxu3  ;;  %v461_v8 = vperm.slane %v4639_v27, 6 }
 0x172   :  { %2728 = vmatpush.bf16.msrb.mxu2 %v4410_v9 }
 0x173   :  { %2741 = vmatpush.bf16.msrb.mxu3 %v4418_v28 }
 0x174   :  { %2704 = vmatpush.bf16.msrb.mxu0 %v4392_v30  ;;  %2717 = vmatpush.bf16.msrb.mxu1 %v4400_v33 }
 0x176   :  { %2729 = vmatpush.bf16.msrb.mxu2 %v4409_v37  ;;  %v4444_v37 = vld [vmem:[#allocation6 + $0x1b0] sm:$0xff] }
 0x177   :  { %2742 = vmatpush.bf16.msrb.mxu3 %v4417_v39 }
 0x178   :  { %2705 = vmatpush.bf16.msrb.mxu0 %v4391_v52  ;;  %2718 = vmatpush.bf16.msrb.mxu1 %v4399_v59  ;;  %v4443_v52 = vld [vmem:[#allocation6 + $0x1a8] sm:$0xff]  ;;  %v4441_v59 = vld [vmem:[#allocation6 + $0x198] sm:$0xff] }
 0x17a   :  { %2730 = vmatpush.bf16.msrb.mxu2 %v4408_v41  ;;  %v4440_v41 = vld [vmem:[#allocation6 + $0x190] sm:$0xff] }
 0x17b   :  { %2743 = vmatpush.bf16.msrb.mxu3 %v4416_v53 }
 0x17c   :  { %2706 = vmatpush.bf16.msrb.mxu0 %v4390_v56  ;;  %2719 = vmatpush.bf16.msrb.mxu1 %v4398_v36  ;;  %v1968_v18 = vpop.f32.mrf.mxu0 }
 0x17d   :  { %v1969_v23 = vadd.f32 %v1968_v18, %v459_v20  ;;  %v4446_v18 = vld [vmem:[#allocation6 + $0x1c0] sm:$0xff] }
 0x17e   :  { %2731 = vmatpush.bf16.msrb.mxu2 %v4407_v61  ;;  %v1981_v40 = vpop.f32.mrf.mxu1  ;;  %v4453_v61 = vld [vmem:[#allocation6 + $0x1f8] sm:$0xff] }
 0x17f   :  { %2744 = vmatpush.bf16.msrb.mxu3 %v4415_v0  ;;  %2707 = vmatmul.bf16.vlgmr.msrb.gmra.mxu0 %v2175_v1  ;;  %v1982_v9 = vadd.f32 %v1981_v40, %v1969_v23 }
 0x180   :  { %2751 = vmatpush.bf16.msra.mxu0 %v4429_v63  ;;  %2764 = vmatpush.bf16.msra.mxu1 %v4437_v46  ;;  %v4438_v63 = vld [vmem:[#allocation6 + $0x180] sm:$0xff] }
 0x181   :  { %2720 = vmatmul.bf16.vlgmr.msrb.gmra.mxu1 %v2176_v4  ;;  %v4450_v4 = vld [vmem:[#allocation6 + $0x1e0] sm:$0xff] }
 0x182   :  { %2732 = vmatpush.bf16.msrb.mxu2 %v4406_v5 }
 0x183   :  { %2745 = vmatpush.bf16.msrb.mxu3 %v4414_v10  ;;  %v4448_v10 = vld [vmem:[#allocation6 + $0x1d0] sm:$0xff] }
 0x184   :  { %2752 = vmatpush.bf16.msra.mxu0 %v4428_v2  ;;  %2765 = vmatpush.bf16.msra.mxu1 %v4436_v6  ;;  %v1970_v24 = vpop.f32.mrf.mxu0  ;;  %v4451_v2 = vld [vmem:[#allocation6 + $0x1e8] sm:$0xff]  ;;  %v4449_v6 = vld [vmem:[#allocation6 + $0x1d8] sm:$0xff] }
 0x185   :  { %2733 = vmatmul.bf16.vlgmr.msrb.gmra.mxu2 %v2177_v14  ;;  %v462_v24 = vperm.slane %v4639_v27, 7 }
 0x186   :  { %2746 = vmatmul.bf16.vlgmr.msrb.gmra.mxu3 %v2178_v15  ;;  %v1983_v25 = vpop.f32.mrf.mxu1  ;;  %2777 = vmatpush.bf16.msra.mxu2 %v4445_v34 }
 0x187   :  { %2790 = vmatpush.bf16.msra.mxu3 %v4453_v61 }
 0x188   :  { %2753 = vmatpush.bf16.msra.mxu0 %v4427_v12  ;;  %2766 = vmatpush.bf16.msra.mxu1 %v4435_v13  ;;  %v1994_v28 = vpop.f32.mrf.mxu2  ;;  %v4447_v13 = vld [vmem:[#allocation6 + $0x1c8] sm:$0xff] }
 0x189   :  { %v1995_v29 = vadd.f32 %v1994_v28, %v1982_v9  ;;  %v2007_v30 = vpop.f32.mrf.mxu3 }
 0x18a   :  { %2778 = vmatpush.bf16.msra.mxu2 %v4444_v37  ;;  %v4463_v37 = vld [vmem:[%s4706_s6] ss:$0 sm:$0xff] }
 0x18b   :  { %v2008_v33 = vadd.f32 %v2007_v30, %v1995_v29  ;;  %2791 = vmatpush.bf16.msra.mxu3 %v4452_v62 }
 0x18c   :  { %2754 = vmatpush.bf16.msra.mxu0 %v4426_v16  ;;  %2767 = vmatpush.bf16.msra.mxu1 %v4434_v17 }
 0x18d   :  { %v2171_v35 = vmax.f32 %v2008_v33, 0.0 }
 0x18e   :  { %2779 = vmatpush.bf16.msra.mxu2 %v4443_v52 }
 0x18f   :  { %v2179_v38 = vpack.c.bf16 %v2171_v35, %v2171_v35  ;;  %2792 = vmatpush.bf16.msra.mxu3 %v4451_v2 }
 0x190   :  { %2755 = vmatpush.bf16.msra.mxu0 %v4425_v45  ;;  %2768 = vmatpush.bf16.msra.mxu1 %v4433_v19  ;;  %v1996_v39 = vpop.f32.mrf.mxu2 }
 0x191   :  { %v2009_v42 = vpop.f32.mrf.mxu3 }
 0x192   :  { %2780 = vmatpush.bf16.msra.mxu2 %v4442_v43 }
 0x193   :  { %2793 = vmatpush.bf16.msra.mxu3 %v4450_v4 }
 0x194   :  { %2756 = vmatpush.bf16.msra.mxu0 %v4424_v21  ;;  %2769 = vmatpush.bf16.msra.mxu1 %v4432_v22 }
 0x196   :  { %2781 = vmatpush.bf16.msra.mxu2 %v4441_v59 }
 0x197   :  { %2794 = vmatpush.bf16.msra.mxu3 %v4449_v6 }
 0x198   :  { %2757 = vmatpush.bf16.msra.mxu0 %v4423_v3  ;;  %2770 = vmatpush.bf16.msra.mxu1 %v4431_v26 }
 0x19a   :  { %2782 = vmatpush.bf16.msra.mxu2 %v4440_v41 }
 0x19b   :  { %2795 = vmatpush.bf16.msra.mxu3 %v4448_v10 }
 0x19c   :  { %2758 = vmatpush.bf16.msra.mxu0 %v4422_v47  ;;  %2771 = vmatpush.bf16.msra.mxu1 %v4430_v32  ;;  %v2020_v44 = vpop.f32.mrf.mxu0 }
 0x19d   :  { %v2021_v48 = vadd.f32 %v2020_v44, %v460_v58 }
 0x19e   :  { %v2033_v31 = vpop.f32.mrf.mxu1  ;;  %2783 = vmatpush.bf16.msra.mxu2 %v4439_v54 }
 0x19f   :  { %2759 = vmatmul.bf16.vlgmr.msra.gmra.mxu0 %v2179_v38  ;;  %v2034_v55 = vadd.f32 %v2033_v31, %v2021_v48  ;;  %2796 = vmatpush.bf16.msra.mxu3 %v4447_v13 }
 0x1a2   :  { %2784 = vmatpush.bf16.msra.mxu2 %v4438_v63 }
 0x1a3   :  { %2797 = vmatpush.bf16.msra.mxu3 %v4446_v18 }
 0x1a4   :  { %v2022_v49 = vpop.f32.mrf.mxu0 }
 0x1a6   :  { %v2035_v53 = vpop.f32.mrf.mxu1 }
 0x1a8   :  { %v2046_v56 = vpop.f32.mrf.mxu2 }
 0x1a9   :  { %v2047_v57 = vadd.f32 %v2046_v56, %v2034_v55  ;;  %v2059_v36 = vpop.f32.mrf.mxu3 }
 0x1ab   :  { %v2060_v60 = vadd.f32 %v2059_v36, %v2047_v57 }
 0x1ad   :  { %v2172_v46 = vmax.f32 %v2060_v60, 0.0 }
 0x1af   :  { %v2180_v0 = vpack.c.bf16 %v2172_v46, %v2172_v46 }
 0x1b0   :  { %v2048_v50 = vpop.f32.mrf.mxu2 }
 0x1b1   :  { %v2061_v1 = vpop.f32.mrf.mxu3  ;;  %2772 = vmatmul.bf16.vlgmr.msra.gmra.mxu1 %v2180_v0 }
 0x1bc   :  { %v2072_v5 = vpop.f32.mrf.mxu0 }
 0x1bd   :  { %v2073_v11 = vadd.f32 %v2072_v5, %v461_v8 }
 0x1be   :  { %v2085_v7 = vpop.f32.mrf.mxu1 }
 0x1bf   :  { %v2086_v14 = vadd.f32 %v2085_v7, %v2073_v11 }
 0x1c4   :  { %v2074_v51 = vpop.f32.mrf.mxu0 }
 0x1c6   :  { %v2087_v12 = vpop.f32.mrf.mxu1 }
 0x1c8   :  { %v2098_v15 = vpop.f32.mrf.mxu2 }
 0x1c9   :  { %v2099_v16 = vadd.f32 %v2098_v15, %v2086_v14  ;;  %v2111_v17 = vpop.f32.mrf.mxu3 }
 0x1cb   :  { %v2112_v40 = vadd.f32 %v2111_v17, %v2099_v16 }
 0x1cd   :  { %v2173_v45 = vmax.f32 %v2112_v40, 0.0 }
 0x1cf   :  { %v2181_v19 = vpack.c.bf16 %v2173_v45, %v2173_v45 }
 0x1d0   :  { %v2100_v20 = vpop.f32.mrf.mxu2 }
 0x1d1   :  { %v2113_v21 = vpop.f32.mrf.mxu3  ;;  %2785 = vmatmul.bf16.vlgmr.msra.gmra.mxu2 %v2181_v19 }
 0x1dc   :  { %v2124_v22 = vpop.f32.mrf.mxu0 }
 0x1dd   :  { %v2125_v25 = vadd.f32 %v2124_v22, %v462_v24 }
 0x1de   :  { %v2137_v23 = vpop.f32.mrf.mxu1 }
 0x1df   :  { %v2138_v9 = vadd.f32 %v2137_v23, %v2125_v25 }
 0x1e4   :  { %v2126_v3 = vpop.f32.mrf.mxu0 }
 0x1e6   :  { %v2139_v26 = vpop.f32.mrf.mxu1 }
 0x1e8   :  { %v2150_v28 = vpop.f32.mrf.mxu2 }
 0x1e9   :  { %v2151_v29 = vadd.f32 %v2150_v28, %v2138_v9  ;;  %v2163_v30 = vpop.f32.mrf.mxu3 }
 0x1eb   :  { %v2164_v47 = vadd.f32 %v2163_v30, %v2151_v29 }
 0x1ed   :  { %v2174_v32 = vmax.f32 %v2164_v47, 0.0 }
 0x1ef   :  { %v2182_v33 = vpack.c.bf16 %v2174_v32, %v2174_v32 }
 0x1f0   :  { %v2152_v34 = vpop.f32.mrf.mxu2 }
 0x1f1   :  { %v2165_v35 = vpop.f32.mrf.mxu3  ;;  %2798 = vmatmul.bf16.vlgmr.msra.gmra.mxu3 %v2182_v33 }
 0x1fc   :  { %v2708_v38 = vpop.f32.mrf.mxu0 }
 0x1fd   :  { %v2709_v39 = vadd.f32 %v4463_v37, %v2708_v38 }
 0x1fe   :  { %v2721_v27 = vpop.f32.mrf.mxu1 }
 0x1ff   :  { %v2722_v42 = vadd.f32 %v2721_v27, %v2709_v39 }
 0x204   :  { %v2710_v52 = vpop.f32.mrf.mxu0 }
 0x206   :  { %v2723_v43 = vpop.f32.mrf.mxu1 }
 0x208   :  { %v2734_v44 = vpop.f32.mrf.mxu2 }
 0x209   :  { %v2735_v59 = vadd.f32 %v2734_v44, %v2722_v42  ;;  %v2747_v31 = vpop.f32.mrf.mxu3 }
 0x20b   :  { %v2748_v58 = vadd.f32 %v2747_v31, %v2735_v59 }
 0x210   :  { %v2736_v41 = vpop.f32.mrf.mxu2 }
 0x211   :  { %v2749_v48 = vpop.f32.mrf.mxu3 }
 0x21c   :  { %v2760_v49 = vpop.f32.mrf.mxu0 }
 0x21d   :  { %v2761_v53 = vadd.f32 %v2760_v49, %v2748_v58 }
 0x224   :  { %v2762_v54 = vpop.f32.mrf.mxu0 }
 0x22e   :  { %v2773_v55 = vpop.f32.mrf.mxu1 }
 0x22f   :  { %v2774_v63 = vadd.f32 %v2773_v55, %v2761_v53 }
 0x236   :  { %v2775_v56 = vpop.f32.mrf.mxu1 }
 0x254   :  { %v2786_v57 = vpop.f32.mrf.mxu2 }
 0x255   :  { %v2787_v60 = vadd.f32 %v2786_v57, %v2774_v63 }
 0x25c   :  { %v2788_v36 = vpop.f32.mrf.mxu2 }
 0x274   :  { %v2799_v61 = vpop.f32.mrf.mxu3 }
 0x275   :  { %v2800_v46 = vadd.f32 %v2799_v61, %v2787_v60 }
 0x277   :  { %2803 = vst [vmem:[%s4707_s7] sm:$0xff] %v2800_v46 }
 0x27c   :  { %v2801_v62 = vpop.f32.mrf.mxu3 }
 0x27d   :  { %2808 = vsyncpa [#allocation3], 1 }
 0x27e   :  { %2809 = vsyncpa [#allocation5], 1 }

</bundles_post_ra>
